<compile_context>
chip_gen: v6e
topology: v6e:2x2x1
jax: 0.10.0
libtpu: 0.0.40
codegen_flags: <defaults>
</compile_context>

<pallas_src>
import math

import jax
import jax.numpy as jnp
from jax import lax
from jax.experimental import pallas as pl
from jax.experimental.pallas import tpu as pltpu

TEXT_DIM = 64    # text_in_dim == corre_dim
IMAGE_DIM = 64   # image_in_dim
OUT_DIM = 64     # corre_out_dim
OUT_PAD = 128    # lane-dense padded output width (multiple of 128)


def _compute_dtype():
    """bf16 for the dominant exp tensor on bf16-native VPU/EUP chips (v6e/v7x);
    f32 everywhere else (v5e has no bf16 VPU/EUP path -> bf16 would regress)."""
    try:
        kind = jax.devices()[0].device_kind.lower()
    except Exception:
        return jnp.float32
    if ("v6" in kind) or ("v7" in kind) or ("7x" in kind):
        return jnp.bfloat16
    return jnp.float32


def _pick_tile(batch):
    """Batch tile: multiple of 16 (so each half-tile is sublane aligned and the
    output store stays an unmasked vst), capped so per-step VMEM stays small."""
    if batch >= 256:
        return 256
    return max(16, ((batch + 15) // 16) * 16)


def _cross_module_kernel(inv_sqrt_d, compute_dtype):
    """Fused: outer-product similarity -> softmax -> max-pool(1) ->
    Linear (+ folded eval-BatchNorm) -> ReLU, lane-dense over two half-tiles."""

    def kernel(text_ref, image_ref, w_ref, b_ref, o_ref):
        t = text_ref[...]                              # (TB, 64) f32
        v = image_ref[...] * inv_sqrt_d                # (TB, 64) f32 (fold 1/sqrt(Dt))
        if compute_dtype != jnp.float32:
            t = t.astype(compute_dtype)
            v = v.astype(compute_dtype)

        half = t.shape[0] // 2                         # TB/2, multiple of 8
        t_lo, t_hi = t[:half], t[half:]                # (H, 64)
        v_lo, v_hi = v[:half], v[half:]                # (H, 64)

        # Pack the two half-tiles' image vectors side by side -> 128 dense lanes.
        v_pair = jnp.concatenate([v_lo, v_hi], axis=-1)          # (H, 128)

        # Algebraic row max of s[b,i,:] = t[b,i] * v[b,:]  (no big XLU reduce):
        vmax_lo = jnp.max(v_lo, axis=-1, keepdims=True)          # (H, 1)
        vmin_lo = jnp.min(v_lo, axis=-1, keepdims=True)
        vmax_hi = jnp.max(v_hi, axis=-1, keepdims=True)
        vmin_hi = jnp.min(v_hi, axis=-1, keepdims=True)
        m_lo = jnp.where(t_lo >= 0, t_lo * vmax_lo, t_lo * vmin_lo)   # (H, 64)
        m_hi = jnp.where(t_hi >= 0, t_hi * vmax_hi, t_hi * vmin_hi)   # (H, 64)

        lane = lax.broadcasted_iota(jnp.int32, (1, 1, 2 * IMAGE_DIM), 2)
        is_lo = lane < IMAGE_DIM                                  # (1, 1, 128)

        # Lane-dense exp argument: lanes [0,64) carry the low half-tile batches,
        # lanes [64,128) the high half-tile batches.
        t_sel = jnp.where(is_lo, t_lo[:, :, None], t_hi[:, :, None])   # (H, 64, 128)
        m_sel = jnp.where(is_lo, m_lo[:, :, None], m_hi[:, :, None])   # (H, 64, 128)
        e = jnp.exp(t_sel * v_pair[:, None, :] - m_sel)                # (H, 64, 128)

        # max_j softmax == 1 / sum_j exp(s - m); accumulate denominators in f32.
        e32 = e.astype(jnp.float32)
        d_lo = jnp.sum(jnp.where(is_lo, e32, 0.0), axis=-1)            # (H, 64)
        d_hi = jnp.sum(e32, axis=-1) - d_lo                            # (H, 64)
        denom = jnp.concatenate([d_lo, d_hi], axis=0)                  # (TB, 64) f32
        corr_p = pl.reciprocal(denom, approx=True)                     # EUP vrcp

        # Linear + folded eval-BN + ReLU in f32 (MXU is idle at this shape).
        y = jnp.dot(corr_p, w_ref[...], preferred_element_type=jnp.float32)  # (TB, 128)
        o_ref[...] = jnp.maximum(y + b_ref[...], 0.0)                  # lane-dense store

    return kernel


def cross_module_forward(params, text, image):
    batch, dt = text.shape
    tb = _pick_tile(batch)
    b_pad = ((batch + tb - 1) // tb) * tb
    if b_pad != batch:
        pad = b_pad - batch
        text = jnp.pad(text, ((0, pad), (0, 0)))
        image = jnp.pad(image, ((0, pad), (0, 0)))

    cost = pl.CostEstimate(
        flops=int(b_pad * (8 * dt * IMAGE_DIM + 2 * dt * OUT_PAD)),
        transcendentals=int(b_pad * dt * IMAGE_DIM),
        bytes_accessed=int(b_pad * (dt + IMAGE_DIM + OUT_PAD) * 4
                           + (dt * OUT_PAD + OUT_PAD) * 4),
    )

    out_padded = pl.pallas_call(
        _cross_module_kernel(1.0 / math.sqrt(dt), _compute_dtype()),
        out_shape=jax.ShapeDtypeStruct((b_pad, OUT_PAD), jnp.float32),
        grid=(b_pad // tb,),
        in_specs=[
            pl.BlockSpec((tb, dt), lambda i: (i, 0)),          # text tile
            pl.BlockSpec((tb, IMAGE_DIM), lambda i: (i, 0)),   # image tile
            pl.BlockSpec((dt, OUT_PAD), lambda i: (0, 0)),     # W (pinned)
            pl.BlockSpec((1, OUT_PAD), lambda i: (0, 0)),      # bias (pinned)
        ],
        out_specs=pl.BlockSpec((tb, OUT_PAD), lambda i: (i, 0)),
        compiler_params=pltpu.CompilerParams(
            dimension_semantics=("parallel",),
            vmem_limit_bytes=32 * 1024 * 1024,
        ),
        cost_estimate=cost,
    )(text, image, params["w"], params["b"])
    return out_padded[:batch, :OUT_DIM]


def init_params(key, eps=1e-5):
    """Linear(64, 64) with PyTorch-default init + eval-mode BatchNorm1d(64)
    folded into one f32 weight / bias, zero-padded to OUT_PAD output lanes."""
    # TODO(synk): train-mode BatchNorm (batch statistics) is not representable in
    # this stateless fold; eval-mode running statistics are assumed.
    kw, kb, kg, kbe, km, kv = jax.random.split(key, 6)

    bound = 1.0 / math.sqrt(TEXT_DIM)
    w = jax.random.uniform(kw, (TEXT_DIM, OUT_DIM), jnp.float32, -bound, bound)
    b = jax.random.uniform(kb, (OUT_DIM,), jnp.float32, -bound, bound)

    # Synthetic eval-mode BN stats (deterministic).
    gamma = 1.0 + 0.1 * jax.random.normal(kg, (OUT_DIM,), jnp.float32)
    beta = 0.1 * jax.random.normal(kbe, (OUT_DIM,), jnp.float32)
    mean = 0.1 * jax.random.normal(km, (OUT_DIM,), jnp.float32)
    var = 0.5 + jax.random.uniform(kv, (OUT_DIM,), jnp.float32)

    scale = gamma / jnp.sqrt(var + eps)               # BN folded: y = (xW+b)*s + t
    w_fold = w * scale[None, :]
    b_fold = (b - mean) * scale + beta

    # Zero-pad to 128 output lanes; padded channels stay exactly 0 after ReLU.
    w_pad = jnp.zeros((TEXT_DIM, OUT_PAD), jnp.float32).at[:, :OUT_DIM].set(w_fold)
    b_pad = jnp.zeros((1, OUT_PAD), jnp.float32).at[:, :OUT_DIM].set(b_fold)
    return {"w": w_pad, "b": b_pad}


def _reference(params, text, image):
    """Pure-JAX reference of the fused module (eval-mode BN already folded)."""
    d = text.shape[1]
    sim = text[:, :, None] * image[:, None, :] / math.sqrt(d)
    corr = jax.nn.softmax(sim, axis=-1)
    corr_p = jnp.max(corr, axis=-1)
    y = corr_p @ params["w"][:, :OUT_DIM] + params["b"][0, :OUT_DIM]
    return jnp.maximum(y, 0.0)


if __name__ == "__main__":
    key = jax.random.PRNGKey(0)
    kp, kt, ki = jax.random.split(key, 3)
    params = init_params(kp)

    B = 2  # batch > 1 so the PyTorch .squeeze() yields (B, 64), matching this layout
    text = jax.random.normal(kt, (B, TEXT_DIM), dtype=jnp.float32)
    image = jax.random.normal(ki, (B, IMAGE_DIM), dtype=jnp.float32)

    fwd = jax.jit(cross_module_forward)
    out = fwd(params, text, image)
    jax.block_until_ready(out)

    assert out.shape == (B, OUT_DIM)
    assert jnp.all(jnp.isfinite(out))

    ref = _reference(params, text, image)
    max_err = float(jnp.max(jnp.abs(out - ref)))
    assert max_err < 5e-2, f"mismatch vs reference: max_err={max_err}"

    print("KERNEL_OK")
</pallas_src>

<mosaic_0001>
module attributes {stable_mosaic.version = 11 : i64} {
  func.func @kernel(%arg0: i32, %arg1: memref<16x64xf32, #tpu.memory_space<vmem>>, %arg2: memref<16x64xf32, #tpu.memory_space<vmem>>, %arg3: memref<64x128xf32, #tpu.memory_space<vmem>>, %arg4: memref<1x128xf32, #tpu.memory_space<vmem>>, %arg5: memref<16x128xf32, #tpu.memory_space<vmem>>) attributes {dimension_semantics = [#tpu.dimension_semantics<parallel>], iteration_bounds = array<i64: 1>, scalar_prefetch = 0 : i64, scratch_operands = 0 : i64, tpu.core_type = #tpu.core_type<tc>, window_params = [{transform_indices = @transform_0, window_bounds = array<i64: 16, 64>}, {transform_indices = @transform_1, window_bounds = array<i64: 16, 64>}, {pipeline_mode = #tpu.pipeline_mode<synchronous>, transform_indices = @transform_2, window_bounds = array<i64: 64, 128>}, {pipeline_mode = #tpu.pipeline_mode<synchronous>, transform_indices = @transform_3, window_bounds = array<i64: 1, 128>}, {transform_indices = @transform_4, window_bounds = array<i64: 16, 128>}]} {
    %c0 = arith.constant 0 : index
    %c0_0 = arith.constant 0 : index
    %0 = vector.load %arg1[%c0, %c0_0] : memref<16x64xf32, #tpu.memory_space<vmem>>, vector<16x64xf32>
    %c0_1 = arith.constant 0 : index
    %c0_2 = arith.constant 0 : index
    %1 = vector.load %arg2[%c0_1, %c0_2] : memref<16x64xf32, #tpu.memory_space<vmem>>, vector<16x64xf32>
    %cst = arith.constant 1.250000e-01 : f32
    %2 = vector.broadcast %cst : f32 to vector<16x64xf32>
    %3 = arith.mulf %1, %2 : vector<16x64xf32>
    %4 = vector.extract_strided_slice %0 {offsets = [0, 0], sizes = [8, 64], strides = [1, 1]} : vector<16x64xf32> to vector<8x64xf32>
    %5 = vector.extract_strided_slice %0 {offsets = [8, 0], sizes = [8, 64], strides = [1, 1]} : vector<16x64xf32> to vector<8x64xf32>
    %6 = vector.extract_strided_slice %3 {offsets = [0, 0], sizes = [8, 64], strides = [1, 1]} : vector<16x64xf32> to vector<8x64xf32>
    %7 = vector.extract_strided_slice %3 {offsets = [8, 0], sizes = [8, 64], strides = [1, 1]} : vector<16x64xf32> to vector<8x64xf32>
    %8 = tpu.concatenate %6, %7 in 1 : vector<8x64xf32>, vector<8x64xf32> -> vector<8x128xf32>
    %cst_3 = arith.constant dense<0xFF800000> : vector<8xf32>
    %9 = vector.multi_reduction <maximumf>, %6, %cst_3 [1] : vector<8x64xf32> to vector<8xf32>
    %10 = vector.shape_cast %9 : vector<8xf32> to vector<8x1xf32>
    %cst_4 = arith.constant dense<0x7F800000> : vector<8xf32>
    %11 = vector.multi_reduction <minimumf>, %6, %cst_4 [1] : vector<8x64xf32> to vector<8xf32>
    %12 = vector.shape_cast %11 : vector<8xf32> to vector<8x1xf32>
    %cst_5 = arith.constant dense<0xFF800000> : vector<8xf32>
    %13 = vector.multi_reduction <maximumf>, %7, %cst_5 [1] : vector<8x64xf32> to vector<8xf32>
    %14 = vector.shape_cast %13 : vector<8xf32> to vector<8x1xf32>
    %cst_6 = arith.constant dense<0x7F800000> : vector<8xf32>
    %15 = vector.multi_reduction <minimumf>, %7, %cst_6 [1] : vector<8x64xf32> to vector<8xf32>
    %16 = vector.shape_cast %15 : vector<8xf32> to vector<8x1xf32>
    %cst_7 = arith.constant 0.000000e+00 : f32
    %17 = vector.broadcast %cst_7 : f32 to vector<8x64xf32>
    %18 = arith.cmpf oge, %4, %17 : vector<8x64xf32>
    %19 = vector.broadcast %10 : vector<8x1xf32> to vector<8x64xf32>
    %20 = arith.mulf %4, %19 : vector<8x64xf32>
    %21 = vector.broadcast %12 : vector<8x1xf32> to vector<8x64xf32>
    %22 = arith.mulf %4, %21 : vector<8x64xf32>
    %23 = arith.select %18, %20, %22 : vector<8x64xi1>, vector<8x64xf32>
    %cst_8 = arith.constant 0.000000e+00 : f32
    %24 = vector.broadcast %cst_8 : f32 to vector<8x64xf32>
    %25 = arith.cmpf oge, %5, %24 : vector<8x64xf32>
    %26 = vector.broadcast %14 : vector<8x1xf32> to vector<8x64xf32>
    %27 = arith.mulf %5, %26 : vector<8x64xf32>
    %28 = vector.broadcast %16 : vector<8x1xf32> to vector<8x64xf32>
    %29 = arith.mulf %5, %28 : vector<8x64xf32>
    %30 = arith.select %25, %27, %29 : vector<8x64xi1>, vector<8x64xf32>
    %31 = tpu.iota {dimensions = array<i32: 2>} : vector<1x1x128xi32>
    %c64_i32 = arith.constant 64 : i32
    %32 = vector.broadcast %c64_i32 : i32 to vector<1x1x128xi32>
    %33 = arith.cmpi slt, %31, %32 : vector<1x1x128xi32>
    %34 = vector.shape_cast %4 : vector<8x64xf32> to vector<8x64x1xf32>
    %35 = vector.shape_cast %5 : vector<8x64xf32> to vector<8x64x1xf32>
    %36 = vector.shape_cast %33 : vector<1x1x128xi1> to vector<1x1x128xi1>
    %37 = vector.broadcast %36 : vector<1x1x128xi1> to vector<8x64x128xi1>
    %38 = vector.shape_cast %34 : vector<8x64x1xf32> to vector<8x64x1xf32>
    %39 = vector.broadcast %38 : vector<8x64x1xf32> to vector<8x64x128xf32>
    %40 = vector.shape_cast %35 : vector<8x64x1xf32> to vector<8x64x1xf32>
    %41 = vector.broadcast %40 : vector<8x64x1xf32> to vector<8x64x128xf32>
    %42 = arith.select %37, %39, %41 : vector<8x64x128xi1>, vector<8x64x128xf32>
    %43 = vector.shape_cast %23 : vector<8x64xf32> to vector<8x64x1xf32>
    %44 = vector.shape_cast %30 : vector<8x64xf32> to vector<8x64x1xf32>
    %45 = vector.shape_cast %33 : vector<1x1x128xi1> to vector<1x1x128xi1>
    %46 = vector.broadcast %45 : vector<1x1x128xi1> to vector<8x64x128xi1>
    %47 = vector.shape_cast %43 : vector<8x64x1xf32> to vector<8x64x1xf32>
    %48 = vector.broadcast %47 : vector<8x64x1xf32> to vector<8x64x128xf32>
    %49 = vector.shape_cast %44 : vector<8x64x1xf32> to vector<8x64x1xf32>
    %50 = vector.broadcast %49 : vector<8x64x1xf32> to vector<8x64x128xf32>
    %51 = arith.select %46, %48, %50 : vector<8x64x128xi1>, vector<8x64x128xf32>
    %52 = vector.shape_cast %8 : vector<8x128xf32> to vector<8x1x128xf32>
    %53 = vector.broadcast %52 : vector<8x1x128xf32> to vector<8x64x128xf32>
    %54 = arith.mulf %42, %53 : vector<8x64x128xf32>
    %55 = arith.subf %54, %51 : vector<8x64x128xf32>
    %56 = math.exp %55 : vector<8x64x128xf32>
    %cst_9 = arith.constant 0.000000e+00 : f32
    %57 = vector.shape_cast %33 : vector<1x1x128xi1> to vector<1x1x128xi1>
    %58 = vector.broadcast %57 : vector<1x1x128xi1> to vector<8x64x128xi1>
    %59 = vector.broadcast %cst_9 : f32 to vector<8x64x128xf32>
    %60 = arith.select %58, %56, %59 : vector<8x64x128xi1>, vector<8x64x128xf32>
    %cst_10 = arith.constant dense<0.000000e+00> : vector<8x64xf32>
    %61 = vector.multi_reduction <add>, %60, %cst_10 [2] : vector<8x64x128xf32> to vector<8x64xf32>
    %cst_11 = arith.constant dense<0.000000e+00> : vector<8x64xf32>
    %62 = vector.multi_reduction <add>, %56, %cst_11 [2] : vector<8x64x128xf32> to vector<8x64xf32>
    %63 = arith.subf %62, %61 : vector<8x64xf32>
    %64 = tpu.concatenate %61, %63 in 0 : vector<8x64xf32>, vector<8x64xf32> -> vector<16x64xf32>
    %65 = tpu.reciprocal %64 {approx = true} : vector<16x64xf32> -> vector<16x64xf32>
    %c0_12 = arith.constant 0 : index
    %c0_13 = arith.constant 0 : index
    %66 = vector.load %arg3[%c0_12, %c0_13] : memref<64x128xf32, #tpu.memory_space<vmem>>, vector<64x128xf32>
    %cst_14 = arith.constant dense<0.000000e+00> : vector<16x128xf32>
    %67 = tpu.matmul %65, %66, %cst_14 {dimension_numbers = #tpu.dot_dimension_numbers<[1], [0], [0], [1], [0, 0, 1, 1], [], []>} : vector<16x64xf32>, vector<64x128xf32>, vector<16x128xf32> -> vector<16x128xf32>
    %c0_15 = arith.constant 0 : index
    %c0_16 = arith.constant 0 : index
    %68 = vector.load %arg4[%c0_15, %c0_16] : memref<1x128xf32, #tpu.memory_space<vmem>>, vector<1x128xf32>
    %69 = vector.broadcast %68 : vector<1x128xf32> to vector<16x128xf32>
    %70 = arith.addf %67, %69 : vector<16x128xf32>
    %cst_17 = arith.constant 0.000000e+00 : f32
    %71 = vector.broadcast %cst_17 : f32 to vector<16x128xf32>
    %72 = arith.maximumf %70, %71 : vector<16x128xf32>
    %c0_18 = arith.constant 0 : index
    %c0_19 = arith.constant 0 : index
    %73 = vector.load %arg5[%c0_18, %c0_19] : memref<16x128xf32, #tpu.memory_space<vmem>>, vector<16x128xf32>
    tpu.vector_store %arg5[%c0_18, %c0_19], %72 {strides = array<i32>} : memref<16x128xf32, #tpu.memory_space<vmem>>, vector<16x128xf32>,
    return
  }
  func.func @transform_0(%arg0: i32) -> (i32, i32) {
    %c0_i32 = arith.constant 0 : i32
    %c0_i32_0 = arith.constant 0 : i32
    return %arg0, %c0_i32 : i32, i32
  }
  func.func @transform_1(%arg0: i32) -> (i32, i32) {
    %c0_i32 = arith.constant 0 : i32
    %c0_i32_0 = arith.constant 0 : i32
    return %arg0, %c0_i32 : i32, i32
  }
  func.func @transform_2(%arg0: i32) -> (i32, i32) {
    %c0_i32 = arith.constant 0 : i32
    %c0_i32_0 = arith.constant 0 : i32
    %c0_i32_1 = arith.constant 0 : i32
    return %c0_i32, %c0_i32_0 : i32, i32
  }
  func.func @transform_3(%arg0: i32) -> (i32, i32) {
    %c0_i32 = arith.constant 0 : i32
    %c0_i32_0 = arith.constant 0 : i32
    %c0_i32_1 = arith.constant 0 : i32
    return %c0_i32, %c0_i32_0 : i32, i32
  }
  func.func @transform_4(%arg0: i32) -> (i32, i32) {
    %c0_i32 = arith.constant 0 : i32
    %c0_i32_0 = arith.constant 0 : i32
    return %arg0, %c0_i32 : i32, i32
  }
}

</mosaic_0001>

<bundles_post_ra>
// kernel: cross_module_forward.1
= control target key start
LH: loop header
LB: loop body
LE: loop exit
PB: predicated region body
PF: predicated region fallthrough
CT: control target
= control target key end

     0   :  { %9 = vsyncpa [#allocation3], 0  ;;  %s3133_s15 = smov [#allocation2]   ;;  %s5214_s0 = inlined_call_operand.vmem [shape: f32[16,64], index: 0, kind: input, shape index: {}]   ;;  %s5215_s1 = inlined_call_operand.vmem [shape: f32[16,64], index: 1, kind: input, shape index: {}]   ;;  %s5216_s2 = inlined_call_operand.hbm [shape: f32[64,128], index: 2, kind: input, shape index: {}]   ;;  %s5217_s3 = inlined_call_operand.vmem [shape: f32[1,128], index: 3, kind: input, shape index: {}]   ;;  %s5218_s4 = inlined_call_operand.vmem [shape: f32[16,128], index: 4, kind: output, shape index: {}]  }
   0x1   :  { %s19_s16 = sshll.u32 %s3133_s15, 4  ;;  %s20_s16 = int_to_ptr.vmem [resolvable:$true] %s19_s16 }
   0x2   :  { %s3119_s17 = scalar_lea.vmem %s20_s16, 1024  ;;  %p3124_p1 = scmp.lt.s32.totalorder %s20_s16, %s20_s16 }
   0x3   :  { %p3120_p0 = scmp.ne.s32.totalorder %s20_s16, %s3119_s17  ;;  %p3125_p2 = scmp.lt.s32.totalorder %s3119_s17, %s3119_s17 }
   0x5   :  { %p3126_p3 = por %p3125_p2, %p3124_p1 }
   0x7   :  { %p3127_p4 = pnand %p3126_p3, %p3120_p0 }
   0x9   :  { %3130 = shalt.err (!%p3127_p4)
}
   0xa   :  { %s3134_s18 = smov 128   ;;  %s3135_s19 = smov 8  }
   0xb   :  { %25 = dma.hbm_to_vmem [thread:$0]  %s5216_s2, 1024, %s20_s16, [#allocation3], %s3134_s18, %s3134_s18, %s3135_s19  }
   0xc   :  { %3131 = dma.done.wait [#allocation3], 1024  }
   0xd   :  { %3132 = vsyncadd [#allocation3], 4294966272  ;;  %v34_v0 = vld [vmem:[%s5215_s1 + $0x8] sm:$0xff]  ;;  %v33_v1 = vld [vmem:[%s5215_s1] sm:$0xff]  ;;  %vm41_vm0 = vcmask 523264   ;;  %s3136_s26 = smov 64   ;;  %v5219_v7 = vlaneseq }
   0xe   :  { %v36_v2 = vmul.f32 0.125, %v34_v0  ;;  %v3172_v3 = vmul.f32 0.125, %v33_v1  ;;  %v3187_v10 = vld [vmem:[%s5214_s0] sm:$0xff]  ;;  %v3243_v33 = vld [vmem:[%s5214_s0 + $0x8] sm:$0xff]  ;;  %vm2119_vm4 = vcmask 130112   ;;  %vm2126_vm5 = vcmask 195712  }
   0xf   :  { %v3179_v8 = vshrl.u32 %v5219_v7, 7  ;;  %vm55_vm1 = vcmp.ge.f32.partialorder %v3187_v10, 0.0  ;;  %vm59_vm2 = vcmp.ge.f32.partialorder %v3243_v33, 0.0  ;;  %vm2133_vm6 = vcmask 261312  }
  0x10   :  { %38 = vrot.lane.b32.xlu0 %v36_v2, %s3136_s26  ;;  %v46_v4 = vsel %vm41_vm0, %v3172_v3, inf  ;;  %v49_v5 = vsel %vm41_vm0, %v36_v2, -inf  ;;  %v52_v6 = vsel %vm41_vm0, %v36_v2, inf  ;;  %v43_v12 = vsel %vm41_vm0, %v3172_v3, -inf }
  0x11   :  { %47 = vmin.xlane.f32.xlu1 %v46_v4  ;;  %5222 = vst [vmem:[#allocation5_spill] sm:$0xff] %v3179_v8  ;;  %v3182_v9 = vsub.s32 0, %v3179_v8  ;;  %v3194_v13 = vsub.s32 1, %v3179_v8  ;;  %v3199_v15 = vsub.s32 2, %v3179_v8  ;;  %v3204_v17 = vsub.s32 3, %v3179_v8 }
  0x12   :  { %v3209_v19 = vsub.s32 4, %v3179_v8  ;;  %v3214_v21 = vsub.s32 5, %v3179_v8  ;;  %v3219_v23 = vsub.s32 6, %v3179_v8  ;;  %v3228_v27 = vsub.s32 7, %v3179_v8 }
  0x13   :  { %v69_v11 = vrot.slane %v3187_v10, %v3182_v9  ;;  %v104_v14 = vrot.slane %v3187_v10, %v3194_v13  ;;  %v139_v16 = vrot.slane %v3187_v10, %v3199_v15  ;;  %v174_v18 = vrot.slane %v3187_v10, %v3204_v17 }
  0x14   :  { %v209_v20 = vrot.slane %v3187_v10, %v3209_v19  ;;  %v244_v22 = vrot.slane %v3187_v10, %v3214_v21  ;;  %v279_v24 = vrot.slane %v3187_v10, %v3219_v23  ;;  %v314_v29 = vrot.slane %v3187_v10, %v3228_v27 }
  0x15   :  { %50 = vmax.xlane.f32.xlu1 %v49_v5  ;;  %v349_v35 = vrot.slane %v3243_v33, %v3182_v9  ;;  %v384_v44 = vrot.slane %v3243_v33, %v3194_v13  ;;  %v419_v53 = vrot.slane %v3243_v33, %v3199_v15  ;;  %v454_v62 = vrot.slane %v3243_v33, %v3204_v17 }
  0x16   :  { %vm2140_vm7 = vcmask 326912   ;;  %vm2147_vm8 = vcmask 392512   ;;  %vm2154_vm9 = vcmask 458112   ;;  %vm2161_vm10 = vcmask 523712  }
  0x17   :  { %vm2436_vm11 = vcmask 1041409   ;;  %vm2438_vm12 = vcmask 1042434   ;;  %vm2440_vm13 = vcmask 1043459   ;;  %vm2442_vm14 = vcmask 1044484  }
  0x18   :  { %vm2444_vm15 = vcmask 1045509  }
  0x19   :  { %53 = vmin.xlane.f32.xlu1 %v52_v6 }
  0x2a   :  { %71 = vbcast.lane.b32.xlu1 %v69_v11, 256 }
  0x2e   :  { %75 = vbcast.lane.b32.xlu1 %v69_v11, 264 }
  0x2f   :  { %44 = vmax.xlane.f32.xlu0 %v43_v12  ;;  %v489_v12 = vrot.slane %v3243_v33, %v3209_v19 }
  0x32   :  { %79 = vbcast.lane.b32.xlu1 %v69_v11, 272 }
  0x36   :  { %87 = vbcast.lane.b32.xlu1 %v69_v11, 288 }
  0x3a   :  { %91 = vbcast.lane.b32.xlu1 %v69_v11, 296 }
  0x3e   :  { %95 = vbcast.lane.b32.xlu1 %v69_v11, 304 }
  0x42   :  { %99 = vbcast.lane.b32.xlu1 %v69_v11, 312 }
  0x45   :  { %83 = vbcast.lane.b32.xlu0 %v69_v11, 280 }
  0x46   :  { %106 = vbcast.lane.b32.xlu1 %v104_v14, 256 }
  0x49   :  { %110 = vbcast.lane.b32.xlu0 %v104_v14, 264 }
  0x4a   :  { %114 = vbcast.lane.b32.xlu1 %v104_v14, 272 }
  0x4d   :  { %118 = vbcast.lane.b32.xlu0 %v104_v14, 280 }
  0x4e   :  { %122 = vbcast.lane.b32.xlu1 %v104_v14, 288 }
  0x51   :  { %126 = vbcast.lane.b32.xlu0 %v104_v14, 296 }
  0x52   :  { %130 = vbcast.lane.b32.xlu1 %v104_v14, 304 }
  0x55   :  { %134 = vbcast.lane.b32.xlu0 %v104_v14, 312 }
  0x56   :  { %141 = vbcast.lane.b32.xlu1 %v139_v16, 256 }
  0x59   :  { %145 = vbcast.lane.b32.xlu0 %v139_v16, 264 }
  0x5a   :  { %149 = vbcast.lane.b32.xlu1 %v139_v16, 272 }
  0x5d   :  { %153 = vbcast.lane.b32.xlu0 %v139_v16, 280 }
  0x5e   :  { %157 = vbcast.lane.b32.xlu1 %v139_v16, 288 }
  0x61   :  { %161 = vbcast.lane.b32.xlu0 %v139_v16, 296 }
  0x62   :  { %165 = vbcast.lane.b32.xlu1 %v139_v16, 304 }
  0x65   :  { %169 = vbcast.lane.b32.xlu0 %v139_v16, 312 }
  0x66   :  { %176 = vbcast.lane.b32.xlu1 %v174_v18, 256 }
  0x69   :  { %180 = vbcast.lane.b32.xlu0 %v174_v18, 264 }
  0x6a   :  { %184 = vbcast.lane.b32.xlu1 %v174_v18, 272 }
  0x6d   :  { %188 = vbcast.lane.b32.xlu0 %v174_v18, 280 }
  0x6e   :  { %192 = vbcast.lane.b32.xlu1 %v174_v18, 288 }
  0x71   :  { %196 = vbcast.lane.b32.xlu0 %v174_v18, 296 }
  0x72   :  { %200 = vbcast.lane.b32.xlu1 %v174_v18, 304 }
  0x75   :  { %204 = vbcast.lane.b32.xlu0 %v174_v18, 312 }
  0x76   :  { %211 = vbcast.lane.b32.xlu1 %v209_v20, 256 }
  0x79   :  { %215 = vbcast.lane.b32.xlu0 %v209_v20, 264 }
  0x7a   :  { %219 = vbcast.lane.b32.xlu1 %v209_v20, 272 }
  0x7d   :  { %223 = vbcast.lane.b32.xlu0 %v209_v20, 280 }
  0x7e   :  { %227 = vbcast.lane.b32.xlu1 %v209_v20, 288 }
  0x81   :  { %231 = vbcast.lane.b32.xlu0 %v209_v20, 296 }
  0x82   :  { %235 = vbcast.lane.b32.xlu1 %v209_v20, 304  ;;  %v3249_v36 = vpop.permute.xlu0 %38 }
  0x85   :  { %239 = vbcast.lane.b32.xlu0 %v209_v20, 312 }
  0x86   :  { %246 = vbcast.lane.b32.xlu1 %v244_v22, 256 }
  0x89   :  { %250 = vbcast.lane.b32.xlu0 %v244_v22, 264 }
  0x8a   :  { %254 = vbcast.lane.b32.xlu1 %v244_v22, 272 }
  0x8d   :  { %258 = vbcast.lane.b32.xlu0 %v244_v22, 280 }
  0x8e   :  { %262 = vbcast.lane.b32.xlu1 %v244_v22, 288 }
  0x91   :  { %266 = vbcast.lane.b32.xlu0 %v244_v22, 296 }
  0x92   :  { %270 = vbcast.lane.b32.xlu1 %v244_v22, 304 }
  0x95   :  { %274 = vbcast.lane.b32.xlu0 %v244_v22, 312 }
  0x96   :  { %281 = vbcast.lane.b32.xlu1 %v279_v24, 256 }
  0x99   :  { %285 = vbcast.lane.b32.xlu0 %v279_v24, 264 }
  0x9a   :  { %v3223_v25 = vpop.xlane.xlu1 %47  ;;  %289 = vbcast.lane.b32.xlu1 %v279_v24, 272 }
  0x9d   :  { %293 = vbcast.lane.b32.xlu0 %v279_v24, 280 }
  0x9e   :  { %v3225_v26 = vpop.xlane.xlu1 %50  ;;  %297 = vbcast.lane.b32.xlu1 %v279_v24, 288 }
  0xa1   :  { %301 = vbcast.lane.b32.xlu0 %v279_v24, 296 }
  0xa2   :  { %v3230_v28 = vpop.xlane.xlu1 %53  ;;  %305 = vbcast.lane.b32.xlu1 %v279_v24, 304 }
  0xa5   :  { %309 = vbcast.lane.b32.xlu0 %v279_v24, 312 }
  0xa6   :  { %316 = vbcast.lane.b32.xlu1 %v314_v29, 256  ;;  %v3234_v30 = vpop.permute.xlu1 %71 }
  0xa9   :  { %320 = vbcast.lane.b32.xlu0 %v314_v29, 264 }
  0xaa   :  { %324 = vbcast.lane.b32.xlu1 %v314_v29, 272  ;;  %v3236_v31 = vpop.permute.xlu1 %75 }
  0xad   :  { %328 = vbcast.lane.b32.xlu0 %v314_v29, 280 }
  0xae   :  { %332 = vbcast.lane.b32.xlu1 %v314_v29, 288  ;;  %v3238_v32 = vpop.permute.xlu1 %79 }
  0xb1   :  { %336 = vbcast.lane.b32.xlu0 %v314_v29, 296 }
  0xb2   :  { %340 = vbcast.lane.b32.xlu1 %v314_v29, 304  ;;  %v3245_v34 = vpop.permute.xlu1 %87 }
  0xb5   :  { %344 = vbcast.lane.b32.xlu0 %v314_v29, 312 }
  0xb6   :  { %351 = vbcast.lane.b32.xlu1 %v349_v35, 256  ;;  %v3251_v37 = vpop.permute.xlu1 %91 }
  0xb7   :  { %5223 = vst [vmem:[#allocation6_spill] sm:$0xff] %v3251_v37 }
  0xb8   :  { %v3253_v38 = vpop.xlane.xlu0 %44 }
  0xb9   :  { %355 = vbcast.lane.b32.xlu0 %v349_v35, 264 }
  0xba   :  { %359 = vbcast.lane.b32.xlu1 %v349_v35, 272  ;;  %v3255_v39 = vpop.permute.xlu1 %95 }
  0xbb   :  { %5224 = vst [vmem:[#allocation7_spill] sm:$0xff] %v3255_v39 }
  0xbc   :  { %v3257_v40 = vpop.permute.xlu0 %83 }
  0xbd   :  { %363 = vbcast.lane.b32.xlu0 %v349_v35, 280 }
  0xbe   :  { %367 = vbcast.lane.b32.xlu1 %v349_v35, 288  ;;  %v3259_v41 = vpop.permute.xlu1 %99 }
  0xbf   :  { %5225 = vst [vmem:[#allocation8_spill] sm:$0xff] %v3259_v41 }
  0xc0   :  { %v3261_v42 = vpop.permute.xlu0 %110 }
  0xc1   :  { %371 = vbcast.lane.b32.xlu0 %v349_v35, 296 }
  0xc2   :  { %375 = vbcast.lane.b32.xlu1 %v349_v35, 304  ;;  %v3263_v43 = vpop.permute.xlu1 %106 }
  0xc4   :  { %v3267_v45 = vpop.permute.xlu0 %118 }
  0xc5   :  { %379 = vbcast.lane.b32.xlu0 %v349_v35, 312 }
  0xc6   :  { %386 = vbcast.lane.b32.xlu1 %v384_v44, 256  ;;  %v3269_v46 = vpop.permute.xlu1 %114 }
  0xc8   :  { %v3271_v47 = vpop.permute.xlu0 %126 }
  0xc9   :  { %5226 = vst [vmem:[#allocation9_spill] sm:$0xff] %v3271_v47  ;;  %390 = vbcast.lane.b32.xlu0 %v384_v44, 264 }
  0xca   :  { %394 = vbcast.lane.b32.xlu1 %v384_v44, 272  ;;  %v3273_v48 = vpop.permute.xlu1 %122 }
  0xcc   :  { %v3275_v49 = vpop.permute.xlu0 %134 }
  0xcd   :  { %5227 = vst [vmem:[#allocation10_spill] sm:$0xff] %v3275_v49  ;;  %398 = vbcast.lane.b32.xlu0 %v384_v44, 280 }
  0xce   :  { %402 = vbcast.lane.b32.xlu1 %v384_v44, 288  ;;  %v3277_v50 = vpop.permute.xlu1 %130 }
  0xcf   :  { %5228 = vst [vmem:[#allocation11_spill] sm:$0xff] %v3277_v50 }
  0xd0   :  { %v3279_v51 = vpop.permute.xlu0 %145 }
  0xd1   :  { %406 = vbcast.lane.b32.xlu0 %v384_v44, 296 }
  0xd2   :  { %410 = vbcast.lane.b32.xlu1 %v384_v44, 304  ;;  %v3281_v52 = vpop.permute.xlu1 %141 }
  0xd4   :  { %v3285_v54 = vpop.permute.xlu0 %153 }
  0xd5   :  { %414 = vbcast.lane.b32.xlu0 %v384_v44, 312  ;;  %v524_v44 = vrot.slane %v3243_v33, %v3214_v21 }
  0xd6   :  { %421 = vbcast.lane.b32.xlu1 %v419_v53, 256  ;;  %v3287_v55 = vpop.permute.xlu1 %149 }
  0xd8   :  { %v3289_v56 = vpop.permute.xlu0 %161 }
  0xd9   :  { %5229 = vst [vmem:[#allocation12_spill] sm:$0xff] %v3289_v56  ;;  %425 = vbcast.lane.b32.xlu0 %v419_v53, 264 }
  0xda   :  { %429 = vbcast.lane.b32.xlu1 %v419_v53, 272  ;;  %v3291_v57 = vpop.permute.xlu1 %157 }
  0xdb   :  { %5230 = vst [vmem:[#allocation13_spill] sm:$0xff] %v3291_v57 }
  0xdc   :  { %v3293_v58 = vpop.permute.xlu0 %169 }
  0xdd   :  { %5231 = vst [vmem:[#allocation14_spill] sm:$0xff] %v3293_v58  ;;  %433 = vbcast.lane.b32.xlu0 %v419_v53, 280  ;;  %v559_v58 = vrot.slane %v3243_v33, %v3219_v23 }
  0xde   :  { %437 = vbcast.lane.b32.xlu1 %v419_v53, 288  ;;  %v3295_v59 = vpop.permute.xlu1 %165 }
  0xdf   :  { %5232 = vst [vmem:[#allocation15_spill] sm:$0xff] %v3295_v59 }
  0xe0   :  { %v3297_v60 = vpop.permute.xlu0 %180 }
  0xe1   :  { %441 = vbcast.lane.b32.xlu0 %v419_v53, 296 }
  0xe2   :  { %445 = vbcast.lane.b32.xlu1 %v419_v53, 304  ;;  %v3299_v61 = vpop.permute.xlu1 %176 }
  0xe4   :  { %v3303_v63 = vpop.permute.xlu0 %188 }
  0xe5   :  { %5233 = vst [vmem:[#allocation16_spill] sm:$0xff] %v3303_v63  ;;  %449 = vbcast.lane.b32.xlu0 %v419_v53, 312 }
  0xe6   :  { %456 = vbcast.lane.b32.xlu1 %v454_v62, 256  ;;  %v3305_v0 = vpop.permute.xlu1 %184 }
  0xe7   :  { %5234 = vst [vmem:[#allocation17_spill] sm:$0xff] %v3305_v0 }
  0xe8   :  { %v3307_v1 = vpop.permute.xlu0 %196 }
  0xe9   :  { %5235 = vst [vmem:[#allocation18_spill] sm:$0xff] %v3307_v1  ;;  %460 = vbcast.lane.b32.xlu0 %v454_v62, 264 }
  0xea   :  { %464 = vbcast.lane.b32.xlu1 %v454_v62, 272  ;;  %v3309_v2 = vpop.permute.xlu1 %192 }
  0xeb   :  { %5236 = vst [vmem:[#allocation19_spill] sm:$0xff] %v3309_v2 }
  0xec   :  { %v3311_v4 = vpop.permute.xlu0 %204 }
  0xed   :  { %5237 = vst [vmem:[#allocation20_spill] sm:$0xff] %v3311_v4  ;;  %468 = vbcast.lane.b32.xlu0 %v454_v62, 280 }
  0xee   :  { %472 = vbcast.lane.b32.xlu1 %v454_v62, 288  ;;  %v3313_v5 = vpop.permute.xlu1 %200 }
  0xef   :  { %5238 = vst [vmem:[#allocation21_spill] sm:$0xff] %v3313_v5 }
  0xf0   :  { %v3315_v6 = vpop.permute.xlu0 %215 }
  0xf1   :  { %5239 = vst [vmem:[#allocation22_spill] sm:$0xff] %v3315_v6  ;;  %476 = vbcast.lane.b32.xlu0 %v454_v62, 296 }
  0xf2   :  { %480 = vbcast.lane.b32.xlu1 %v454_v62, 304  ;;  %v3317_v11 = vpop.permute.xlu1 %211 }
  0xf3   :  { %5240 = vst [vmem:[#allocation23_spill] sm:$0xff] %v3317_v11 }
  0xf4   :  { %v3321_v14 = vpop.permute.xlu0 %223 }
  0xf5   :  { %5241 = vst [vmem:[#allocation24_spill] sm:$0xff] %v3321_v14  ;;  %484 = vbcast.lane.b32.xlu0 %v454_v62, 312 }
  0xf6   :  { %491 = vbcast.lane.b32.xlu1 %v489_v12, 256  ;;  %v3323_v16 = vpop.permute.xlu1 %219 }
  0xf7   :  { %5242 = vst [vmem:[#allocation25_spill] sm:$0xff] %v3323_v16 }
  0xf8   :  { %v3325_v18 = vpop.permute.xlu0 %231 }
  0xf9   :  { %5243 = vst [vmem:[#allocation26_spill] sm:$0xff] %v3325_v18  ;;  %495 = vbcast.lane.b32.xlu0 %v489_v12, 264 }
  0xfa   :  { %499 = vbcast.lane.b32.xlu1 %v489_v12, 272  ;;  %v3327_v20 = vpop.permute.xlu1 %227 }
  0xfb   :  { %5244 = vst [vmem:[#allocation27_spill] sm:$0xff] %v3327_v20 }
  0xfc   :  { %v3329_v22 = vpop.permute.xlu0 %239 }
  0xfd   :  { %5245 = vst [vmem:[#allocation28_spill] sm:$0xff] %v3329_v22  ;;  %503 = vbcast.lane.b32.xlu0 %v489_v12, 280 }
  0xfe   :  { %507 = vbcast.lane.b32.xlu1 %v489_v12, 288  ;;  %v3331_v24 = vpop.permute.xlu1 %235 }
  0xff   :  { %5246 = vst [vmem:[#allocation29_spill] sm:$0xff] %v3331_v24 }
 0x100   :  { %v3333_v29 = vpop.permute.xlu0 %250 }
 0x101   :  { %5247 = vst [vmem:[#allocation30_spill] sm:$0xff] %v3333_v29  ;;  %511 = vbcast.lane.b32.xlu0 %v489_v12, 296 }
 0x102   :  { %515 = vbcast.lane.b32.xlu1 %v489_v12, 304  ;;  %v3335_v35 = vpop.permute.xlu1 %246 }
 0x103   :  { %5248 = vst [vmem:[#allocation31_spill] sm:$0xff] %v3335_v35 }
 0x104   :  { %v3339_v53 = vpop.permute.xlu0 %258 }
 0x105   :  { %5249 = vst [vmem:[#allocation32_spill] sm:$0xff] %v3339_v53  ;;  %519 = vbcast.lane.b32.xlu0 %v489_v12, 312 }
 0x106   :  { %526 = vbcast.lane.b32.xlu1 %v524_v44, 256  ;;  %v3341_v62 = vpop.permute.xlu1 %254 }
 0x107   :  { %5250 = vst [vmem:[#allocation33_spill] sm:$0xff] %v3341_v62 }
 0x108   :  { %v3343_v7 = vpop.permute.xlu0 %266 }
 0x109   :  { %5251 = vst [vmem:[#allocation34_spill] sm:$0xff] %v3343_v7  ;;  %530 = vbcast.lane.b32.xlu0 %v524_v44, 264 }
 0x10a   :  { %534 = vbcast.lane.b32.xlu1 %v524_v44, 272  ;;  %v3345_v22 = vpop.permute.xlu1 %262 }
 0x10b   :  { %5252 = vst [vmem:[#allocation35_spill] sm:$0xff] %v3345_v22 }
 0x10c   :  { %v3347_v4 = vpop.permute.xlu0 %274 }
 0x10d   :  { %5253 = vst [vmem:[#allocation36_spill] sm:$0xff] %v3347_v4  ;;  %538 = vbcast.lane.b32.xlu0 %v524_v44, 280 }
 0x10e   :  { %542 = vbcast.lane.b32.xlu1 %v524_v44, 288  ;;  %v3349_v18 = vpop.permute.xlu1 %270 }
 0x10f   :  { %5254 = vst [vmem:[#allocation37_spill] sm:$0xff] %v3349_v18 }
 0x110   :  { %v3351_v5 = vpop.permute.xlu0 %285 }
 0x111   :  { %5255 = vst [vmem:[#allocation38_spill] sm:$0xff] %v3351_v5  ;;  %546 = vbcast.lane.b32.xlu0 %v524_v44, 296 }
 0x112   :  { %550 = vbcast.lane.b32.xlu1 %v524_v44, 304  ;;  %v3353_v12 = vpop.permute.xlu1 %281 }
 0x113   :  { %5256 = vst [vmem:[#allocation39_spill] sm:$0xff] %v3353_v12 }
 0x114   :  { %v3357_v7 = vpop.permute.xlu0 %293 }
 0x115   :  { %5257 = vst [vmem:[#allocation40_spill] sm:$0xff] %v3357_v7  ;;  %554 = vbcast.lane.b32.xlu0 %v524_v44, 312  ;;  %v594_v7 = vrot.slane %v3243_v33, %v3228_v27 }
 0x116   :  { %561 = vbcast.lane.b32.xlu1 %v559_v58, 256  ;;  %v3359_v22 = vpop.permute.xlu1 %289 }
 0x117   :  { %5258 = vst [vmem:[#allocation41_spill] sm:$0xff] %v3359_v22 }
 0x118   :  { %v3361_v4 = vpop.permute.xlu0 %301 }
 0x119   :  { %5259 = vst [vmem:[#allocation42_spill] sm:$0xff] %v3361_v4  ;;  %565 = vbcast.lane.b32.xlu0 %v559_v58, 264 }
 0x11a   :  { %569 = vbcast.lane.b32.xlu1 %v559_v58, 272  ;;  %v3363_v18 = vpop.permute.xlu1 %297 }
 0x11b   :  { %5260 = vst [vmem:[#allocation43_spill] sm:$0xff] %v3363_v18 }
 0x11c   :  { %v3365_v53 = vpop.permute.xlu0 %309 }
 0x11d   :  { %5261 = vst [vmem:[#allocation44_spill] sm:$0xff] %v3365_v53  ;;  %573 = vbcast.lane.b32.xlu0 %v559_v58, 280 }
 0x11e   :  { %577 = vbcast.lane.b32.xlu1 %v559_v58, 288  ;;  %v3367_v20 = vpop.permute.xlu1 %305 }
 0x11f   :  { %5262 = vst [vmem:[#allocation45_spill] sm:$0xff] %v3367_v20 }
 0x120   :  { %v3369_v1 = vpop.permute.xlu0 %320 }
 0x121   :  { %5263 = vst [vmem:[#allocation46_spill] sm:$0xff] %v3369_v1  ;;  %581 = vbcast.lane.b32.xlu0 %v559_v58, 296 }
 0x122   :  { %585 = vbcast.lane.b32.xlu1 %v559_v58, 304  ;;  %v3371_v44 = vpop.permute.xlu1 %316 }
 0x123   :  { %5264 = vst [vmem:[#allocation47_spill] sm:$0xff] %v3371_v44  ;;  %v56_v44 = vmul.f32 %v3253_v38, %v3187_v10 }
 0x124   :  { %v3375_v4 = vpop.permute.xlu0 %328 }
 0x125   :  { %5265 = vst [vmem:[#allocation48_spill] sm:$0xff] %v3375_v4  ;;  %589 = vbcast.lane.b32.xlu0 %v559_v58, 312  ;;  %v57_v58 = vmul.f32 %v3223_v25, %v3187_v10 }
 0x126   :  { %596 = vbcast.lane.b32.xlu1 %v594_v7, 256  ;;  %v3377_v22 = vpop.permute.xlu1 %324 }
 0x127   :  { %5266 = vst [vmem:[#allocation49_spill] sm:$0xff] %v3377_v22 }
 0x128   :  { %v3379_v53 = vpop.permute.xlu0 %336 }
 0x129   :  { %5267 = vst [vmem:[#allocation50_spill] sm:$0xff] %v3379_v53  ;;  %600 = vbcast.lane.b32.xlu0 %v594_v7, 264  ;;  %v3394_v53 = vsel %vm55_vm1, %v56_v44, %v57_v58  ;;  %vm2446_vm1 = vcmask 1046534  }
 0x12a   :  { %604 = vbcast.lane.b32.xlu1 %v594_v7, 272  ;;  %v3381_v20 = vpop.permute.xlu1 %332  ;;  %v695_v38 = vrot.slane %v3394_v53, %v3182_v9 }
 0x12b   :  { %5268 = vst [vmem:[#allocation51_spill] sm:$0xff] %v3381_v20 }
 0x12c   :  { %v3383_v1 = vpop.permute.xlu0 %344 }
 0x12d   :  { %5269 = vst [vmem:[#allocation52_spill] sm:$0xff] %v3383_v1  ;;  %608 = vbcast.lane.b32.xlu0 %v594_v7, 280 }
 0x12e   :  { %612 = vbcast.lane.b32.xlu1 %v594_v7, 288  ;;  %v3388_v4 = vpop.permute.xlu1 %340 }
 0x12f   :  { %5270 = vst [vmem:[#allocation53_spill] sm:$0xff] %v3388_v4 }
 0x130   :  { %v3392_v22 = vpop.permute.xlu0 %355 }
 0x131   :  { %616 = vbcast.lane.b32.xlu0 %v594_v7, 296 }
 0x132   :  { %620 = vbcast.lane.b32.xlu1 %v594_v7, 304  ;;  %v3396_v20 = vpop.permute.xlu1 %351 }
 0x134   :  { %v3400_v1 = vpop.permute.xlu0 %363 }
 0x135   :  { %624 = vbcast.lane.b32.xlu0 %v594_v7, 312  ;;  %v730_v7 = vrot.slane %v3394_v53, %v3194_v13 }
 0x136   :  { %v3402_v59 = vpop.permute.xlu1 %359  ;;  %697 = vbcast.lane.b32.xlu1 %v695_v38, 256 }
 0x138   :  { %v3404_v4 = vpop.permute.xlu0 %371 }
 0x139   :  { %5271 = vst [vmem:[#allocation54_spill] sm:$0xff] %v3404_v4  ;;  %701 = vbcast.lane.b32.xlu0 %v695_v38, 264 }
 0x13a   :  { %v3406_v10 = vpop.permute.xlu1 %367  ;;  %705 = vbcast.lane.b32.xlu1 %v695_v38, 272 }
 0x13c   :  { %v3408_v25 = vpop.permute.xlu0 %379 }
 0x13d   :  { %5272 = vst [vmem:[#allocation55_spill] sm:$0xff] %v3408_v25  ;;  %709 = vbcast.lane.b32.xlu0 %v695_v38, 280 }
 0x13e   :  { %v3410_v44 = vpop.permute.xlu1 %375  ;;  %713 = vbcast.lane.b32.xlu1 %v695_v38, 288 }
 0x13f   :  { %5273 = vst [vmem:[#allocation56_spill] sm:$0xff] %v3410_v44 }
 0x140   :  { %v3412_v58 = vpop.permute.xlu0 %390 }
 0x141   :  { %717 = vbcast.lane.b32.xlu0 %v695_v38, 296 }
 0x142   :  { %v3414_v49 = vpop.permute.xlu1 %386  ;;  %721 = vbcast.lane.b32.xlu1 %v695_v38, 304 }
 0x144   :  { %v3418_v41 = vpop.permute.xlu0 %398 }
 0x145   :  { %725 = vbcast.lane.b32.xlu0 %v695_v38, 312  ;;  %v765_v38 = vrot.slane %v3394_v53, %v3199_v15 }
 0x146   :  { %v3420_v5 = vpop.permute.xlu1 %394  ;;  %732 = vbcast.lane.b32.xlu1 %v730_v7, 256 }
 0x148   :  { %v3422_v25 = vpop.permute.xlu0 %406 }
 0x149   :  { %5274 = vst [vmem:[#allocation57_spill] sm:$0xff] %v3422_v25  ;;  %736 = vbcast.lane.b32.xlu0 %v730_v7, 264 }
 0x14a   :  { %v3424_v12 = vpop.permute.xlu1 %402  ;;  %740 = vbcast.lane.b32.xlu1 %v730_v7, 272 }
 0x14c   :  { %v3426_v62 = vpop.permute.xlu0 %414 }
 0x14d   :  { %5275 = vst [vmem:[#allocation58_spill] sm:$0xff] %v3426_v62  ;;  %744 = vbcast.lane.b32.xlu0 %v730_v7, 280 }
 0x14e   :  { %v3428_v14 = vpop.permute.xlu1 %410  ;;  %748 = vbcast.lane.b32.xlu1 %v730_v7, 288 }
 0x14f   :  { %5276 = vst [vmem:[#allocation59_spill] sm:$0xff] %v3428_v14 }
 0x150   :  { %v3430_v2 = vpop.permute.xlu0 %425 }
 0x151   :  { %752 = vbcast.lane.b32.xlu0 %v730_v7, 296 }
 0x152   :  { %v3432_v56 = vpop.permute.xlu1 %421  ;;  %756 = vbcast.lane.b32.xlu1 %v730_v7, 304 }
 0x154   :  { %v3436_v50 = vpop.permute.xlu0 %433 }
 0x155   :  { %760 = vbcast.lane.b32.xlu0 %v730_v7, 312  ;;  %v800_v7 = vrot.slane %v3394_v53, %v3204_v17 }
 0x156   :  { %v3438_v39 = vpop.permute.xlu1 %429  ;;  %767 = vbcast.lane.b32.xlu1 %v765_v38, 256 }
 0x158   :  { %v3440_v62 = vpop.permute.xlu0 %441 }
 0x159   :  { %5277 = vst [vmem:[#allocation60_spill] sm:$0xff] %v3440_v62  ;;  %771 = vbcast.lane.b32.xlu0 %v765_v38, 264 }
 0x15a   :  { %v3442_v14 = vpop.permute.xlu1 %437  ;;  %775 = vbcast.lane.b32.xlu1 %v765_v38, 272 }
 0x15b   :  { %5278 = vst [vmem:[#allocation61_spill] sm:$0xff] %v3442_v14 }
 0x15c   :  { %v3444_v44 = vpop.permute.xlu0 %449 }
 0x15d   :  { %5279 = vst [vmem:[#allocation62_spill] sm:$0xff] %v3444_v44  ;;  %779 = vbcast.lane.b32.xlu0 %v765_v38, 280 }
 0x15e   :  { %v3446_v18 = vpop.permute.xlu1 %445  ;;  %783 = vbcast.lane.b32.xlu1 %v765_v38, 288 }
 0x15f   :  { %5280 = vst [vmem:[#allocation63_spill] sm:$0xff] %v3446_v18 }
 0x160   :  { %v3448_v24 = vpop.permute.xlu0 %460 }
 0x161   :  { %787 = vbcast.lane.b32.xlu0 %v765_v38, 296 }
 0x162   :  { %v3450_v29 = vpop.permute.xlu1 %456  ;;  %791 = vbcast.lane.b32.xlu1 %v765_v38, 304 }
 0x164   :  { %v3454_v62 = vpop.permute.xlu0 %468 }
 0x165   :  { %5281 = vst [vmem:[#allocation64_spill] sm:$0xff] %v3454_v62  ;;  %795 = vbcast.lane.b32.xlu0 %v765_v38, 312  ;;  %v835_v38 = vrot.slane %v3394_v53, %v3209_v19 }
 0x166   :  { %v3456_v35 = vpop.permute.xlu1 %464  ;;  %802 = vbcast.lane.b32.xlu1 %v800_v7, 256 }
 0x167   :  { %5282 = vst [vmem:[#allocation65_spill] sm:$0xff] %v3456_v35 }
 0x168   :  { %v3458_v44 = vpop.permute.xlu0 %476 }
 0x169   :  { %5283 = vst [vmem:[#allocation66_spill] sm:$0xff] %v3458_v44  ;;  %806 = vbcast.lane.b32.xlu0 %v800_v7, 264 }
 0x16a   :  { %v3460_v18 = vpop.permute.xlu1 %472  ;;  %810 = vbcast.lane.b32.xlu1 %v800_v7, 272 }
 0x16b   :  { %5284 = vst [vmem:[#allocation67_spill] sm:$0xff] %v3460_v18 }
 0x16c   :  { %v3462_v16 = vpop.permute.xlu0 %484 }
 0x16d   :  { %5285 = vst [vmem:[#allocation68_spill] sm:$0xff] %v3462_v16  ;;  %814 = vbcast.lane.b32.xlu0 %v800_v7, 280 }
 0x16e   :  { %v3464_v63 = vpop.permute.xlu1 %480  ;;  %818 = vbcast.lane.b32.xlu1 %v800_v7, 288 }
 0x16f   :  { %5286 = vst [vmem:[#allocation69_spill] sm:$0xff] %v3464_v63 }
 0x170   :  { %v3466_v57 = vpop.permute.xlu0 %495 }
 0x171   :  { %5287 = vst [vmem:[#allocation70_spill] sm:$0xff] %v3466_v57  ;;  %822 = vbcast.lane.b32.xlu0 %v800_v7, 296 }
 0x172   :  { %v3468_v62 = vpop.permute.xlu1 %491  ;;  %826 = vbcast.lane.b32.xlu1 %v800_v7, 304 }
 0x173   :  { %5288 = vst [vmem:[#allocation71_spill] sm:$0xff] %v3468_v62 }
 0x174   :  { %v3472_v44 = vpop.permute.xlu0 %503 }
 0x175   :  { %5289 = vst [vmem:[#allocation72_spill] sm:$0xff] %v3472_v44  ;;  %830 = vbcast.lane.b32.xlu0 %v800_v7, 312  ;;  %v870_v7 = vrot.slane %v3394_v53, %v3214_v21 }
 0x176   :  { %v3474_v18 = vpop.permute.xlu1 %499  ;;  %837 = vbcast.lane.b32.xlu1 %v835_v38, 256 }
 0x177   :  { %5290 = vst [vmem:[#allocation73_spill] sm:$0xff] %v3474_v18 }
 0x178   :  { %v3476_v16 = vpop.permute.xlu0 %511 }
 0x179   :  { %5291 = vst [vmem:[#allocation74_spill] sm:$0xff] %v3476_v16  ;;  %841 = vbcast.lane.b32.xlu0 %v835_v38, 264 }
 0x17a   :  { %v3478_v63 = vpop.permute.xlu1 %507  ;;  %845 = vbcast.lane.b32.xlu1 %v835_v38, 272 }
 0x17b   :  { %5292 = vst [vmem:[#allocation75_spill] sm:$0xff] %v3478_v63 }
 0x17c   :  { %v3480_v14 = vpop.permute.xlu0 %519 }
 0x17d   :  { %5293 = vst [vmem:[#allocation76_spill] sm:$0xff] %v3480_v14  ;;  %849 = vbcast.lane.b32.xlu0 %v835_v38, 280 }
 0x17e   :  { %v3482_v47 = vpop.permute.xlu1 %515  ;;  %853 = vbcast.lane.b32.xlu1 %v835_v38, 288 }
 0x17f   :  { %5294 = vst [vmem:[#allocation77_spill] sm:$0xff] %v3482_v47 }
 0x180   :  { %v3484_v25 = vpop.permute.xlu0 %530 }
 0x181   :  { %5295 = vst [vmem:[#allocation78_spill] sm:$0xff] %v3484_v25  ;;  %857 = vbcast.lane.b32.xlu0 %v835_v38, 296 }
 0x182   :  { %v3486_v44 = vpop.permute.xlu1 %526  ;;  %861 = vbcast.lane.b32.xlu1 %v835_v38, 304 }
 0x183   :  { %5296 = vst [vmem:[#allocation79_spill] sm:$0xff] %v3486_v44 }
 0x184   :  { %v3490_v16 = vpop.permute.xlu0 %538 }
 0x185   :  { %5297 = vst [vmem:[#allocation80_spill] sm:$0xff] %v3490_v16  ;;  %865 = vbcast.lane.b32.xlu0 %v835_v38, 312  ;;  %v905_v38 = vrot.slane %v3394_v53, %v3219_v23 }
 0x186   :  { %v3492_v63 = vpop.permute.xlu1 %534  ;;  %872 = vbcast.lane.b32.xlu1 %v870_v7, 256 }
 0x187   :  { %5298 = vst [vmem:[#allocation81_spill] sm:$0xff] %v3492_v63 }
 0x188   :  { %v3494_v14 = vpop.permute.xlu0 %546 }
 0x189   :  { %5299 = vst [vmem:[#allocation82_spill] sm:$0xff] %v3494_v14  ;;  %876 = vbcast.lane.b32.xlu0 %v870_v7, 264 }
 0x18a   :  { %v3496_v47 = vpop.permute.xlu1 %542  ;;  %880 = vbcast.lane.b32.xlu1 %v870_v7, 272 }
 0x18b   :  { %5300 = vst [vmem:[#allocation83_spill] sm:$0xff] %v3496_v47 }
 0x18c   :  { %v3498_v25 = vpop.permute.xlu0 %554 }
 0x18d   :  { %5301 = vst [vmem:[#allocation84_spill] sm:$0xff] %v3498_v25  ;;  %884 = vbcast.lane.b32.xlu0 %v870_v7, 280 }
 0x18e   :  { %v3500_v44 = vpop.permute.xlu1 %550  ;;  %888 = vbcast.lane.b32.xlu1 %v870_v7, 288 }
 0x18f   :  { %5302 = vst [vmem:[#allocation85_spill] sm:$0xff] %v3500_v44 }
 0x190   :  { %v3502_v18 = vpop.permute.xlu0 %565 }
 0x191   :  { %5303 = vst [vmem:[#allocation86_spill] sm:$0xff] %v3502_v18  ;;  %892 = vbcast.lane.b32.xlu0 %v870_v7, 296 }
 0x192   :  { %v3504_v16 = vpop.permute.xlu1 %561  ;;  %896 = vbcast.lane.b32.xlu1 %v870_v7, 304 }
 0x193   :  { %5304 = vst [vmem:[#allocation87_spill] sm:$0xff] %v3504_v16 }
 0x194   :  { %v3508_v14 = vpop.permute.xlu0 %573 }
 0x195   :  { %5305 = vst [vmem:[#allocation88_spill] sm:$0xff] %v3508_v14  ;;  %900 = vbcast.lane.b32.xlu0 %v870_v7, 312  ;;  %v940_v7 = vrot.slane %v3394_v53, %v3228_v27 }
 0x196   :  { %v3510_v47 = vpop.permute.xlu1 %569  ;;  %907 = vbcast.lane.b32.xlu1 %v905_v38, 256 }
 0x197   :  { %5306 = vst [vmem:[#allocation89_spill] sm:$0xff] %v3510_v47 }
 0x198   :  { %v3512_v25 = vpop.permute.xlu0 %581 }
 0x199   :  { %5307 = vst [vmem:[#allocation90_spill] sm:$0xff] %v3512_v25  ;;  %911 = vbcast.lane.b32.xlu0 %v905_v38, 264 }
 0x19a   :  { %v3514_v44 = vpop.permute.xlu1 %577  ;;  %915 = vbcast.lane.b32.xlu1 %v905_v38, 272 }
 0x19b   :  { %5308 = vst [vmem:[#allocation91_spill] sm:$0xff] %v3514_v44 }
 0x19c   :  { %v3516_v18 = vpop.permute.xlu0 %589 }
 0x19d   :  { %5309 = vst [vmem:[#allocation92_spill] sm:$0xff] %v3516_v18  ;;  %919 = vbcast.lane.b32.xlu0 %v905_v38, 280 }
 0x19e   :  { %v3518_v16 = vpop.permute.xlu1 %585  ;;  %923 = vbcast.lane.b32.xlu1 %v905_v38, 288 }
 0x19f   :  { %5310 = vst [vmem:[#allocation93_spill] sm:$0xff] %v3518_v16 }
 0x1a0   :  { %v3520_v63 = vpop.permute.xlu0 %600 }
 0x1a1   :  { %5311 = vst [vmem:[#allocation94_spill] sm:$0xff] %v3520_v63  ;;  %927 = vbcast.lane.b32.xlu0 %v905_v38, 296 }
 0x1a2   :  { %v3522_v14 = vpop.permute.xlu1 %596  ;;  %931 = vbcast.lane.b32.xlu1 %v905_v38, 304 }
 0x1a3   :  { %5312 = vst [vmem:[#allocation95_spill] sm:$0xff] %v3522_v14  ;;  %v61_v14 = vmul.f32 %v3230_v28, %v3243_v33 }
 0x1a4   :  { %v3526_v25 = vpop.permute.xlu0 %608 }
 0x1a5   :  { %5313 = vst [vmem:[#allocation96_spill] sm:$0xff] %v3526_v25  ;;  %935 = vbcast.lane.b32.xlu0 %v905_v38, 312  ;;  %v60_v38 = vmul.f32 %v3225_v26, %v3243_v33 }
 0x1a6   :  { %v3528_v47 = vpop.permute.xlu1 %604  ;;  %942 = vbcast.lane.b32.xlu1 %v940_v7, 256 }
 0x1a7   :  { %5314 = vst [vmem:[#allocation97_spill] sm:$0xff] %v3528_v47 }
 0x1a8   :  { %v3530_v18 = vpop.permute.xlu0 %616 }
 0x1a9   :  { %5315 = vst [vmem:[#allocation98_spill] sm:$0xff] %v3530_v18  ;;  %946 = vbcast.lane.b32.xlu0 %v940_v7, 264  ;;  %v3545_v18 = vsel %vm59_vm2, %v60_v38, %v61_v14  ;;  %vm2448_vm2 = vcmask 1047559  }
 0x1aa   :  { %v3532_v16 = vpop.permute.xlu1 %612  ;;  %950 = vbcast.lane.b32.xlu1 %v940_v7, 272  ;;  %v975_v28 = vrot.slane %v3545_v18, %v3182_v9  ;;  %v1010_v44 = vrot.slane %v3545_v18, %v3194_v13  ;;  %v3579_v4 = vrot.slane %v3545_v18, %v3199_v15  ;;  %v3594_v57 = vrot.slane %v3545_v18, %v3204_v17 }
 0x1ab   :  { %5316 = vst [vmem:[#allocation99_spill] sm:$0xff] %v3532_v16  ;;  %v3609_v62 = vrot.slane %v3545_v18, %v3209_v19 }
 0x1ac   :  { %v3534_v63 = vpop.permute.xlu0 %624 }
 0x1ad   :  { %5317 = vst [vmem:[#allocation100_spill] sm:$0xff] %v3534_v63  ;;  %954 = vbcast.lane.b32.xlu0 %v940_v7, 280 }
 0x1ae   :  { %v3539_v53 = vpop.permute.xlu1 %620  ;;  %958 = vbcast.lane.b32.xlu1 %v940_v7, 288 }
 0x1af   :  { %5318 = vst [vmem:[#allocation101_spill] sm:$0xff] %v3539_v53 }
 0x1b0   :  { %v3543_v25 = vpop.permute.xlu0 %701 }
 0x1b1   :  { %962 = vbcast.lane.b32.xlu0 %v940_v7, 296 }
 0x1b2   :  { %966 = vbcast.lane.b32.xlu1 %v940_v7, 304  ;;  %v3547_v16 = vpop.permute.xlu1 %697 }
 0x1b4   :  { %v3551_v63 = vpop.permute.xlu0 %709 }
 0x1b5   :  { %970 = vbcast.lane.b32.xlu0 %v940_v7, 312 }
 0x1b6   :  { %977 = vbcast.lane.b32.xlu1 %v975_v28, 256  ;;  %v3553_v53 = vpop.permute.xlu1 %705 }
 0x1b8   :  { %v3555_v47 = vpop.permute.xlu0 %717 }
 0x1b9   :  { %5319 = vst [vmem:[#allocation102_spill] sm:$0xff] %v3555_v47  ;;  %981 = vbcast.lane.b32.xlu0 %v975_v28, 264 }
 0x1ba   :  { %985 = vbcast.lane.b32.xlu1 %v975_v28, 272  ;;  %v3557_v26 = vpop.permute.xlu1 %713 }
 0x1bc   :  { %v3559_v33 = vpop.permute.xlu0 %725 }
 0x1bd   :  { %5320 = vst [vmem:[#allocation103_spill] sm:$0xff] %v3559_v33  ;;  %989 = vbcast.lane.b32.xlu0 %v975_v28, 280 }
 0x1be   :  { %993 = vbcast.lane.b32.xlu1 %v975_v28, 288  ;;  %v3561_v14 = vpop.permute.xlu1 %721 }
 0x1bf   :  { %5321 = vst [vmem:[#allocation104_spill] sm:$0xff] %v3561_v14 }
 0x1c0   :  { %v3563_v38 = vpop.permute.xlu0 %736 }
 0x1c1   :  { %997 = vbcast.lane.b32.xlu0 %v975_v28, 296 }
 0x1c2   :  { %1001 = vbcast.lane.b32.xlu1 %v975_v28, 304  ;;  %v3565_v7 = vpop.permute.xlu1 %732 }
 0x1c4   :  { %v3569_v47 = vpop.permute.xlu0 %744 }
 0x1c5   :  { %1005 = vbcast.lane.b32.xlu0 %v975_v28, 312 }
 0x1c6   :  { %1012 = vbcast.lane.b32.xlu1 %v1010_v44, 256  ;;  %v3571_v37 = vpop.permute.xlu1 %740 }
 0x1c8   :  { %v3573_v33 = vpop.permute.xlu0 %752 }
 0x1c9   :  { %5322 = vst [vmem:[#allocation105_spill] sm:$0xff] %v3573_v33  ;;  %1016 = vbcast.lane.b32.xlu0 %v1010_v44, 264 }
 0x1ca   :  { %1020 = vbcast.lane.b32.xlu1 %v1010_v44, 272  ;;  %v3575_v14 = vpop.permute.xlu1 %748 }
 0x1cb   :  { %5323 = vst [vmem:[#allocation106_spill] sm:$0xff] %v3575_v14 }
 0x1cc   :  { %v3581_v6 = vpop.permute.xlu0 %760 }
 0x1cd   :  { %5324 = vst [vmem:[#allocation107_spill] sm:$0xff] %v3581_v6  ;;  %1047 = vbcast.lane.b32.xlu0 %v3579_v4, 256 }
 0x1ce   :  { %1051 = vbcast.lane.b32.xlu1 %v3579_v4, 264  ;;  %v3585_v13 = vpop.permute.xlu1 %756 }
 0x1cf   :  { %5325 = vst [vmem:[#allocation108_spill] sm:$0xff] %v3585_v13 }
 0x1d0   :  { %v3587_v28 = vpop.permute.xlu0 %771 }
 0x1d1   :  { %1024 = vbcast.lane.b32.xlu0 %v1010_v44, 280 }
 0x1d2   :  { %1055 = vbcast.lane.b32.xlu1 %v3579_v4, 272  ;;  %v3590_v33 = vpop.permute.xlu1 %767 }
 0x1d4   :  { %v3596_v15 = vpop.permute.xlu0 %779 }
 0x1d5   :  { %5326 = vst [vmem:[#allocation109_spill] sm:$0xff] %v3596_v15  ;;  %1082 = vbcast.lane.b32.xlu0 %v3594_v57, 256 }
 0x1d6   :  { %1086 = vbcast.lane.b32.xlu1 %v3594_v57, 264  ;;  %v3600_v6 = vpop.permute.xlu1 %775 }
 0x1d8   :  { %v3602_v13 = vpop.permute.xlu0 %787 }
 0x1d9   :  { %5327 = vst [vmem:[#allocation110_spill] sm:$0xff] %v3602_v13  ;;  %1028 = vbcast.lane.b32.xlu0 %v1010_v44, 288 }
 0x1da   :  { %1059 = vbcast.lane.b32.xlu1 %v3579_v4, 280  ;;  %v3605_v11 = vpop.permute.xlu1 %783 }
 0x1db   :  { %5328 = vst [vmem:[#allocation111_spill] sm:$0xff] %v3605_v11 }
 0x1dc   :  { %v3611_v17 = vpop.permute.xlu0 %795 }
 0x1dd   :  { %5329 = vst [vmem:[#allocation112_spill] sm:$0xff] %v3611_v17  ;;  %1090 = vbcast.lane.b32.xlu0 %v3594_v57, 272  ;;  %v3630_v17 = vrot.slane %v3545_v18, %v3214_v21 }
 0x1de   :  { %1117 = vbcast.lane.b32.xlu1 %v3609_v62, 256  ;;  %v3615_v15 = vpop.permute.xlu1 %791 }
 0x1df   :  { %5330 = vst [vmem:[#allocation113_spill] sm:$0xff] %v3615_v15 }
 0x1e0   :  { %v3617_v0 = vpop.permute.xlu0 %806 }
 0x1e1   :  { %1121 = vbcast.lane.b32.xlu0 %v3609_v62, 264 }
 0x1e2   :  { %1032 = vbcast.lane.b32.xlu1 %v1010_v44, 296  ;;  %v3620_v13 = vpop.permute.xlu1 %802 }
 0x1e4   :  { %v3622_v11 = vpop.permute.xlu0 %814 }
 0x1e5   :  { %5331 = vst [vmem:[#allocation114_spill] sm:$0xff] %v3622_v11  ;;  %1063 = vbcast.lane.b32.xlu0 %v3579_v4, 288 }
 0x1e6   :  { %1094 = vbcast.lane.b32.xlu1 %v3594_v57, 280  ;;  %v3626_v19 = vpop.permute.xlu1 %810 }
 0x1e7   :  { %5332 = vst [vmem:[#allocation115_spill] sm:$0xff] %v3626_v19 }
 0x1e8   :  { %v3632_v15 = vpop.permute.xlu0 %822 }
 0x1e9   :  { %5333 = vst [vmem:[#allocation116_spill] sm:$0xff] %v3632_v15  ;;  %1125 = vbcast.lane.b32.xlu0 %v3609_v62, 272 }
 0x1ea   :  { %1152 = vbcast.lane.b32.xlu1 %v3630_v17, 256  ;;  %v3636_v35 = vpop.permute.xlu1 %818 }
 0x1eb   :  { %5334 = vst [vmem:[#allocation117_spill] sm:$0xff] %v3636_v35  ;;  %v3657_v35 = vrot.slane %v3545_v18, %v3219_v23 }
 0x1ec   :  { %v3638_v14 = vpop.permute.xlu0 %830 }
 0x1ed   :  { %5335 = vst [vmem:[#allocation118_spill] sm:$0xff] %v3638_v14  ;;  %1156 = vbcast.lane.b32.xlu0 %v3630_v17, 264 }
 0x1ee   :  { %1036 = vbcast.lane.b32.xlu1 %v1010_v44, 304  ;;  %v3641_v11 = vpop.permute.xlu1 %826 }
 0x1ef   :  { %5336 = vst [vmem:[#allocation119_spill] sm:$0xff] %v3641_v11 }
 0x1f0   :  { %v3643_v19 = vpop.permute.xlu0 %841 }
 0x1f1   :  { %5337 = vst [vmem:[#allocation120_spill] sm:$0xff] %v3643_v19  ;;  %1067 = vbcast.lane.b32.xlu0 %v3579_v4, 296 }
 0x1f2   :  { %1098 = vbcast.lane.b32.xlu1 %v3594_v57, 288  ;;  %v3647_v21 = vpop.permute.xlu1 %837 }
 0x1f3   :  { %5338 = vst [vmem:[#allocation121_spill] sm:$0xff] %v3647_v21 }
 0x1f4   :  { %v3649_v15 = vpop.permute.xlu0 %849 }
 0x1f5   :  { %5339 = vst [vmem:[#allocation122_spill] sm:$0xff] %v3649_v15  ;;  %1129 = vbcast.lane.b32.xlu0 %v3609_v62, 280 }
 0x1f6   :  { %1160 = vbcast.lane.b32.xlu1 %v3630_v17, 272  ;;  %v3653_v14 = vpop.permute.xlu1 %845 }
 0x1f7   :  { %5340 = vst [vmem:[#allocation123_spill] sm:$0xff] %v3653_v14 }
 0x1f8   :  { %v3659_v11 = vpop.permute.xlu0 %857 }
 0x1f9   :  { %5341 = vst [vmem:[#allocation124_spill] sm:$0xff] %v3659_v11  ;;  %1187 = vbcast.lane.b32.xlu0 %v3657_v35, 256 }
 0x1fa   :  { %1191 = vbcast.lane.b32.xlu1 %v3657_v35, 264  ;;  %v3663_v19 = vpop.permute.xlu1 %853 }
 0x1fb   :  { %5342 = vst [vmem:[#allocation125_spill] sm:$0xff] %v3663_v19 }
 0x1fc   :  { %v3665_v21 = vpop.permute.xlu0 %865 }
 0x1fd   :  { %5343 = vst [vmem:[#allocation126_spill] sm:$0xff] %v3665_v21  ;;  %1040 = vbcast.lane.b32.xlu0 %v1010_v44, 312  ;;  %v1220_v44 = vrot.slane %v3545_v18, %v3228_v27 }
 0x1fe   :  { %1071 = vbcast.lane.b32.xlu1 %v3579_v4, 304  ;;  %v3668_v15 = vpop.permute.xlu1 %861 }
 0x1ff   :  { %5344 = vst [vmem:[#allocation127_spill] sm:$0xff] %v3668_v15 }
 0x200   :  { %v3670_v14 = vpop.permute.xlu0 %876 }
 0x201   :  { %5345 = vst [vmem:[#allocation128_spill] sm:$0xff] %v3670_v14  ;;  %1102 = vbcast.lane.b32.xlu0 %v3594_v57, 296 }
 0x202   :  { %1133 = vbcast.lane.b32.xlu1 %v3609_v62, 288  ;;  %v3674_v23 = vpop.permute.xlu1 %872 }
 0x203   :  { %5346 = vst [vmem:[#allocation129_spill] sm:$0xff] %v3674_v23 }
 0x204   :  { %v3676_v11 = vpop.permute.xlu0 %884 }
 0x205   :  { %5347 = vst [vmem:[#allocation130_spill] sm:$0xff] %v3676_v11  ;;  %1164 = vbcast.lane.b32.xlu0 %v3630_v17, 280 }
 0x206   :  { %1195 = vbcast.lane.b32.xlu1 %v3657_v35, 272  ;;  %v3680_v21 = vpop.permute.xlu1 %880 }
 0x207   :  { %5348 = vst [vmem:[#allocation131_spill] sm:$0xff] %v3680_v21 }
 0x208   :  { %v3684_v19 = vpop.permute.xlu0 %892 }
 0x209   :  { %5349 = vst [vmem:[#allocation132_spill] sm:$0xff] %v3684_v19  ;;  %1222 = vbcast.lane.b32.xlu0 %v1220_v44, 256 }
 0x20a   :  { %1226 = vbcast.lane.b32.xlu1 %v1220_v44, 264  ;;  %v3686_v15 = vpop.permute.xlu1 %888 }
 0x20b   :  { %5350 = vst [vmem:[#allocation133_spill] sm:$0xff] %v3686_v15 }
 0x20c   :  { %v3688_v14 = vpop.permute.xlu0 %900 }
 0x20d   :  { %5351 = vst [vmem:[#allocation134_spill] sm:$0xff] %v3688_v14  ;;  %1075 = vbcast.lane.b32.xlu0 %v3579_v4, 312 }
 0x20e   :  { %1106 = vbcast.lane.b32.xlu1 %v3594_v57, 304  ;;  %v3692_v11 = vpop.permute.xlu1 %896 }
 0x20f   :  { %5352 = vst [vmem:[#allocation135_spill] sm:$0xff] %v3692_v11 }
 0x210   :  { %v3694_v23 = vpop.permute.xlu0 %911 }
 0x211   :  { %5353 = vst [vmem:[#allocation136_spill] sm:$0xff] %v3694_v23  ;;  %1137 = vbcast.lane.b32.xlu0 %v3609_v62, 296 }
 0x212   :  { %1168 = vbcast.lane.b32.xlu1 %v3630_v17, 288  ;;  %v3698_v27 = vpop.permute.xlu1 %907 }
 0x213   :  { %5354 = vst [vmem:[#allocation137_spill] sm:$0xff] %v3698_v27 }
 0x214   :  { %v3700_v18 = vpop.permute.xlu0 %919 }
 0x215   :  { %5355 = vst [vmem:[#allocation138_spill] sm:$0xff] %v3700_v18  ;;  %1199 = vbcast.lane.b32.xlu0 %v3657_v35, 280 }
 0x216   :  { %1230 = vbcast.lane.b32.xlu1 %v1220_v44, 272  ;;  %v3703_v14 = vpop.permute.xlu1 %915 }
 0x217   :  { %5356 = vst [vmem:[#allocation139_spill] sm:$0xff] %v3703_v14 }
 0x218   :  { %v3705_v4 = vpop.permute.xlu0 %927 }
 0x219   :  { %5357 = vst [vmem:[#allocation140_spill] sm:$0xff] %v3705_v4  ;;  %1110 = vbcast.lane.b32.xlu0 %v3594_v57, 312  ;;  %v3137_v57 = vmov 1966171168  }
 0x21a   :  { %1141 = vbcast.lane.b32.xlu1 %v3609_v62, 304  ;;  %v3709_v11 = vpop.permute.xlu1 %923  ;;  %v1319_v14 = vunpack.c.l.s4 %v3137_v57  ;;  %v3739_v57 = vsel %vm41_vm0, %v3172_v3, %v3249_v36 }
 0x21b   :  { %5358 = vst [vmem:[#allocation141_spill] sm:$0xff] %v3709_v11 }
 0x21c   :  { %v3711_v19 = vpop.permute.xlu0 %935  ;;  %v1320_v27 = vunpack.c.0.s8 %v1319_v14 }
 0x21d   :  { %5359 = vst [vmem:[#allocation142_spill] sm:$0xff] %v3711_v19  ;;  %1172 = vbcast.lane.b32.xlu0 %v3630_v17, 296 }
 0x21e   :  { %1203 = vbcast.lane.b32.xlu1 %v3657_v35, 288  ;;  %v3715_v18 = vpop.permute.xlu1 %931 }
 0x21f   :  { %5360 = vst [vmem:[#allocation143_spill] sm:$0xff] %v3715_v18 }
 0x220   :  { %v3717_v15 = vpop.permute.xlu0 %946 }
 0x221   :  { %5361 = vst [vmem:[#allocation144_spill] sm:$0xff] %v3717_v15  ;;  %1234 = vbcast.lane.b32.xlu0 %v1220_v44, 280 }
 0x222   :  { %1145 = vbcast.lane.b32.xlu1 %v3609_v62, 312  ;;  %v3720_v4 = vpop.permute.xlu1 %942  ;;  %v3734_v62 = vsub.s32 %v1320_v27, %v3179_v8 }
 0x223   :  { %5362 = vst [vmem:[#allocation145_spill] sm:$0xff] %v3720_v4 }
 0x224   :  { %v3722_v23 = vpop.permute.xlu0 %954 }
 0x225   :  { %5363 = vst [vmem:[#allocation146_spill] sm:$0xff] %v3722_v23  ;;  %1176 = vbcast.lane.b32.xlu0 %v3630_v17, 304 }
 0x226   :  { %1207 = vbcast.lane.b32.xlu1 %v3657_v35, 296  ;;  %v3726_v19 = vpop.permute.xlu1 %950 }
 0x227   :  { %5364 = vst [vmem:[#allocation147_spill] sm:$0xff] %v3726_v19 }
 0x228   :  { %v3728_v21 = vpop.permute.xlu0 %962 }
 0x229   :  { %5365 = vst [vmem:[#allocation148_spill] sm:$0xff] %v3728_v21  ;;  %1238 = vbcast.lane.b32.xlu0 %v1220_v44, 288  ;;  %v5369_v21 = vlaneseq }
 0x22a   :  { %1180 = vbcast.lane.b32.xlu1 %v3630_v17, 312  ;;  %v3731_v18 = vpop.permute.xlu1 %958  ;;  %v1324_v17 = vrot.slane %v3739_v57, %v3734_v62 }
 0x22b   :  { %5366 = vst [vmem:[#allocation149_spill] sm:$0xff] %v3731_v18  ;;  %v3747_v19 = vand.u32 127, %v5369_v21 }
 0x22c   :  { %v3741_v23 = vpop.permute.xlu0 %970  ;;  %v1340_v3 = vrot.slane %v1324_v17, %v3734_v62 }
 0x22d   :  { %5367 = vst [vmem:[#allocation150_spill] sm:$0xff] %v3741_v23  ;;  %1211 = vbcast.lane.b32.xlu0 %v3657_v35, 304  ;;  %vm65_vm3 = vcmp.lt.s32.totalorder %v3747_v19, 64  ;;  %v1332_v23 = vcombine.high %v1324_v17, %v1324_v17 }
 0x22e   :  { %1242 = vbcast.lane.b32.xlu1 %v1220_v44, 296  ;;  %v3744_v14 = vpop.permute.xlu1 %966  ;;  %v629_v21 = vsel %vm65_vm3, %v3236_v31, %v3392_v22  ;;  %v3761_v8 = vrot.slane %v1340_v3, %v3182_v9 }
 0x22f   :  { %5368 = vst [vmem:[#allocation151_spill] sm:$0xff] %v3744_v14  ;;  %v3774_v4 = vrot.slane %v1332_v23, %v3734_v62 }
 0x230   :  { %v982_v27 = vpop.permute.xlu0 %981  ;;  %v1407_v17 = vmul.f32 %v3761_v8, %v629_v21 }
 0x231   :  { %1215 = vbcast.lane.b32.xlu0 %v3657_v35, 312  ;;  %v628_v35 = vsel %vm65_vm3, %v3234_v30, %v3396_v20  ;;  %v1253_v15 = vsel %vm65_vm3, %v3543_v25, %v982_v27  ;;  %v637_v25 = vsel %vm65_vm3, %v3261_v42, %v3412_v58  ;;  %v3790_v23 = vrot.slane %v3774_v4, %v3182_v9 }
 0x232   :  { %1246 = vbcast.lane.b32.xlu1 %v1220_v44, 304  ;;  %v978_v18 = vpop.permute.xlu1 %977  ;;  %v1406_v11 = vmul.f32 %v3761_v8, %v628_v35  ;;  %v1471_v30 = vsub.f32 %v1407_v17, %v1253_v15 }
 0x233   :  { %v1252_v31 = vsel %vm65_vm3, %v3547_v16, %v978_v18  ;;  %v636_v16 = vsel %vm65_vm3, %v3263_v43, %v3414_v49  ;;  %v1415_v18 = vmul.f32 %v3790_v23, %v637_v25 }
 0x234   :  { %v3754_v36 = vpop.permute.xlu0 %989  ;;  %v1470_v27 = vsub.f32 %v1406_v11, %v1252_v31  ;;  %v1536_v15 = vmul.f32 1.442695, %v1471_v30  ;;  %v1414_v11 = vmul.f32 %v3790_v23, %v636_v16  ;;  %v630_v30 = vsel %vm65_vm3, %v3238_v32, %v3402_v59 }
 0x235   :  { %1250 = vbcast.lane.b32.xlu0 %v1220_v44, 312  ;;  %v638_v16 = vsel %vm65_vm3, %v3269_v46, %v3420_v5  ;;  %v644_v32 = vsel %vm65_vm3, %v3281_v52, %v3432_v56 }
 0x236   :  { %v986_v14 = vpop.permute.xlu1 %985  ;;  %v1534_v17 = vmul.f32 1.442695, %v1470_v27  ;;  %2979 = vpow2.f32 %v1536_v15  ;;  %v1362_v27 = vcombine.high %v1340_v3, %v1340_v3  ;;  %v1408_v15 = vmul.f32 %v3761_v8, %v630_v30 }
 0x237   :  { %v1416_v5 = vmul.f32 %v3790_v23, %v638_v16 }
 0x238   :  { %v3770_v44 = vpop.permute.xlu0 %997  ;;  %2981 = vpow2.f32 %v1534_v17  ;;  %v3826_v46 = vrot.slane %v1362_v27, %v3182_v9 }
 0x23a   :  { %v3779_v22 = vpop.permute.xlu1 %993 }
 0x23c   :  { %v3782_v20 = vpop.permute.xlu0 %1005 }
 0x23d   :  { %5370 = vst [vmem:[#allocation152_spill] sm:$0xff] %v3782_v20 }
 0x23e   :  { %v3792_v21 = vpop.permute.xlu1 %1001 }
 0x23f   :  { %5371 = vst [vmem:[#allocation153_spill] sm:$0xff] %v3792_v21 }
 0x240   :  { %v1017_v35 = vpop.permute.xlu0 %1016 }
 0x241   :  { %v1261_v42 = vsel %vm65_vm3, %v3563_v38, %v1017_v35 }
 0x242   :  { %v1479_v58 = vsub.f32 %v1415_v18, %v1261_v42  ;;  %v1013_v31 = vpop.permute.xlu1 %1012 }
 0x243   :  { %v1260_v20 = vsel %vm65_vm3, %v3565_v7, %v1013_v31  ;;  %v1254_v7 = vsel %vm65_vm3, %v3553_v53, %v986_v14  ;;  %v645_v14 = vsel %vm65_vm3, %v3279_v51, %v3430_v2 }
 0x244   :  { %v1478_v21 = vsub.f32 %v1414_v11, %v1260_v20  ;;  %v1048_v43 = vpop.permute.xlu0 %1047  ;;  %v1552_v49 = vmul.f32 1.442695, %v1479_v58  ;;  %v1472_v53 = vsub.f32 %v1408_v15, %v1254_v7  ;;  %v1423_v17 = vmul.f32 %v3826_v46, %v645_v14  ;;  %v2980_v58 = vpop.eup %2979 }
 0x245   :  { %v1268_v52 = vsel %vm65_vm3, %v3590_v33, %v1048_v43  ;;  %v1663_v30 = vsel %vm65_vm3, %v2980_v58, 0.0  ;;  %v631_v7 = vsel %vm65_vm3, %v3257_v40, %v3400_v1  ;;  %v1364_v40 = vcombine.high %v3774_v4, %v3774_v4 }
 0x246   :  { %v1550_v25 = vmul.f32 1.442695, %v1478_v21  ;;  %v1021_v38 = vpop.permute.xlu1 %1020  ;;  %v1422_v21 = vmul.f32 %v3826_v46, %v644_v32  ;;  %v1538_v42 = vmul.f32 1.442695, %v1472_v53  ;;  %v1409_v1 = vmul.f32 %v3761_v8, %v631_v7 }
 0x247   :  { %v1262_v59 = vsel %vm65_vm3, %v3571_v37, %v1021_v38  ;;  %v652_v14 = vsel %vm65_vm3, %v3299_v61, %v3450_v29 }
 0x248   :  { %2983 = vpow2.f32 %v1550_v25  ;;  %v1025_v20 = vpop.permute.xlu0 %1024  ;;  %v1480_v37 = vsub.f32 %v1416_v5, %v1262_v59  ;;  %v1486_v11 = vsub.f32 %v1422_v21, %v1268_v52  ;;  %v639_v59 = vsel %vm65_vm3, %v3267_v45, %v3418_v41 }
 0x249   :  { %2985 = vpow2.f32 %v1552_v49  ;;  %v2982_v49 = vpop.eup %2981  ;;  %v646_v41 = vsel %vm65_vm3, %v3287_v55, %v3438_v39  ;;  %v1263_v45 = vsel %vm65_vm3, %v3569_v47, %v1025_v20  ;;  %v1417_v4 = vmul.f32 %v3790_v23, %v639_v59 }
 0x24a   :  { %v1052_v3 = vpop.permute.xlu1 %1051  ;;  %v1554_v51 = vmul.f32 1.442695, %v1480_v37  ;;  %2987 = vpow2.f32 %v1538_v42  ;;  %v1566_v43 = vmul.f32 1.442695, %v1486_v11  ;;  %v1662_v27 = vsel %vm65_vm3, %v2982_v49, 0.0 }
 0x24b   :  { %v1269_v18 = vsel %vm65_vm3, %v3587_v28, %v1052_v3  ;;  %v1255_v3 = vsel %vm65_vm3, %v3551_v63, %v3754_v36  ;;  %v3890_v47 = vrot.slane %v1364_v40, %v3182_v9  ;;  %v1424_v55 = vmul.f32 %v3826_v46, %v646_v41  ;;  %v5374_v41 = vld [vmem:[#allocation17_spill] sm:$0xff] }
 0x24c   :  { %v1083_v56 = vpop.permute.xlu0 %1082  ;;  %v1487_v2 = vsub.f32 %v1423_v17, %v1269_v18  ;;  %2989 = vpow2.f32 %v1554_v51  ;;  %v1473_v36 = vsub.f32 %v1409_v1, %v1255_v3  ;;  %v1481_v20 = vsub.f32 %v1417_v4, %v1263_v45 }
 0x24d   :  { %2991 = vpow2.f32 %v1566_v43  ;;  %v653_v52 = vsel %vm65_vm3, %v3297_v60, %v3448_v24  ;;  %v1276_v61 = vsel %vm65_vm3, %v3620_v13, %v1083_v56  ;;  %v1317_v43 = vcombine.high %v3739_v57, %v3739_v57 }
 0x24e   :  { %v1056_v35 = vpop.permute.xlu1 %1055  ;;  %v1568_v28 = vmul.f32 1.442695, %v1487_v2  ;;  %v1540_v21 = vmul.f32 1.442695, %v1473_v36  ;;  %v1431_v17 = vmul.f32 %v3890_v47, %v653_v52  ;;  %v1556_v60 = vmul.f32 1.442695, %v1481_v20 }
 0x24f   :  { %v1270_v39 = vsel %vm65_vm3, %v3600_v6, %v1056_v35  ;;  %v1430_v6 = vmul.f32 %v3890_v47, %v652_v14  ;;  %v3926_v7 = vrot.slane %v1317_v43, %v3734_v62  ;;  %v632_v57 = vsel %vm65_vm3, %v3245_v34, %v3406_v10  ;;  %v5375_v14 = vld [vmem:[#allocation109_spill] sm:$0xff]  ;;  %v5376_v52 = vld [vmem:[#allocation71_spill] sm:$0xff] }
 0x250   :  { %v3841_v31 = vpop.permute.xlu0 %1028  ;;  %2993 = vpow2.f32 %v1568_v28  ;;  %v1488_v37 = vsub.f32 %v1424_v55, %v1270_v39  ;;  %v640_v59 = vsel %vm65_vm3, %v3273_v48, %v3424_v12  ;;  %v1256_v3 = vsel %vm65_vm3, %v3557_v26, %v3779_v22  ;;  %v5372_v48 = vld [vmem:[#allocation106_spill] sm:$0xff] }
 0x251   :  { %v1494_v24 = vsub.f32 %v1430_v6, %v1276_v61  ;;  %2995 = vpow2.f32 %v1540_v21  ;;  %v1410_v40 = vmul.f32 %v3761_v8, %v632_v57  ;;  %v3947_v34 = vrot.slane %v3926_v7, %v3734_v62  ;;  %v5377_v61 = vld [vmem:[#allocation23_spill] sm:$0xff] }
 0x252   :  { %v1087_v33 = vpop.permute.xlu1 %1086  ;;  %v1570_v11 = vmul.f32 1.442695, %v1488_v37  ;;  %2997 = vpow2.f32 %v1556_v60  ;;  %v647_v10 = vsel %vm65_vm3, %v3285_v54, %v3436_v50  ;;  %v1264_v12 = vsel %vm65_vm3, %v5372_v48, %v3841_v31  ;;  %v5378_v21 = vld [vmem:[#allocation115_spill] sm:$0xff] }
 0x253   :  { %v1277_v35 = vsel %vm65_vm3, %v3617_v0, %v1087_v33  ;;  %v1582_v0 = vmul.f32 1.442695, %v1494_v24  ;;  %v1418_v22 = vmul.f32 %v3790_v23, %v640_v59  ;;  %v1474_v4 = vsub.f32 %v1410_v40, %v1256_v3 }
 0x254   :  { %1728 = vadd.xlane.f32.xlu0 %v1663_v30  ;;  %v3845_v38 = vpop.permute.xlu0 %1090  ;;  %2999 = vpow2.f32 %v1570_v11  ;;  %v1425_v54 = vmul.f32 %v3826_v46, %v647_v10  ;;  %v3971_v55 = vrot.slane %v3947_v34, %v3182_v9  ;;  %v660_v6 = vsel %vm65_vm3, %v5377_v61, %v5376_v52  ;;  %v5385_v61 = vld [vmem:[#allocation57_spill] sm:$0xff] }
 0x255   :  { %v2984_v25 = vpop.eup %2983  ;;  %3001 = vpow2.f32 %v1582_v0  ;;  %v1482_v31 = vsub.f32 %v1418_v22, %v1264_v12  ;;  %v1542_v60 = vmul.f32 1.442695, %v1474_v4 }
 0x256   :  { %v2986_v16 = vpop.eup %2985  ;;  %1726 = vadd.xlane.f32.xlu1 %v1662_v27  ;;  %v3853_v15 = vpop.permute.xlu1 %1059  ;;  %v1670_v32 = vsel %vm65_vm3, %v2984_v25, 0.0 }
 0x257   :  { %v1671_v5 = vsel %vm65_vm3, %v2986_v16, 0.0  ;;  %v2988_v18 = vpop.eup %2987  ;;  %v1271_v50 = vsel %vm65_vm3, %v5375_v14, %v3853_v15  ;;  %v1278_v15 = vsel %vm65_vm3, %v5378_v21, %v3845_v38  ;;  %v1558_v0 = vmul.f32 1.442695, %v1482_v31 }
 0x258   :  { %1742 = vadd.xlane.f32.xlu0 %v1670_v32  ;;  %v3880_v53 = vpop.permute.xlu0 %1121  ;;  %v1664_v51 = vsel %vm65_vm3, %v2988_v18, 0.0  ;;  %v1489_v24 = vsub.f32 %v1425_v54, %v1271_v50  ;;  %v5383_v50 = vld [vmem:[#allocation54_spill] sm:$0xff] }
 0x259   :  { %v2990_v13 = vpop.eup %2989  ;;  %v5384_v54 = vld [vmem:[#allocation6_spill] sm:$0xff] }
 0x25a   :  { %1744 = vadd.xlane.f32.xlu1 %v1671_v5  ;;  %v3877_v63 = vpop.permute.xlu1 %1117  ;;  %v2992_v2 = vpop.eup %2991  ;;  %v5373_v5 = vld [vmem:[#allocation65_spill] sm:$0xff]  ;;  %v633_v31 = vsel %vm65_vm3, %v5384_v54, %v5383_v50 }
 0x25b   :  { %v1678_v27 = vsel %vm65_vm3, %v2992_v2, 0.0  ;;  %v654_v45 = vsel %vm65_vm3, %v5374_v41, %v5373_v5 }
 0x25c   :  { %1854 = vadd.xlane.f32.xlu0 %v2982_v49  ;;  %v3907_v42 = vpop.permute.xlu0 %1063  ;;  %v1672_v49 = vsel %vm65_vm3, %v2990_v13, 0.0  ;;  %v1432_v20 = vmul.f32 %v3890_v47, %v654_v45 }
 0x25d   :  { %v2994_v33 = vpop.eup %2993 }
 0x25e   :  { %1856 = vadd.xlane.f32.xlu1 %v2980_v58  ;;  %v3900_v29 = vpop.permute.xlu1 %1032  ;;  %v1495_v58 = vsub.f32 %v1431_v17, %v1277_v35  ;;  %v2996_v36 = vpop.eup %2995  ;;  %v5380_v35 = vld [vmem:[#allocation22_spill] sm:$0xff] }
 0x25f   :  { %v2998_v39 = vpop.eup %2997  ;;  %v1665_v11 = vsel %vm65_vm3, %v2996_v36, 0.0 }
 0x260   :  { %1870 = vadd.xlane.f32.xlu0 %v2984_v25  ;;  %v1584_v25 = vmul.f32 1.442695, %v1495_v58  ;;  %v3919_v28 = vpop.permute.xlu0 %1125 }
 0x261   :  { %v3000_v58 = vpop.eup %2999 }
 0x262   :  { %1872 = vadd.xlane.f32.xlu1 %v2986_v16  ;;  %v3909_v56 = vpop.permute.xlu1 %1094  ;;  %v1679_v16 = vsel %vm65_vm3, %v2994_v33, 0.0  ;;  %3003 = vpow2.f32 %v1584_v25  ;;  %v3002_v43 = vpop.eup %3001  ;;  %v1680_v3 = vsel %vm65_vm3, %v3000_v58, 0.0 }
 0x263   :  { %3005 = vpow2.f32 %v1542_v60  ;;  %v1686_v22 = vsel %vm65_vm3, %v3002_v43, 0.0  ;;  %v5388_v60 = vld [vmem:[#allocation61_spill] sm:$0xff] }
 0x264   :  { %1730 = vadd.xlane.f32.xlu0 %v1664_v51  ;;  %v3943_v1 = vpop.permute.xlu0 %1156  ;;  %v5381_v51 = vld [vmem:[#allocation121_spill] sm:$0xff]  ;;  %3007 = vpow2.f32 %v1558_v0 }
 0x265   :  { %v1284_v38 = vsel %vm65_vm3, %v5381_v51, %v3877_v63  ;;  %v1572_v63 = vmul.f32 1.442695, %v1489_v24  ;;  %v5389_v24 = vld [vmem:[#allocation13_spill] sm:$0xff] }
 0x266   :  { %1746 = vadd.xlane.f32.xlu1 %v1672_v49  ;;  %v3917_v30 = vpop.permute.xlu1 %1152  ;;  %v1496_v49 = vsub.f32 %v1432_v20, %v1278_v15 }
 0x267   :  { %3009 = vpow2.f32 %v1572_v63  ;;  %v5394_v63 = vld [vmem:[#allocation73_spill] sm:$0xff] }
 0x268   :  { %1758 = vadd.xlane.f32.xlu0 %v1678_v27  ;;  %v5382_v27 = vld [vmem:[#allocation120_spill] sm:$0xff]  ;;  %v1586_v10 = vmul.f32 1.442695, %v1496_v49 }
 0x26a   :  { %1760 = vadd.xlane.f32.xlu1 %v1679_v16  ;;  %v3932_v32 = vpop.permute.xlu1 %1036  ;;  %v1285_v16 = vsel %vm65_vm3, %v5382_v27, %v3880_v53  ;;  %3011 = vpow2.f32 %v1586_v10 }
 0x26c   :  { %1858 = vadd.xlane.f32.xlu0 %v2988_v18  ;;  %v5379_v18 = vld [vmem:[#allocation70_spill] sm:$0xff] }
 0x26d   :  { %v661_v17 = vsel %vm65_vm3, %v5380_v35, %v5379_v18  ;;  %v1411_v18 = vmul.f32 %v3761_v8, %v633_v31 }
 0x26e   :  { %1874 = vadd.xlane.f32.xlu1 %v2990_v13  ;;  %v3957_v26 = vpop.permute.xlu1 %1098  ;;  %v3988_v13 = vpop.permute.xlu0 %1067  ;;  %v1439_v25 = vmul.f32 %v3971_v55, %v661_v17 }
 0x26f   :  { %v3004_v40 = vpop.eup %3003 }
 0x270   :  { %1886 = vadd.xlane.f32.xlu0 %v2992_v2  ;;  %v1438_v2 = vmul.f32 %v3971_v55, %v660_v6  ;;  %v1503_v48 = vsub.f32 %v1439_v25, %v1285_v16  ;;  %v1687_v41 = vsel %vm65_vm3, %v3004_v40, 0.0  ;;  %v4026_v52 = vpop.eup %3005  ;;  %v5386_v6 = vld [vmem:[#allocation9_spill] sm:$0xff] }
 0x271   :  { %v641_v21 = vsel %vm65_vm3, %v5386_v6, %v5385_v61  ;;  %v4041_v17 = vpop.eup %3007 }
 0x272   :  { %1888 = vadd.xlane.f32.xlu1 %v2994_v33  ;;  %v3982_v37 = vpop.permute.xlu1 %1160  ;;  %v1673_v33 = vsel %vm65_vm3, %v2998_v39, 0.0  ;;  %v1502_v59 = vsub.f32 %v1438_v2, %v1284_v38  ;;  %v4008_v12 = vpop.permute.xlu0 %1129  ;;  %v1600_v45 = vmul.f32 1.442695, %v1503_v48  ;;  %v5391_v38 = vld [vmem:[#allocation64_spill] sm:$0xff]  ;;  %v1674_v10 = vsel %vm65_vm3, %v4041_v17, 0.0 }
 0x273   :  { %v5392_v2 = vld [vmem:[#allocation16_spill] sm:$0xff] }
 0x274   :  { %1732 = vadd.xlane.f32.xlu0 %v1665_v11  ;;  %v1598_v5 = vmul.f32 1.442695, %v1502_v59  ;;  %v5390_v11 = vld [vmem:[#allocation105_spill] sm:$0xff]  ;;  %v655_v0 = vsel %vm65_vm3, %v5392_v2, %v5391_v38 }
 0x275   :  { %v5395_v59 = vld [vmem:[#allocation25_spill] sm:$0xff]  ;;  %v1433_v48 = vmul.f32 %v3890_v47, %v655_v0 }
 0x276   :  { %1748 = vadd.xlane.f32.xlu1 %v1673_v33  ;;  %v4004_v57 = vpop.permute.xlu1 %1191  ;;  %3013 = vpow2.f32 %v1598_v5  ;;  %v4018_v14 = vpop.permute.xlu0 %1187  ;;  %v1666_v33 = vsel %vm65_vm3, %v4026_v52, 0.0  ;;  %v5402_v2 = vld [vmem:[#allocation129_spill] sm:$0xff] }
 0x277   :  { %3015 = vpow2.f32 %v1600_v45  ;;  %v5398_v45 = vld [vmem:[#allocation31_spill] sm:$0xff]  ;;  %v1292_v0 = vsel %vm65_vm3, %v5402_v2, %v3917_v30 }
 0x278   :  { %1762 = vadd.xlane.f32.xlu0 %v1680_v3  ;;  %v662_v3 = vsel %vm65_vm3, %v5395_v59, %v5394_v63 }
 0x27a   :  { %1774 = vadd.xlane.f32.xlu1 %v1686_v22  ;;  %v4012_v53 = vpop.permute.xlu1 %1071  ;;  %v4039_v35 = vpop.permute.xlu0 %1040  ;;  %v5396_v22 = vld [vmem:[#allocation114_spill] sm:$0xff] }
 0x27c   :  { %1776 = vadd.xlane.f32.xlu0 %v1687_v41  ;;  %v5397_v41 = vld [vmem:[#allocation79_spill] sm:$0xff] }
 0x27d   :  { %v668_v50 = vsel %vm65_vm3, %v5398_v45, %v5397_v41  ;;  %v1363_v45 = vcombine.high %v3947_v34, %v3947_v34  ;;  %v5408_v34 = vld [vmem:[#allocation127_spill] sm:$0xff] }
 0x27e   :  { %1860 = vadd.xlane.f32.xlu1 %v2996_v36  ;;  %v4016_v4 = vpop.permute.xlu1 %1133  ;;  %v1333_v36 = vcombine.high %v3926_v7, %v3926_v7  ;;  %v648_v7 = vsel %vm65_vm3, %v5389_v24, %v5388_v60  ;;  %v5401_v60 = vld [vmem:[#allocation30_spill] sm:$0xff] }
 0x27f   :  { %v1426_v16 = vmul.f32 %v3826_v46, %v648_v7 }
 0x280   :  { %1876 = vadd.xlane.f32.xlu0 %v2998_v39  ;;  %v5387_v39 = vld [vmem:[#allocation102_spill] sm:$0xff]  ;;  %v4064_v25 = vrot.slane %v1333_v36, %v3734_v62  ;;  %v4089_v36 = vpop.permute.xlu0 %1102 }
 0x281   :  { %v1257_v15 = vsel %vm65_vm3, %v5387_v39, %v3770_v44  ;;  %v1419_v44 = vmul.f32 %v3790_v23, %v641_v21  ;;  %v1440_v21 = vmul.f32 %v3971_v55, %v662_v3  ;;  %v5399_v39 = vld [vmem:[#allocation123_spill] sm:$0xff] }
 0x282   :  { %1890 = vadd.xlane.f32.xlu1 %v3000_v58  ;;  %v4024_v20 = vpop.permute.xlu1 %1195  ;;  %v1265_v58 = vsel %vm65_vm3, %v5390_v11, %v3900_v29  ;;  %v1475_v49 = vsub.f32 %v1411_v18, %v1257_v15  ;;  %v5393_v29 = vld [vmem:[#allocation111_spill] sm:$0xff]  ;;  %v1286_v15 = vsel %vm65_vm3, %v5399_v39, %v3919_v28  ;;  %v5400_v18 = vld [vmem:[#allocation78_spill] sm:$0xff] }
 0x283   :  { %v1272_v27 = vsel %vm65_vm3, %v5393_v29, %v3907_v42  ;;  %v1279_v42 = vsel %vm65_vm3, %v5396_v22, %v3909_v56  ;;  %v4096_v56 = vrot.slane %v4064_v25, %v3182_v9  ;;  %v669_v24 = vsel %vm65_vm3, %v5401_v60, %v5400_v18  ;;  %v5405_v22 = vld [vmem:[#allocation29_spill] sm:$0xff] }
 0x284   :  { %1902 = vadd.xlane.f32.xlu0 %v3002_v43  ;;  %v4061_v43 = vpop.eup %3009  ;;  %v1544_v54 = vmul.f32 1.442695, %v1475_v49  ;;  %v1490_v31 = vsub.f32 %v1426_v16, %v1272_v27  ;;  %v1497_v11 = vsub.f32 %v1433_v48, %v1279_v42  ;;  %v5403_v16 = vld [vmem:[#allocation128_spill] sm:$0xff]  ;;  %v4123_v3 = vpop.permute.xlu0 %1164  ;;  %v5404_v48 = vld [vmem:[#allocation77_spill] sm:$0xff]  ;;  %v4152_v60 = vrot.slane %v1363_v45, %v3182_v9 }
 0x285   :  { %v3012_v62 = vpop.eup %3011  ;;  %v1681_v61 = vsel %vm65_vm3, %v4061_v43, 0.0  ;;  %v1446_v38 = vmul.f32 %v4096_v56, %v668_v50  ;;  %v1447_v27 = vmul.f32 %v4096_v56, %v669_v24  ;;  %v1293_v63 = vsel %vm65_vm3, %v5403_v16, %v3943_v1  ;;  %v5412_v16 = vld [vmem:[#allocation59_spill] sm:$0xff]  ;;  %v5418_v45 = vld [vmem:[#allocation108_spill] sm:$0xff] }
 0x286   :  { %1904 = vadd.xlane.f32.xlu1 %v3004_v40  ;;  %v4051_v51 = vpop.permute.xlu1 %1226  ;;  %v1483_v40 = vsub.f32 %v1419_v44, %v1265_v58  ;;  %v3014_v6 = vpop.eup %3013  ;;  %v1688_v58 = vsel %vm65_vm3, %v3012_v62, 0.0  ;;  %3017 = vpow2.f32 %v1544_v54  ;;  %v1574_v49 = vmul.f32 1.442695, %v1490_v31 }
 0x287   :  { %v3016_v44 = vpop.eup %3015  ;;  %v1694_v29 = vsel %vm65_vm3, %v3014_v6, 0.0  ;;  %v1588_v59 = vmul.f32 1.442695, %v1497_v11  ;;  %v1510_v30 = vsub.f32 %v1446_v38, %v1292_v0  ;;  %v666_v42 = vsel %vm65_vm3, %v5405_v22, %v5404_v48  ;;  %v5409_v11 = vld [vmem:[#allocation141_spill] sm:$0xff] }
 0x288   :  { %1734 = vadd.xlane.f32.xlu0 %v1666_v33  ;;  %v1560_v7 = vmul.f32 1.442695, %v1483_v40  ;;  %v1504_v33 = vsub.f32 %v1440_v21, %v1286_v15  ;;  %v1695_v40 = vsel %vm65_vm3, %v3016_v44, 0.0  ;;  %v1511_v1 = vsub.f32 %v1447_v27, %v1293_v63  ;;  %v5407_v21 = vld [vmem:[#allocation43_spill] sm:$0xff]  ;;  %v4144_v18 = vpop.permute.xlu0 %1222 }
 0x289   :  { %v1614_v50 = vmul.f32 1.442695, %v1510_v30  ;;  %v4137_v54 = vmul.f32 %v3971_v55, %v666_v42  ;;  %v5413_v63 = vld [vmem:[#allocation11_spill] sm:$0xff]  ;;  %v5415_v30 = vld [vmem:[#allocation104_spill] sm:$0xff] }
 0x28a   :  { %1750 = vadd.xlane.f32.xlu1 %v1674_v10  ;;  %v4083_v5 = vpop.permute.xlu1 %1106  ;;  %3019 = vpow2.f32 %v1560_v7  ;;  %v1602_v41 = vmul.f32 1.442695, %v1504_v33  ;;  %v1616_v15 = vmul.f32 1.442695, %v1511_v1  ;;  %v5411_v33 = vld [vmem:[#allocation7_spill] sm:$0xff]  ;;  %v5416_v42 = vld [vmem:[#allocation60_spill] sm:$0xff] }
 0x28b   :  { %3021 = vpow2.f32 %v1574_v49  ;;  %v5410_v49 = vld [vmem:[#allocation56_spill] sm:$0xff] }
 0x28c   :  { %1764 = vadd.xlane.f32.xlu0 %v1681_v61  ;;  %3023 = vpow2.f32 %v1588_v59  ;;  %v5406_v61 = vld [vmem:[#allocation91_spill] sm:$0xff]  ;;  %v4169_v0 = vpop.permute.xlu0 %1075  ;;  %v5414_v59 = vld [vmem:[#allocation153_spill] sm:$0xff] }
 0x28d   :  { %v680_v39 = vsel %vm65_vm3, %v5407_v21, %v5406_v61  ;;  %3025 = vpow2.f32 %v1602_v41  ;;  %v5417_v41 = vld [vmem:[#allocation12_spill] sm:$0xff]  ;;  %v5419_v61 = vld [vmem:[#allocation67_spill] sm:$0xff] }
 0x28e   :  { %1778 = vadd.xlane.f32.xlu1 %v1688_v58  ;;  %v4114_v28 = vpop.permute.xlu1 %1168  ;;  %3027 = vpow2.f32 %v1614_v50  ;;  %v4158_v24 = vmul.f32 %v4152_v60, %v680_v39  ;;  %v649_v1 = vsel %vm65_vm3, %v5417_v41, %v5416_v42  ;;  %v1266_v50 = vsel %vm65_vm3, %v5418_v45, %v3932_v32  ;;  %v5420_v21 = vld [vmem:[#allocation19_spill] sm:$0xff] }
 0x28f   :  { %3029 = vpow2.f32 %v1616_v15  ;;  %v656_v39 = vsel %vm65_vm3, %v5420_v21, %v5419_v61 }
 0x290   :  { %1790 = vadd.xlane.f32.xlu0 %v1694_v29 }
 0x292   :  { %1792 = vadd.xlane.f32.xlu1 %v1695_v40  ;;  %v4127_v10 = vpop.permute.xlu1 %1230  ;;  %v1258_v40 = vsel %vm65_vm3, %v5415_v30, %v5414_v59  ;;  %v5423_v59 = vld [vmem:[#allocation24_spill] sm:$0xff] }
 0x293   :  { %v4165_v38 = vpop.eup %3017 }
 0x294   :  { %1862 = vadd.xlane.f32.xlu0 %v4026_v52  ;;  %v1667_v29 = vsel %vm65_vm3, %v4165_v38, 0.0 }
 0x296   :  { %1878 = vadd.xlane.f32.xlu1 %v4041_v17  ;;  %v1142_v31 = vpop.permute.xlu1 %1141  ;;  %v5473_v17 = vld [vmem:[#allocation83_spill] sm:$0xff] }
 0x297   :  { %v4149_v52 = vsel %vm65_vm3, %v5408_v34, %v1142_v31  ;;  %v4207_v34 = vpop.permute.xlu0 %1137 }
 0x298   :  { %1892 = vadd.xlane.f32.xlu0 %v4061_v43  ;;  %v4171_v43 = vpop.eup %3019 }
 0x299   :  { %v4180_v27 = vpop.eup %3021 }
 0x29a   :  { %1906 = vadd.xlane.f32.xlu1 %v3012_v62  ;;  %v1204_v7 = vpop.permute.xlu1 %1203  ;;  %v634_v62 = vsel %vm65_vm3, %v5411_v33, %v5410_v49  ;;  %v3024_v22 = vpop.eup %3023  ;;  %v5421_v49 = vld [vmem:[#allocation110_spill] sm:$0xff]  ;;  %v1427_v33 = vmul.f32 %v3826_v46, %v649_v1 }
 0x29b   :  { %v4163_v58 = vsel %vm65_vm3, %v5409_v11, %v1204_v7  ;;  %v1412_v48 = vmul.f32 %v3761_v8, %v634_v62  ;;  %v1682_v7 = vsel %vm65_vm3, %v4180_v27, 0.0  ;;  %v3026_v11 = vpop.eup %3025  ;;  %v1273_v32 = vsel %vm65_vm3, %v5421_v49, %v3988_v13 }
 0x29c   :  { %1918 = vadd.xlane.f32.xlu0 %v3014_v6  ;;  %v642_v6 = vsel %vm65_vm3, %v5413_v63, %v5412_v16  ;;  %v3028_v16 = vpop.eup %3027  ;;  %v1434_v63 = vmul.f32 %v3890_v47, %v656_v39  ;;  %v1491_v1 = vsub.f32 %v1427_v33, %v1273_v32  ;;  %v1696_v45 = vsel %vm65_vm3, %v3026_v11, 0.0  ;;  %v5428_v32 = vld [vmem:[#allocation87_spill] sm:$0xff] }
 0x29d   :  { %v1420_v31 = vmul.f32 %v3790_v23, %v642_v6  ;;  %v1476_v15 = vsub.f32 %v1412_v48, %v1258_v40  ;;  %v5422_v6 = vld [vmem:[#allocation72_spill] sm:$0xff]  ;;  %v5424_v40 = vld [vmem:[#allocation117_spill] sm:$0xff]  ;;  %v5429_v33 = vld [vmem:[#allocation39_spill] sm:$0xff] }
 0x29e   :  { %1920 = vadd.xlane.f32.xlu1 %v3016_v44  ;;  %v1675_v44 = vsel %vm65_vm3, %v4171_v43, 0.0  ;;  %v663_v30 = vsel %vm65_vm3, %v5423_v59, %v5422_v6  ;;  %v1280_v13 = vsel %vm65_vm3, %v5424_v40, %v3957_v26  ;;  %v5425_v48 = vld [vmem:[#allocation81_spill] sm:$0xff]  ;;  %v5430_v6 = vld [vmem:[#allocation131_spill] sm:$0xff]  ;;  %v5432_v40 = vld [vmem:[#allocation38_spill] sm:$0xff] }
 0x29f   :  { %v1484_v62 = vsub.f32 %v1420_v31, %v1266_v50  ;;  %v1546_v41 = vmul.f32 1.442695, %v1476_v15  ;;  %v3030_v50 = vpop.eup %3029  ;;  %v5427_v31 = vld [vmem:[#allocation122_spill] sm:$0xff]  ;;  %v1441_v26 = vmul.f32 %v3971_v55, %v663_v30  ;;  %v1498_v39 = vsub.f32 %v1434_v63, %v1280_v13 }
 0x2a0   :  { %1736 = vadd.xlane.f32.xlu0 %v1667_v29  ;;  %v1689_v29 = vsel %vm65_vm3, %v3024_v22, 0.0  ;;  %v1287_v61 = vsel %vm65_vm3, %v5427_v31, %v4008_v12  ;;  %v1702_v15 = vsel %vm65_vm3, %v3028_v16, 0.0  ;;  %v1294_v12 = vsel %vm65_vm3, %v5430_v6, %v3982_v37  ;;  %v5431_v30 = vld [vmem:[#allocation86_spill] sm:$0xff] }
 0x2a1   :  { %v1562_v21 = vmul.f32 1.442695, %v1484_v62  ;;  %3031 = vpow2.f32 %v1546_v41  ;;  %v1576_v62 = vmul.f32 1.442695, %v1491_v1  ;;  %v1505_v63 = vsub.f32 %v1441_v26, %v1287_v61  ;;  %v5434_v1 = vld [vmem:[#allocation136_spill] sm:$0xff] }
 0x2a2   :  { %1752 = vadd.xlane.f32.xlu1 %v1675_v44  ;;  %v5426_v44 = vld [vmem:[#allocation33_spill] sm:$0xff]  ;;  %v1703_v59 = vsel %vm65_vm3, %v3030_v50, 0.0  ;;  %v677_v13 = vsel %vm65_vm3, %v5432_v40, %v5431_v30  ;;  %v5439_v30 = vld [vmem:[#allocation152_spill] sm:$0xff]  ;;  %v5440_v40 = vld [vmem:[#allocation103_spill] sm:$0xff] }
 0x2a3   :  { %v670_v42 = vsel %vm65_vm3, %v5426_v44, %v5425_v48  ;;  %v5433_v48 = vld [vmem:[#allocation137_spill] sm:$0xff]  ;;  %3033 = vpow2.f32 %v1562_v21  ;;  %v1455_v31 = vmul.f32 %v4152_v60, %v677_v13  ;;  %v1604_v61 = vmul.f32 1.442695, %v1505_v63  ;;  %v5438_v63 = vld [vmem:[#allocation10_spill] sm:$0xff] }
 0x2a4   :  { %1766 = vadd.xlane.f32.xlu0 %v1682_v7  ;;  %v4239_v7 = vpop.permute.xlu0 %1199  ;;  %v1448_v49 = vmul.f32 %v4096_v56, %v670_v42  ;;  %v1300_v44 = vsel %vm65_vm3, %v5433_v48, %v4018_v14  ;;  %v1590_v42 = vmul.f32 1.442695, %v1498_v39  ;;  %3035 = vpow2.f32 %v1576_v62  ;;  %v5437_v62 = vld [vmem:[#allocation58_spill] sm:$0xff] }
 0x2a5   :  { %v1259_v13 = vsel %vm65_vm3, %v5440_v40, %v5439_v30  ;;  %v5449_v30 = vld [vmem:[#allocation116_spill] sm:$0xff] }
 0x2a6   :  { %1780 = vadd.xlane.f32.xlu1 %v1689_v29  ;;  %v676_v29 = vsel %vm65_vm3, %v5429_v33, %v5428_v32  ;;  %v1512_v41 = vsub.f32 %v1448_v49, %v1294_v12  ;;  %3037 = vpow2.f32 %v1590_v42 }
 0x2a7   :  { %v1454_v37 = vmul.f32 %v4152_v60, %v676_v29  ;;  %3039 = vpow2.f32 %v1604_v61  ;;  %v5436_v29 = vld [vmem:[#allocation8_spill] sm:$0xff] }
 0x2a8   :  { %1794 = vadd.xlane.f32.xlu0 %v1696_v45  ;;  %v1301_v45 = vsel %vm65_vm3, %v5434_v1, %v4004_v57  ;;  %v1618_v14 = vmul.f32 1.442695, %v1512_v41  ;;  %v5441_v41 = vld [vmem:[#allocation63_spill] sm:$0xff] }
 0x2a9   :  { %v1518_v26 = vsub.f32 %v1454_v37, %v1300_v44  ;;  %v1519_v21 = vsub.f32 %v1455_v31, %v1301_v45  ;;  %v5442_v1 = vld [vmem:[#allocation15_spill] sm:$0xff] }
 0x2aa   :  { %1806 = vadd.xlane.f32.xlu1 %v1702_v15  ;;  %v4269_v15 = vpop.permute.xlu0 %1110  ;;  %3041 = vpow2.f32 %v1618_v14  ;;  %v650_v45 = vsel %vm65_vm3, %v5442_v1, %v5441_v41  ;;  %v5443_v31 = vld [vmem:[#allocation107_spill] sm:$0xff]  ;;  %v4325_v14 = vpop.permute.xlu1 %1145  ;;  %v1365_v1 = vcombine.high %v4064_v25, %v4064_v25 }
 0x2ab   :  { %v1630_v39 = vmul.f32 1.442695, %v1518_v26  ;;  %v1632_v57 = vmul.f32 1.442695, %v1519_v21  ;;  %v1267_v61 = vsel %vm65_vm3, %v5443_v31, %v4039_v35  ;;  %v5451_v31 = vld [vmem:[#allocation32_spill] sm:$0xff] }
 0x2ac   :  { %1808 = vadd.xlane.f32.xlu0 %v1703_v59  ;;  %v643_v59 = vsel %vm65_vm3, %v5438_v63, %v5437_v62  ;;  %v5447_v62 = vld [vmem:[#allocation75_spill] sm:$0xff] }
 0x2ad   :  { %3043 = vpow2.f32 %v1630_v39  ;;  %v5448_v63 = vld [vmem:[#allocation27_spill] sm:$0xff] }
 0x2ae   :  { %1864 = vadd.xlane.f32.xlu1 %v4165_v38  ;;  %v4273_v38 = vpop.permute.xlu0 %1172  ;;  %v4275_v49 = vpop.eup %3031  ;;  %3045 = vpow2.f32 %v1632_v57  ;;  %v5444_v57 = vld [vmem:[#allocation66_spill] sm:$0xff] }
 0x2b0   :  { %1880 = vadd.xlane.f32.xlu0 %v4171_v43  ;;  %v4277_v32 = vpop.eup %3033 }
 0x2b2   :  { %1894 = vadd.xlane.f32.xlu1 %v4180_v27  ;;  %v4279_v43 = vpop.permute.xlu0 %1234  ;;  %v1668_v27 = vsel %vm65_vm3, %v4275_v49, 0.0 }
 0x2b4   :  { %1908 = vadd.xlane.f32.xlu0 %v3024_v22  ;;  %v4284_v22 = vpop.eup %3035 }
 0x2b5   :  { %v4289_v33 = vpop.eup %3037  ;;  %v1683_v6 = vsel %vm65_vm3, %v4284_v22, 0.0 }
 0x2b6   :  { %1922 = vadd.xlane.f32.xlu1 %v3026_v11  ;;  %v1676_v11 = vsel %vm65_vm3, %v4277_v32, 0.0  ;;  %v4298_v12 = vpop.eup %3039  ;;  %v4309_v44 = vpop.permute.xlu0 %1176  ;;  %v1690_v37 = vsel %vm65_vm3, %v4289_v33, 0.0 }
 0x2b7   :  { %v4314_v42 = vpop.eup %3041  ;;  %v1697_v21 = vsel %vm65_vm3, %v4298_v12, 0.0 }
 0x2b8   :  { %1934 = vadd.xlane.f32.xlu0 %v3028_v16  ;;  %v5435_v16 = vld [vmem:[#allocation55_spill] sm:$0xff] }
 0x2ba   :  { %1936 = vadd.xlane.f32.xlu1 %v3030_v50  ;;  %v635_v50 = vsel %vm65_vm3, %v5436_v29, %v5435_v16  ;;  %v4330_v39 = vpop.eup %3043  ;;  %v5446_v16 = vld [vmem:[#allocation113_spill] sm:$0xff] }
 0x2bb   :  { %v1413_v48 = vmul.f32 %v3761_v8, %v635_v50  ;;  %v1421_v8 = vmul.f32 %v3790_v23, %v643_v59  ;;  %v1274_v35 = vsel %vm65_vm3, %v5446_v16, %v4012_v53  ;;  %v1428_v23 = vmul.f32 %v3826_v46, %v650_v45  ;;  %v5450_v45 = vld [vmem:[#allocation80_spill] sm:$0xff]  ;;  %v5454_v16 = vld [vmem:[#allocation41_spill] sm:$0xff] }
 0x2bc   :  { %1738 = vadd.xlane.f32.xlu0 %v1668_v27  ;;  %v5445_v27 = vld [vmem:[#allocation18_spill] sm:$0xff]  ;;  %v1704_v50 = vsel %vm65_vm3, %v4314_v42, 0.0  ;;  %v664_v59 = vsel %vm65_vm3, %v5448_v63, %v5447_v62  ;;  %v1281_v53 = vsel %vm65_vm3, %v5449_v30, %v4089_v36  ;;  %v1710_v41 = vsel %vm65_vm3, %v4330_v39, 0.0  ;;  %v5452_v36 = vld [vmem:[#allocation125_spill] sm:$0xff]  ;;  %v5457_v30 = vld [vmem:[#allocation47_spill] sm:$0xff] }
 0x2bd   :  { %v1477_v26 = vsub.f32 %v1413_v48, %v1259_v13  ;;  %v1485_v29 = vsub.f32 %v1421_v8, %v1267_v61  ;;  %v1492_v48 = vsub.f32 %v1428_v23, %v1274_v35  ;;  %v671_v61 = vsel %vm65_vm3, %v5451_v31, %v5450_v45  ;;  %v5455_v23 = vld [vmem:[#allocation130_spill] sm:$0xff] }
 0x2be   :  { %1754 = vadd.xlane.f32.xlu1 %v1676_v11  ;;  %v657_v11 = vsel %vm65_vm3, %v5445_v27, %v5444_v57  ;;  %v1288_v8 = vsel %vm65_vm3, %v5452_v36, %v4016_v4  ;;  %v4371_v27 = vpop.permute.xlu1 %1207  ;;  %v1295_v4 = vsel %vm65_vm3, %v5455_v23, %v4123_v3  ;;  %v4386_v63 = vrot.slane %v1365_v1, %v3182_v9  ;;  %v5459_v9 = vld [vmem:[#allocation94_spill] sm:$0xff] }
 0x2bf   :  { %v1435_v40 = vmul.f32 %v3890_v47, %v657_v11  ;;  %v1548_v13 = vmul.f32 1.442695, %v1477_v26  ;;  %v1442_v26 = vmul.f32 %v3971_v55, %v664_v59  ;;  %v5453_v11 = vld [vmem:[#allocation89_spill] sm:$0xff]  ;;  %v5456_v59 = vld [vmem:[#allocation95_spill] sm:$0xff]  ;;  %v5460_v1 = vld [vmem:[#allocation46_spill] sm:$0xff] }
 0x2c0   :  { %1768 = vadd.xlane.f32.xlu0 %v1683_v6  ;;  %v4344_v6 = vpop.eup %3045  ;;  %v678_v35 = vsel %vm65_vm3, %v5454_v16, %v5453_v11  ;;  %v685_v31 = vsel %vm65_vm3, %v5460_v1, %v5459_v9 }
 0x2c1   :  { %v1499_v57 = vsub.f32 %v1435_v40, %v1281_v53  ;;  %v1711_v25 = vsel %vm65_vm3, %v4344_v6, 0.0  ;;  %3047 = vpow2.f32 %v1548_v13  ;;  %v1506_v62 = vsub.f32 %v1442_v26, %v1288_v8  ;;  %v5458_v40 = vld [vmem:[#allocation139_spill] sm:$0xff] }
 0x2c2   :  { %1782 = vadd.xlane.f32.xlu1 %v1690_v37  ;;  %v4355_v37 = vpop.permute.xlu0 %1238  ;;  %v684_v53 = vsel %vm65_vm3, %v5457_v30, %v5456_v59  ;;  %v1456_v3 = vmul.f32 %v4152_v60, %v678_v35  ;;  %v4410_v26 = vpop.permute.xlu1 %1180 }
 0x2c3   :  { %v1592_v13 = vmul.f32 1.442695, %v1499_v57 }
 0x2c4   :  { %1796 = vadd.xlane.f32.xlu0 %v1697_v21  ;;  %v1564_v21 = vmul.f32 1.442695, %v1485_v29  ;;  %v1449_v29 = vmul.f32 %v4096_v56, %v671_v61  ;;  %v5461_v61 = vld [vmem:[#allocation145_spill] sm:$0xff] }
 0x2c5   :  { %v1308_v36 = vsel %vm65_vm3, %v5461_v61, %v4144_v18 }
 0x2c6   :  { %1810 = vadd.xlane.f32.xlu1 %v1704_v50  ;;  %v1578_v50 = vmul.f32 1.442695, %v1492_v48  ;;  %3049 = vpow2.f32 %v1564_v21  ;;  %v1513_v48 = vsub.f32 %v1449_v29, %v1295_v4  ;;  %v4398_v45 = vpop.permute.xlu0 %1211  ;;  %v5462_v21 = vld [vmem:[#allocation144_spill] sm:$0xff]  ;;  %v4422_v4 = vpop.permute.xlu1 %1242 }
 0x2c7   :  { %v1309_v57 = vsel %vm65_vm3, %v5462_v21, %v4051_v51 }
 0x2c8   :  { %1822 = vadd.xlane.f32.xlu0 %v1710_v41  ;;  %v1302_v41 = vsel %vm65_vm3, %v5458_v40, %v4024_v20  ;;  %v1462_v20 = vmul.f32 %v4386_v63, %v684_v53  ;;  %3051 = vpow2.f32 %v1578_v50  ;;  %v1620_v18 = vmul.f32 1.442695, %v1513_v48 }
 0x2c9   :  { %v1520_v8 = vsub.f32 %v1456_v3, %v1302_v41  ;;  %3053 = vpow2.f32 %v1592_v13 }
 0x2ca   :  { %1824 = vadd.xlane.f32.xlu1 %v1711_v25  ;;  %v1463_v25 = vmul.f32 %v4386_v63, %v685_v31  ;;  %v1526_v11 = vsub.f32 %v1462_v20, %v1308_v36  ;;  %v4419_v35 = vpop.permute.xlu0 %1215  ;;  %v5465_v36 = vld [vmem:[#allocation62_spill] sm:$0xff] }
 0x2cb   :  { %v5466_v20 = vld [vmem:[#allocation14_spill] sm:$0xff] }
 0x2cc   :  { %1866 = vadd.xlane.f32.xlu0 %v4275_v49  ;;  %v1606_v49 = vmul.f32 1.442695, %v1506_v62  ;;  %v1527_v16 = vsub.f32 %v1463_v25, %v1309_v57  ;;  %v1646_v23 = vmul.f32 1.442695, %v1526_v11  ;;  %v5468_v11 = vld [vmem:[#allocation21_spill] sm:$0xff] }
 0x2ce   :  { %1882 = vadd.xlane.f32.xlu1 %v4277_v32  ;;  %3055 = vpow2.f32 %v1606_v49  ;;  %v1634_v32 = vmul.f32 1.442695, %v1520_v8  ;;  %v1648_v51 = vmul.f32 1.442695, %v1527_v16  ;;  %v4429_v29 = vpop.permute.xlu0 %1250  ;;  %v651_v49 = vsel %vm65_vm3, %v5466_v20, %v5465_v36  ;;  %v5469_v16 = vld [vmem:[#allocation112_spill] sm:$0xff]  ;;  %v5472_v20 = vld [vmem:[#allocation119_spill] sm:$0xff] }
 0x2cf   :  { %3057 = vpow2.f32 %v1620_v18  ;;  %5463 = vst [vmem:[#allocation106_spill] sm:$0xff] %v4429_v29  ;;  %v5467_v18 = vld [vmem:[#allocation69_spill] sm:$0xff]  ;;  %v2121_v36 = vadd.s32 4294967280, %v3747_v19  ;;  %v5474_v29 = vld [vmem:[#allocation35_spill] sm:$0xff] }
 0x2d0   :  { %1896 = vadd.xlane.f32.xlu0 %v4284_v22  ;;  %3059 = vpow2.f32 %v1634_v32  ;;  %v4425_v22 = vpop.eup %3047  ;;  %v658_v32 = vsel %vm65_vm3, %v5468_v11, %v5467_v18 }
 0x2d1   :  { %3061 = vpow2.f32 %v1646_v23  ;;  %v1275_v23 = vsel %vm65_vm3, %v5469_v16, %v4169_v0  ;;  %v1436_v18 = vmul.f32 %v3890_v47, %v658_v32 }
 0x2d2   :  { %1910 = vadd.xlane.f32.xlu1 %v4289_v33  ;;  %v2114_v33 = vadd.s32 4294967288, %v3747_v19  ;;  %3063 = vpow2.f32 %v1648_v51 }
 0x2d3   :  { %v4431_v50 = vpop.eup %3049 }
 0x2d4   :  { %1924 = vadd.xlane.f32.xlu0 %v4298_v12  ;;  %v4434_v12 = vpop.permute.xlu1 %1246 }
 0x2d5   :  { %v4439_v62 = vpop.eup %3051 }
 0x2d6   :  { %1938 = vadd.xlane.f32.xlu1 %v4314_v42  ;;  %v1669_v42 = vsel %vm65_vm3, %v4425_v22, 0.0  ;;  %v4451_v40 = vpop.eup %3053  ;;  %v1684_v3 = vsel %vm65_vm3, %v4439_v62, 0.0 }
 0x2d7   :  { %v1691_v31 = vsel %vm65_vm3, %v4451_v40, 0.0 }
 0x2d8   :  { %1950 = vadd.xlane.f32.xlu0 %v4330_v39  ;;  %v5464_v39 = vld [vmem:[#allocation5_spill] sm:$0xff] }
 0x2d9   :  { %v4442_v59 = vsub.s32 %v2114_v33, %v5464_v39  ;;  %v4446_v30 = vsub.s32 %v3747_v19, %v5464_v39 }
 0x2da   :  { %1952 = vadd.xlane.f32.xlu1 %v4344_v6  ;;  %v1677_v6 = vsel %vm65_vm3, %v4431_v50, 0.0 }
 0x2db   :  { %v4456_v13 = vpop.eup %3055 }
 0x2dc   :  { %1740 = vadd.xlane.f32.xlu0 %v1669_v42  ;;  %v4463_v61 = vpop.eup %3057  ;;  %v1698_v57 = vsel %vm65_vm3, %v4456_v13, 0.0  ;;  %v1429_v42 = vmul.f32 %v3826_v46, %v651_v49 }
 0x2dd   :  { %v1729_v53 = vpop.xlane.xlu0 %1728  ;;  %v4475_v25 = vpop.eup %3059 }
 0x2de   :  { %1756 = vadd.xlane.f32.xlu1 %v1677_v6  ;;  %v2118_v48 = vrot.slane %v1729_v53, %v4442_v59  ;;  %v5470_v6 = vld [vmem:[#allocation74_spill] sm:$0xff]  ;;  %v4496_v0 = vpop.eup %3061  ;;  %v1493_v11 = vsub.f32 %v1429_v42, %v1275_v23 }
 0x2df   :  { %v1727_v41 = vpop.xlane.xlu1 %1726 }
 0x2e0   :  { %v2113_v9 = vrot.slane %v1727_v41, %v4446_v30  ;;  %1770 = vadd.xlane.f32.xlu0 %v1684_v3  ;;  %v5471_v3 = vld [vmem:[#allocation26_spill] sm:$0xff] }
 0x2e1   :  { %v1743_v1 = vpop.xlane.xlu0 %1742 }
 0x2e2   :  { %v4470_v8 = vsel %vm2119_vm4, %v2118_v48, %v2113_v9  ;;  %1784 = vadd.xlane.f32.xlu1 %v1691_v31  ;;  %v2166_v51 = vrot.slane %v1743_v1, %v4446_v30  ;;  %v665_v48 = vsel %vm65_vm3, %v5471_v3, %v5470_v6  ;;  %v1705_v31 = vsel %vm65_vm3, %v4463_v61, 0.0  ;;  %v4507_v3 = vpop.eup %3063 }
 0x2e3   :  { %v1745_v21 = vpop.xlane.xlu1 %1744  ;;  %v1712_v6 = vsel %vm65_vm3, %v4475_v25, 0.0  ;;  %v1443_v2 = vmul.f32 %v3971_v55, %v665_v48  ;;  %v1718_v48 = vsel %vm65_vm3, %v4496_v0, 0.0 }
 0x2e4   :  { %v2170_v33 = vrot.slane %v1745_v21, %v4442_v59  ;;  %1798 = vadd.xlane.f32.xlu0 %v1698_v57  ;;  %v1282_v57 = vsel %vm65_vm3, %v5472_v20, %v4083_v5  ;;  %v672_v5 = vsel %vm65_vm3, %v5474_v29, %v5473_v17  ;;  %v4526_v17 = vsub.s32 %v2121_v36, %v5464_v39  ;;  %v5478_v29 = vld [vmem:[#allocation133_spill] sm:$0xff] }
 0x2e5   :  { %v1855_v9 = vpop.xlane.xlu0 %1854  ;;  %v1719_v36 = vsel %vm65_vm3, %v4507_v3, 0.0 }
 0x2e6   :  { %v2171_v46 = vsel %vm2119_vm4, %v2170_v33, %v2166_v51  ;;  %v1982_v49 = vsub.f32 %v1855_v9, %v1727_v41  ;;  %1812 = vadd.xlane.f32.xlu1 %v1705_v31  ;;  %v5475_v41 = vld [vmem:[#allocation124_spill] sm:$0xff]  ;;  %v1500_v9 = vsub.f32 %v1436_v18, %v1282_v57  ;;  %v1450_v57 = vmul.f32 %v4096_v56, %v672_v5 }
 0x2e7   :  { %v1857_v16 = vpop.xlane.xlu1 %1856  ;;  %v1289_v32 = vsel %vm65_vm3, %v5475_v41, %v4207_v34  ;;  %v5476_v51 = vld [vmem:[#allocation88_spill] sm:$0xff]  ;;  %v1296_v34 = vsel %vm65_vm3, %v5478_v29, %v4114_v28  ;;  %v1580_v18 = vmul.f32 1.442695, %v1493_v11 }
 0x2e8   :  { %v1983_v23 = vsub.f32 %v1857_v16, %v1729_v53  ;;  %1826 = vadd.xlane.f32.xlu0 %v1712_v6  ;;  %v5477_v33 = vld [vmem:[#allocation40_spill] sm:$0xff]  ;;  %v2518_v53 = vrot.slane %v1982_v49, %v4446_v30  ;;  %v1507_v6 = vsub.f32 %v1443_v2, %v1289_v32  ;;  %v5481_v49 = vld [vmem:[#allocation138_spill] sm:$0xff]  ;;  %v1594_v11 = vmul.f32 1.442695, %v1500_v9 }
 0x2e9   :  { %v679_v42 = vsel %vm65_vm3, %v5477_v33, %v5476_v51  ;;  %v1871_v31 = vpop.xlane.xlu0 %1870  ;;  %v5479_v51 = vld [vmem:[#allocation97_spill] sm:$0xff]  ;;  %v1514_v32 = vsub.f32 %v1450_v57, %v1296_v34  ;;  %3065 = vpow2.f32 %v1580_v18 }
 0x2ea   :  { %v2522_v20 = vrot.slane %v1983_v23, %v4442_v59  ;;  %v1990_v16 = vsub.f32 %v1871_v31, %v1743_v1  ;;  %1838 = vadd.xlane.f32.xlu1 %v1718_v48  ;;  %v5480_v33 = vld [vmem:[#allocation49_spill] sm:$0xff]  ;;  %v1303_v1 = vsel %vm65_vm3, %v5481_v49, %v4239_v7  ;;  %v1457_v2 = vmul.f32 %v4152_v60, %v679_v42  ;;  %v5482_v48 = vld [vmem:[#allocation147_spill] sm:$0xff] }
 0x2eb   :  { %v1873_v41 = vpop.xlane.xlu1 %1872  ;;  %v686_v28 = vsel %vm65_vm3, %v5480_v33, %v5479_v51  ;;  %v1310_v29 = vsel %vm65_vm3, %v5482_v48, %v4127_v10  ;;  %v1608_v42 = vmul.f32 1.442695, %v1507_v6  ;;  %3067 = vpow2.f32 %v1594_v11  ;;  %v5483_v11 = vld [vmem:[#allocation68_spill] sm:$0xff] }
 0x2ec   :  { %v2523_v23 = vsel %vm2119_vm4, %v2522_v20, %v2518_v53  ;;  %v1991_v5 = vsub.f32 %v1873_v41, %v1745_v21  ;;  %1840 = vadd.xlane.f32.xlu0 %v1719_v36  ;;  %v2557_v51 = vrot.slane %v1990_v16, %v4446_v30  ;;  %v1464_v21 = vmul.f32 %v4386_v63, %v686_v28 }
 0x2ed   :  { %v1731_v31 = vpop.xlane.xlu0 %1730  ;;  %v1521_v9 = vsub.f32 %v1457_v2, %v1303_v1  ;;  %v1622_v16 = vmul.f32 1.442695, %v1514_v32  ;;  %3069 = vpow2.f32 %v1608_v42  ;;  %v5484_v32 = vld [vmem:[#allocation20_spill] sm:$0xff] }
 0x2ee   :  { %v2561_v33 = vrot.slane %v1991_v5, %v4442_v59  ;;  %v2125_v7 = vrot.slane %v1731_v31, %v4526_v17  ;;  %1868 = vadd.xlane.f32.xlu1 %v4425_v22  ;;  %v1528_v57 = vsub.f32 %v1464_v21, %v1310_v29 }
 0x2ef   :  { %v1747_v34 = vpop.xlane.xlu1 %1746  ;;  %v1636_v18 = vmul.f32 1.442695, %v1521_v9  ;;  %3071 = vpow2.f32 %v1622_v16  ;;  %v5487_v16 = vld [vmem:[#allocation34_spill] sm:$0xff] }
 0x2f0   :  { %v2562_v53 = vsel %vm2119_vm4, %v2561_v33, %v2557_v51  ;;  %v2127_v20 = vsel %vm2126_vm5, %v2125_v7, %v4470_v8  ;;  %v2175_v10 = vrot.slane %v1747_v34, %v4526_v17  ;;  %1884 = vadd.xlane.f32.xlu0 %v4431_v50  ;;  %v1650_v8 = vmul.f32 1.442695, %v1528_v57  ;;  %v5485_v7 = vld [vmem:[#allocation118_spill] sm:$0xff] }
 0x2f1   :  { %v1759_v41 = vpop.xlane.xlu0 %1758  ;;  %3073 = vpow2.f32 %v1636_v18  ;;  %v1283_v21 = vsel %vm65_vm3, %v5485_v7, %v4269_v15  ;;  %v5491_v7 = vld [vmem:[#allocation146_spill] sm:$0xff] }
 0x2f2   :  { %v2176_v22 = vsel %vm2126_vm5, %v2175_v10, %v2171_v46  ;;  %1898 = vadd.xlane.f32.xlu1 %v4439_v62  ;;  %v2205_v36 = vrot.slane %v1759_v41, %v4446_v30  ;;  %v2128_v46 = vadd.s32 4294967272, %v3747_v19  ;;  %3075 = vpow2.f32 %v1650_v8  ;;  %v5486_v10 = vld [vmem:[#allocation82_spill] sm:$0xff] }
 0x2f3   :  { %v1761_v6 = vpop.xlane.xlu1 %1760  ;;  %v673_v57 = vsel %vm65_vm3, %v5487_v16, %v5486_v10 }
 0x2f4   :  { %v2209_v28 = vrot.slane %v1761_v6, %v4442_v59  ;;  %1912 = vadd.xlane.f32.xlu0 %v4451_v40  ;;  %v659_v40 = vsel %vm65_vm3, %v5484_v32, %v5483_v11  ;;  %v4582_v51 = vsub.s32 %v2128_v46, %v5464_v39 }
 0x2f5   :  { %v1859_v50 = vpop.xlane.xlu0 %1858  ;;  %v1437_v9 = vmul.f32 %v3890_v47, %v659_v40 }
 0x2f6   :  { %v2210_v49 = vsel %vm2119_vm4, %v2209_v28, %v2205_v36  ;;  %v1984_v1 = vsub.f32 %v1859_v50, %v1731_v31  ;;  %1926 = vadd.xlane.f32.xlu1 %v4456_v13  ;;  %v5488_v36 = vld [vmem:[#allocation132_spill] sm:$0xff] }
 0x2f7   :  { %v1875_v62 = vpop.xlane.xlu1 %1874  ;;  %v1297_v28 = vsel %vm65_vm3, %v5488_v36, %v4273_v38  ;;  %v5490_v38 = vld [vmem:[#allocation48_spill] sm:$0xff]  ;;  %v5493_v36 = vsub.f32 %v4158_v24, %v4163_v58 }
 0x2f8   :  { %v2527_v5 = vrot.slane %v1984_v1, %v4526_v17  ;;  %v1992_v2 = vsub.f32 %v1875_v62, %v1747_v34  ;;  %1940 = vadd.xlane.f32.xlu0 %v4463_v61  ;;  %v4584_v61 = vpop.eup %3065  ;;  %v1451_v1 = vmul.f32 %v4096_v56, %v673_v57 }
 0x2f9   :  { %v1887_v48 = vpop.xlane.xlu0 %1886  ;;  %v4595_v34 = vpop.eup %3067  ;;  %v1685_v47 = vsel %vm65_vm3, %v4584_v61, 0.0 }
 0x2fa   :  { %v4577_v31 = vsel %vm2126_vm5, %v2527_v5, %v2523_v23  ;;  %v2566_v13 = vrot.slane %v1992_v2, %v4526_v17  ;;  %v1998_v29 = vsub.f32 %v1887_v48, %v1759_v41  ;;  %1954 = vadd.xlane.f32.xlu1 %v4475_v25  ;;  %v1692_v62 = vsel %vm65_vm3, %v4595_v34, 0.0  ;;  %v5489_v2 = vld [vmem:[#allocation96_spill] sm:$0xff] }
 0x2fb   :  { %v1889_v33 = vpop.xlane.xlu1 %1888  ;;  %v687_v11 = vsel %vm65_vm3, %v5490_v38, %v5489_v2  ;;  %v1515_v48 = vsub.f32 %v1451_v1, %v1297_v28  ;;  %v1638_v28 = vmul.f32 1.442695, %v5493_v36  ;;  %v2135_v38 = vadd.s32 4294967264, %v3747_v19  ;;  %v5503_v36 = vld [vmem:[#allocation51_spill] sm:$0xff] }
 0x2fc   :  { %v4591_v42 = vsel %vm2126_vm5, %v2566_v13, %v2562_v53  ;;  %v1999_v23 = vsub.f32 %v1889_v33, %v1761_v6  ;;  %1966 = vadd.xlane.f32.xlu0 %v4496_v0  ;;  %v2596_v41 = vrot.slane %v1998_v29, %v4446_v30  ;;  %v1501_v0 = vsub.f32 %v1437_v9, %v1283_v21  ;;  %v4608_v6 = vpop.eup %3069 }
 0x2fd   :  { %v1733_v25 = vpop.xlane.xlu0 %1732  ;;  %v4625_v5 = vpop.eup %3071  ;;  %v1699_v29 = vsel %vm65_vm3, %v4608_v6, 0.0  ;;  %v1311_v21 = vsel %vm65_vm3, %v5491_v7, %v4279_v43  ;;  %v5492_v9 = vsub.f32 %v4137_v54, %v4149_v52 }
 0x2fe   :  { %v2600_v15 = vrot.slane %v1999_v23, %v4442_v59  ;;  %v2132_v53 = vrot.slane %v1733_v25, %v4582_v51  ;;  %1968 = vadd.xlane.f32.xlu1 %v4507_v3  ;;  %v1596_v40 = vmul.f32 1.442695, %v1501_v0  ;;  %v4638_v33 = vpop.eup %3073  ;;  %v1465_v23 = vmul.f32 %v4386_v63, %v687_v11 }
 0x2ff   :  { %v1749_v18 = vpop.xlane.xlu1 %1748  ;;  %v1610_v10 = vmul.f32 1.442695, %v5492_v9  ;;  %v1706_v57 = vsel %vm65_vm3, %v4625_v5, 0.0  ;;  %v1713_v54 = vsel %vm65_vm3, %v4638_v33, 0.0  ;;  %v5497_v9 = vld [vmem:[#allocation37_spill] sm:$0xff] }
 0x300   :  { %v4615_v8 = vsel %vm2119_vm4, %v2600_v15, %v2596_v41  ;;  %v4618_v50 = vsel %vm2133_vm6, %v2132_v53, %v2127_v20  ;;  %v2180_v3 = vrot.slane %v1749_v18, %v4582_v51  ;;  %1772 = vadd.xlane.f32.xlu0 %v1685_v47  ;;  %v4654_v41 = vpop.eup %3075  ;;  %3077 = vpow2.f32 %v1596_v40  ;;  %v5494_v40 = vld [vmem:[#allocation76_spill] sm:$0xff] }
 0x301   :  { %v1763_v46 = vpop.xlane.xlu0 %1762  ;;  %v1529_v53 = vsub.f32 %v1465_v23, %v1311_v21  ;;  %3079 = vpow2.f32 %v1610_v10  ;;  %v1720_v1 = vsel %vm65_vm3, %v4654_v41, 0.0  ;;  %v5496_v23 = vld [vmem:[#allocation85_spill] sm:$0xff] }
 0x302   :  { %v4632_v20 = vsel %vm2133_vm6, %v2180_v3, %v2176_v22  ;;  %v2214_v32 = vrot.slane %v1763_v46, %v4526_v17  ;;  %1786 = vadd.xlane.f32.xlu1 %v1692_v62  ;;  %v674_v10 = vsel %vm65_vm3, %v5497_v9, %v5496_v23 }
 0x303   :  { %v1775_v13 = vpop.xlane.xlu1 %1774  ;;  %v1652_v11 = vmul.f32 1.442695, %v1529_v53 }
 0x304   :  { %v4645_v22 = vsel %vm2126_vm5, %v2214_v32, %v2210_v49  ;;  %1800 = vadd.xlane.f32.xlu0 %v1699_v29  ;;  %v2244_v15 = vrot.slane %v1775_v13, %v4446_v30  ;;  %v1624_v49 = vmul.f32 1.442695, %v1515_v48  ;;  %v5495_v48 = vld [vmem:[#allocation28_spill] sm:$0xff] }
 0x305   :  { %v1777_v16 = vpop.xlane.xlu0 %1776 }
 0x306   :  { %v2248_v43 = vrot.slane %v1777_v16, %v4442_v59  ;;  %1814 = vadd.xlane.f32.xlu1 %v1706_v57  ;;  %3081 = vpow2.f32 %v1624_v49  ;;  %v5498_v57 = vld [vmem:[#allocation126_spill] sm:$0xff] }
 0x307   :  { %v1861_v0 = vpop.xlane.xlu1 %1860  ;;  %3083 = vpow2.f32 %v1638_v28  ;;  %v5500_v49 = vld [vmem:[#allocation42_spill] sm:$0xff] }
 0x308   :  { %v4662_v52 = vsel %vm2119_vm4, %v2248_v43, %v2244_v15  ;;  %v1985_v47 = vsub.f32 %v1861_v0, %v1733_v25  ;;  %1828 = vadd.xlane.f32.xlu0 %v1713_v54  ;;  %3085 = vpow2.f32 %v1652_v11  ;;  %v5499_v43 = vld [vmem:[#allocation90_spill] sm:$0xff]  ;;  %v5501_v54 = vld [vmem:[#allocation135_spill] sm:$0xff] }
 0x309   :  { %v1877_v3 = vpop.xlane.xlu0 %1876  ;;  %v681_v53 = vsel %vm65_vm3, %v5500_v49, %v5499_v43 }
 0x30a   :  { %v2532_v62 = vrot.slane %v1985_v47, %v4582_v51  ;;  %v1993_v2 = vsub.f32 %v1877_v3, %v1749_v18  ;;  %1842 = vadd.xlane.f32.xlu1 %v1720_v1  ;;  %v667_v18 = vsel %vm65_vm3, %v5495_v48, %v5494_v40  ;;  %v5502_v47 = vld [vmem:[#allocation99_spill] sm:$0xff]  ;;  %v5505_v48 = vld [vmem:[#allocation149_spill] sm:$0xff] }
 0x30b   :  { %v1891_v25 = vpop.xlane.xlu1 %1890  ;;  %v1445_v15 = vmul.f32 %v3971_v55, %v667_v18  ;;  %v1452_v55 = vmul.f32 %v4096_v56, %v674_v10  ;;  %v688_v28 = vsel %vm65_vm3, %v5503_v36, %v5502_v47 }
 0x30c   :  { %v4674_v32 = vsel %vm2133_vm6, %v2532_v62, %v4577_v31  ;;  %v2571_v24 = vrot.slane %v1993_v2, %v4582_v51  ;;  %v2000_v58 = vsub.f32 %v1891_v25, %v1763_v46  ;;  %1900 = vadd.xlane.f32.xlu0 %v4584_v61  ;;  %v4689_v46 = vsub.s32 %v2135_v38, %v5464_v39 }
 0x30d   :  { %v1903_v29 = vpop.xlane.xlu0 %1902  ;;  %v3078_v62 = vpop.eup %3077  ;;  %v1459_v25 = vmul.f32 %v4152_v60, %v681_v53 }
 0x30e   :  { %v4684_v7 = vsel %vm2133_vm6, %v2571_v24, %v4591_v42  ;;  %v2605_v21 = vrot.slane %v2000_v58, %v4526_v17  ;;  %v2006_v31 = vsub.f32 %v1903_v29, %v1775_v13  ;;  %1914 = vadd.xlane.f32.xlu1 %v4595_v34  ;;  %v1291_v42 = vsel %vm65_vm3, %v5498_v57, %v4325_v14  ;;  %v3080_v40 = vpop.eup %3079 }
 0x30f   :  { %v1905_v61 = vpop.xlane.xlu1 %1904  ;;  %v1298_v14 = vsel %vm65_vm3, %v5501_v54, %v4309_v44  ;;  %v1509_v3 = vsub.f32 %v1445_v15, %v1291_v42  ;;  %v5504_v44 = vld [vmem:[#allocation140_spill] sm:$0xff] }
 0x310   :  { %v4701_v13 = vsel %vm2126_vm5, %v2605_v21, %v4615_v8  ;;  %v2007_v34 = vsub.f32 %v1905_v61, %v1777_v16  ;;  %1928 = vadd.xlane.f32.xlu0 %v4608_v6  ;;  %v2635_v8 = vrot.slane %v2006_v31, %v4446_v30  ;;  %v1305_v2 = vsel %vm65_vm3, %v5504_v44, %v4371_v27  ;;  %v5508_v44 = vld [vmem:[#allocation93_spill] sm:$0xff] }
 0x311   :  { %v1735_v0 = vpop.xlane.xlu0 %1734  ;;  %v1516_v24 = vsub.f32 %v1452_v55, %v1298_v14  ;;  %v1312_v27 = vsel %vm65_vm3, %v5505_v48, %v4355_v37  ;;  %v1612_v29 = vmul.f32 1.442695, %v1509_v3  ;;  %v1523_v21 = vsub.f32 %v1459_v25, %v1305_v2  ;;  %v5509_v2 = vld [vmem:[#allocation45_spill] sm:$0xff]  ;;  %v5510_v25 = vld [vmem:[#allocation134_spill] sm:$0xff] }
 0x312   :  { %v2639_v16 = vrot.slane %v2007_v34, %v4442_v59  ;;  %v2139_v6 = vrot.slane %v1735_v0, %v4689_v46  ;;  %1942 = vadd.xlane.f32.xlu1 %v4625_v5  ;;  %v1693_v61 = vsel %vm65_vm3, %v3078_v62, 0.0 }
 0x313   :  { %v1751_v1 = vpop.xlane.xlu1 %1750  ;;  %v3082_v23 = vpop.eup %3081  ;;  %v1626_v9 = vmul.f32 1.442695, %v1516_v24  ;;  %3087 = vpow2.f32 %v1612_v29  ;;  %v1640_v15 = vmul.f32 1.442695, %v1523_v21  ;;  %v1299_v24 = vsel %vm65_vm3, %v5510_v25, %v4410_v26  ;;  %v5513_v21 = vld [vmem:[#allocation143_spill] sm:$0xff] }
 0x314   :  { %v4727_v38 = vsel %vm2119_vm4, %v2639_v16, %v2635_v8  ;;  %v4731_v5 = vsel %vm2140_vm7, %v2139_v6, %v4618_v50  ;;  %v2185_v11 = vrot.slane %v1751_v1, %v4689_v46  ;;  %1956 = vadd.xlane.f32.xlu0 %v4638_v33  ;;  %v1466_v33 = vmul.f32 %v4386_v63, %v688_v28  ;;  %v3084_v42 = vpop.eup %3083  ;;  %v5506_v16 = vld [vmem:[#allocation84_spill] sm:$0xff] }
 0x315   :  { %v1765_v58 = vpop.xlane.xlu0 %1764  ;;  %v1707_v43 = vsel %vm65_vm3, %v3082_v23, 0.0  ;;  %v3086_v49 = vpop.eup %3085  ;;  %3089 = vpow2.f32 %v1626_v9  ;;  %v5507_v6 = vld [vmem:[#allocation36_spill] sm:$0xff] }
 0x316   :  { %v4742_v18 = vsel %vm2140_vm7, %v2185_v11, %v4632_v20  ;;  %v2219_v50 = vrot.slane %v1765_v58, %v4582_v51  ;;  %1970 = vadd.xlane.f32.xlu1 %v4654_v41  ;;  %v1530_v10 = vsub.f32 %v1466_v33, %v1312_v27  ;;  %v1700_v41 = vsel %vm65_vm3, %v3080_v40, 0.0  ;;  %v5512_v33 = vld [vmem:[#allocation50_spill] sm:$0xff] }
 0x317   :  { %v1779_v31 = vpop.xlane.xlu1 %1778  ;;  %v675_v55 = vsel %vm65_vm3, %v5507_v6, %v5506_v16  ;;  %3091 = vpow2.f32 %v1640_v15  ;;  %v1721_v3 = vsel %vm65_vm3, %v3086_v49, 0.0  ;;  %v682_v11 = vsel %vm65_vm3, %v5509_v2, %v5508_v44 }
 0x318   :  { %v4751_v37 = vsel %vm2133_vm6, %v2219_v50, %v4645_v22  ;;  %v2253_v20 = vrot.slane %v1779_v31, %v4526_v17  ;;  %1788 = vadd.xlane.f32.xlu0 %v1693_v61  ;;  %v1654_v14 = vmul.f32 1.442695, %v1530_v10  ;;  %v5511_v50 = vld [vmem:[#allocation98_spill] sm:$0xff]  ;;  %v1306_v61 = vsel %vm65_vm3, %v5513_v21, %v4398_v45 }
 0x319   :  { %v4754_v57 = vpop.xlane.xlu0 %1790  ;;  %v689_v29 = vsel %vm65_vm3, %v5512_v33, %v5511_v50  ;;  %v1460_v10 = vmul.f32 %v4152_v60, %v682_v11  ;;  %v5519_v50 = vld [vmem:[#allocation142_spill] sm:$0xff] }
 0x31a   :  { %v4760_v34 = vsel %vm2126_vm5, %v2253_v20, %v4662_v52  ;;  %1802 = vadd.xlane.f32.xlu1 %v1700_v41  ;;  %v2283_v53 = vrot.slane %v4754_v57, %v4446_v30  ;;  %v1714_v52 = vsel %vm65_vm3, %v3084_v42, 0.0  ;;  %3093 = vpow2.f32 %v1654_v14 }
 0x31b   :  { %v1793_v22 = vpop.xlane.xlu1 %1792  ;;  %v1307_v33 = vsel %vm65_vm3, %v5519_v50, %v4419_v35  ;;  %v5520_v35 = vld [vmem:[#allocation151_spill] sm:$0xff] }
 0x31c   :  { %v2287_v54 = vrot.slane %v1793_v22, %v4442_v59  ;;  %1816 = vadd.xlane.f32.xlu0 %v1707_v43  ;;  %v5514_v43 = vld [vmem:[#allocation148_spill] sm:$0xff] }
 0x31d   :  { %v1863_v8 = vpop.xlane.xlu0 %1862  ;;  %v1313_v45 = vsel %vm65_vm3, %v5514_v43, %v4422_v4 }
 0x31e   :  { %v4774_v47 = vsel %vm2119_vm4, %v2287_v54, %v2283_v53  ;;  %v1986_v36 = vsub.f32 %v1863_v8, %v1735_v0  ;;  %1830 = vadd.xlane.f32.xlu1 %v1714_v52  ;;  %v1453_v0 = vmul.f32 %v4096_v56, %v675_v55  ;;  %v2142_v56 = vadd.s32 4294967256, %v3747_v19 }
 0x31f   :  { %v1879_v28 = vpop.xlane.xlu1 %1878 }
 0x320   :  { %v2537_v48 = vrot.slane %v1986_v36, %v4689_v46  ;;  %v1994_v27 = vsub.f32 %v1879_v28, %v1751_v1  ;;  %1844 = vadd.xlane.f32.xlu0 %v1721_v3  ;;  %v1517_v41 = vsub.f32 %v1453_v0, %v1299_v24 }
 0x321   :  { %v1893_v20 = vpop.xlane.xlu0 %1892 }
 0x322   :  { %v4798_v26 = vsel %vm2140_vm7, %v2537_v48, %v4674_v32  ;;  %v2576_v1 = vrot.slane %v1994_v27, %v4689_v46  ;;  %v2001_v9 = vsub.f32 %v1893_v20, %v1765_v58  ;;  %1916 = vadd.xlane.f32.xlu1 %v3078_v62  ;;  %v1467_v62 = vmul.f32 %v4386_v63, %v689_v29 }
 0x323   :  { %v1907_v15 = vpop.xlane.xlu1 %1906  ;;  %v1524_v58 = vsub.f32 %v1460_v10, %v1306_v61  ;;  %v1628_v16 = vmul.f32 1.442695, %v1517_v41 }
 0x324   :  { %v4809_v53 = vsel %vm2140_vm7, %v2576_v1, %v4684_v7  ;;  %v2610_v32 = vrot.slane %v2001_v9, %v4582_v51  ;;  %v2008_v54 = vsub.f32 %v1907_v15, %v1779_v31  ;;  %1930 = vadd.xlane.f32.xlu0 %v3080_v40  ;;  %v4820_v7 = vsub.s32 %v2142_v56, %v5464_v39  ;;  %v3088_v40 = vpop.eup %3087 }
 0x325   :  { %v1919_v14 = vpop.xlane.xlu0 %1918  ;;  %v1531_v6 = vsub.f32 %v1467_v62, %v1313_v45  ;;  %v3090_v3 = vpop.eup %3089  ;;  %3095 = vpow2.f32 %v1628_v16  ;;  %v1701_v27 = vsel %vm65_vm3, %v3088_v40, 0.0  ;;  %v1314_v56 = vsel %vm65_vm3, %v5520_v35, %v4434_v12  ;;  %v5521_v62 = vld [vmem:[#allocation100_spill] sm:$0xff] }
 0x326   :  { %v4815_v8 = vsel %vm2133_vm6, %v2610_v32, %v4701_v13  ;;  %v2644_v52 = vrot.slane %v2008_v54, %v4526_v17  ;;  %v2014_v4 = vsub.f32 %v1919_v14, %v4754_v57  ;;  %1944 = vadd.xlane.f32.xlu1 %v3082_v23  ;;  %v1642_v13 = vmul.f32 1.442695, %v1524_v58  ;;  %v5515_v57 = vld [vmem:[#allocation92_spill] sm:$0xff]  ;;  %v3092_v0 = vpop.eup %3091 }
 0x327   :  { %v1921_v31 = vpop.xlane.xlu1 %1920  ;;  %v5516_v23 = vld [vmem:[#allocation44_spill] sm:$0xff]  ;;  %v1656_v24 = vmul.f32 1.442695, %v1531_v6  ;;  %v1708_v1 = vsel %vm65_vm3, %v3090_v3, 0.0  ;;  %v3094_v9 = vpop.eup %3093  ;;  %v1715_v43 = vsel %vm65_vm3, %v3092_v0, 0.0  ;;  %v5523_v6 = vld [vmem:[#allocation106_spill] sm:$0xff] }
 0x328   :  { %v4824_v55 = vsel %vm2126_vm5, %v2644_v52, %v4727_v38  ;;  %v2015_v36 = vsub.f32 %v1921_v31, %v1793_v22  ;;  %1958 = vadd.xlane.f32.xlu0 %v3084_v42  ;;  %v683_v44 = vsel %vm65_vm3, %v5516_v23, %v5515_v57  ;;  %v2674_v2 = vrot.slane %v2014_v4, %v4446_v30  ;;  %v5517_v22 = vld [vmem:[#allocation101_spill] sm:$0xff]  ;;  %v5522_v58 = vld [vmem:[#allocation52_spill] sm:$0xff]  ;;  %v5524_v31 = vld [vmem:[#allocation150_spill] sm:$0xff] }
 0x329   :  { %v4826_v28 = vpop.xlane.xlu0 %1736  ;;  %v5518_v42 = vld [vmem:[#allocation53_spill] sm:$0xff]  ;;  %v1461_v61 = vmul.f32 %v4152_v60, %v683_v44  ;;  %3097 = vpow2.f32 %v1642_v13  ;;  %v1722_v54 = vsel %vm65_vm3, %v3094_v9, 0.0  ;;  %v691_v14 = vsel %vm65_vm3, %v5522_v58, %v5521_v62 }
 0x32a   :  { %v2678_v11 = vrot.slane %v2015_v36, %v4442_v59  ;;  %v2146_v38 = vrot.slane %v4826_v28, %v4820_v7  ;;  %1972 = vadd.xlane.f32.xlu1 %v3086_v49  ;;  %v690_v25 = vsel %vm65_vm3, %v5518_v42, %v5517_v22  ;;  %3099 = vpow2.f32 %v1656_v24 }
 0x32b   :  { %v1753_v48 = vpop.xlane.xlu1 %1752  ;;  %v1468_v60 = vmul.f32 %v4386_v63, %v690_v25  ;;  %v1525_v41 = vsub.f32 %v1461_v61, %v1307_v33  ;;  %v1315_v36 = vsel %vm65_vm3, %v5524_v31, %v5523_v6  ;;  %v1469_v57 = vmul.f32 %v4386_v63, %v691_v14 }
 0x32c   :  { %v4847_v29 = vsel %vm2119_vm4, %v2678_v11, %v2674_v2  ;;  %v4851_v49 = vsel %vm2147_vm8, %v2146_v38, %v4731_v5  ;;  %v2190_v21 = vrot.slane %v1753_v48, %v4820_v7  ;;  %1804 = vadd.xlane.f32.xlu0 %v1701_v27 }
 0x32d   :  { %v1767_v20 = vpop.xlane.xlu0 %1766  ;;  %v1644_v4 = vmul.f32 1.442695, %v1525_v41  ;;  %v1533_v11 = vsub.f32 %v1469_v57, %v1315_v36 }
 0x32e   :  { %v4863_v5 = vsel %vm2147_vm8, %v2190_v21, %v4742_v18  ;;  %v2224_v10 = vrot.slane %v1767_v20, %v4689_v46  ;;  %1818 = vadd.xlane.f32.xlu1 %v1708_v1  ;;  %v1532_v18 = vsub.f32 %v1468_v60, %v1314_v56  ;;  %v2149_v56 = vadd.s32 4294967248, %v3747_v19 }
 0x32f   :  { %v1781_v15 = vpop.xlane.xlu1 %1780  ;;  %3101 = vpow2.f32 %v1644_v4  ;;  %v1660_v27 = vmul.f32 1.442695, %v1533_v11 }
 0x330   :  { %v4871_v45 = vsel %vm2140_vm7, %v2224_v10, %v4751_v37  ;;  %v2258_v12 = vrot.slane %v1781_v15, %v4582_v51  ;;  %1832 = vadd.xlane.f32.xlu0 %v1715_v43  ;;  %v1658_v23 = vmul.f32 1.442695, %v1532_v18  ;;  %v4929_v18 = vsub.s32 %v2149_v56, %v5464_v39 }
 0x331   :  { %v1795_v32 = vpop.xlane.xlu0 %1794 }
 0x332   :  { %v4882_v52 = vsel %vm2133_vm6, %v2258_v12, %v4760_v34  ;;  %v2292_v37 = vrot.slane %v1795_v32, %v4526_v17  ;;  %1846 = vadd.xlane.f32.xlu1 %v1722_v54  ;;  %v3096_v22 = vpop.eup %3095  ;;  %3103 = vpow2.f32 %v1658_v23 }
 0x333   :  { %v1807_v16 = vpop.xlane.xlu1 %1806  ;;  %3105 = vpow2.f32 %v1660_v27 }
 0x334   :  { %v4891_v13 = vsel %vm2126_vm5, %v2292_v37, %v4774_v47  ;;  %1932 = vadd.xlane.f32.xlu0 %v3088_v40  ;;  %v2322_v44 = vrot.slane %v1807_v16, %v4446_v30 }
 0x335   :  { %v1809_v34 = vpop.xlane.xlu0 %1808 }
 0x336   :  { %v2326_v2 = vrot.slane %v1809_v34, %v4442_v59  ;;  %1946 = vadd.xlane.f32.xlu1 %v3090_v3  ;;  %v3098_v63 = vpop.eup %3097  ;;  %v1709_v3 = vsel %vm65_vm3, %v3096_v22, 0.0 }
 0x337   :  { %v1865_v38 = vpop.xlane.xlu1 %1864  ;;  %v3100_v33 = vpop.eup %3099  ;;  %v1716_v1 = vsel %vm65_vm3, %v3098_v63, 0.0 }
 0x338   :  { %v4897_v42 = vsel %vm2119_vm4, %v2326_v2, %v2322_v44  ;;  %v1987_v47 = vsub.f32 %v1865_v38, %v4826_v28  ;;  %1960 = vadd.xlane.f32.xlu0 %v3092_v0 }
 0x339   :  { %v1881_v40 = vpop.xlane.xlu0 %1880 }
 0x33a   :  { %v2542_v25 = vrot.slane %v1987_v47, %v4820_v7  ;;  %v1995_v24 = vsub.f32 %v1881_v40, %v1753_v48  ;;  %1974 = vadd.xlane.f32.xlu1 %v3094_v9 }
 0x33b   :  { %v1895_v50 = vpop.xlane.xlu1 %1894 }
 0x33c   :  { %v4905_v21 = vsel %vm2147_vm8, %v2542_v25, %v4798_v26  ;;  %v2581_v28 = vrot.slane %v1995_v24, %v4820_v7  ;;  %v2002_v0 = vsub.f32 %v1895_v50, %v1767_v20  ;;  %1820 = vadd.xlane.f32.xlu0 %v1709_v3  ;;  %v1723_v20 = vsel %vm65_vm3, %v3100_v33, 0.0  ;;  %v3102_v62 = vpop.eup %3101 }
 0x33d   :  { %v1909_v61 = vpop.xlane.xlu0 %1908  ;;  %v1717_v6 = vsel %vm65_vm3, %v3102_v62, 0.0 }
 0x33e   :  { %v4912_v48 = vsel %vm2147_vm8, %v2581_v28, %v4809_v53  ;;  %v2615_v9 = vrot.slane %v2002_v0, %v4689_v46  ;;  %v2009_v35 = vsub.f32 %v1909_v61, %v1781_v15  ;;  %1834 = vadd.xlane.f32.xlu1 %v1716_v1 }
 0x33f   :  { %v1923_v26 = vpop.xlane.xlu1 %1922  ;;  %v3104_v14 = vpop.eup %3103 }
 0x340   :  { %v4920_v10 = vsel %vm2140_vm7, %v2615_v9, %v4815_v8  ;;  %v2649_v60 = vrot.slane %v2009_v35, %v4582_v51  ;;  %v2016_v41 = vsub.f32 %v1923_v26, %v1795_v32  ;;  %1848 = vadd.xlane.f32.xlu0 %v1723_v20  ;;  %v1724_v23 = vsel %vm65_vm3, %v3104_v14, 0.0  ;;  %v3106_v11 = vpop.eup %3105 }
 0x341   :  { %v1935_v53 = vpop.xlane.xlu0 %1934 }
 0x342   :  { %v4925_v15 = vsel %vm2133_vm6, %v2649_v60, %v4824_v55  ;;  %v2683_v43 = vrot.slane %v2016_v41, %v4526_v17  ;;  %v2022_v12 = vsub.f32 %v1935_v53, %v1807_v16  ;;  %1948 = vadd.xlane.f32.xlu1 %v3096_v22 }
 0x343   :  { %v1937_v54 = vpop.xlane.xlu1 %1936 }
 0x344   :  { %v4933_v8 = vsel %vm2126_vm5, %v2683_v43, %v4847_v29  ;;  %v2023_v32 = vsub.f32 %v1937_v54, %v1809_v34  ;;  %1962 = vadd.xlane.f32.xlu0 %v3098_v63  ;;  %v2713_v55 = vrot.slane %v2022_v12, %v4446_v30  ;;  %v1725_v63 = vsel %vm65_vm3, %v3106_v11, 0.0 }
 0x345   :  { %v1739_v58 = vpop.xlane.xlu0 %1738  ;;  %v2156_v54 = vadd.s32 4294967240, %v3747_v19 }
 0x346   :  { %v2717_v37 = vrot.slane %v2023_v32, %v4442_v59  ;;  %v2153_v4 = vrot.slane %v1739_v58, %v4929_v18  ;;  %1976 = vadd.xlane.f32.xlu1 %v3100_v33 }
 0x347   :  { %v1755_v16 = vpop.xlane.xlu1 %1754  ;;  %v5009_v19 = vsub.s32 %v2156_v54, %v5464_v39 }
 0x348   :  { %v4941_v31 = vsel %vm2119_vm4, %v2717_v37, %v2713_v55  ;;  %v4945_v29 = vsel %vm2154_vm9, %v2153_v4, %v4851_v49  ;;  %v2195_v36 = vrot.slane %v1755_v16, %v4929_v18  ;;  %1836 = vadd.xlane.f32.xlu0 %v1717_v6 }
 0x349   :  { %v1769_v57 = vpop.xlane.xlu0 %1768 }
 0x34a   :  { %v4952_v34 = vsel %vm2154_vm9, %v2195_v36, %v4863_v5  ;;  %v2229_v44 = vrot.slane %v1769_v57, %v4820_v7  ;;  %1850 = vadd.xlane.f32.xlu1 %v1724_v23  ;;  %v2841_v23 = vld [vmem:[#allocation2 + $0x20] sm:$0xff] }
 0x34b   :  { %v1783_v2 = vpop.xlane.xlu1 %1782 }
 0x34c   :  { %v4957_v49 = vsel %vm2147_vm8, %v2229_v44, %v4871_v45  ;;  %v2263_v38 = vrot.slane %v1783_v2, %v4689_v46  ;;  %1964 = vadd.xlane.f32.xlu0 %v3102_v62 }
 0x34d   :  { %v1797_v22 = vpop.xlane.xlu0 %1796 }
 0x34e   :  { %v4962_v47 = vsel %vm2140_vm7, %v2263_v38, %v4882_v52  ;;  %v2297_v5 = vrot.slane %v1797_v22, %v4582_v51  ;;  %1978 = vadd.xlane.f32.xlu1 %v3104_v14  ;;  %v2844_v14 = vld [vmem:[#allocation2 + $0x38] sm:$0xff] }
 0x34f   :  { %v1811_v40 = vpop.xlane.xlu1 %1810  ;;  %2955 = vmatprep.subr.mxu0 %v2844_v14 }
 0x350   :  { %v4969_v25 = vsel %vm2133_vm6, %v2297_v5, %v4891_v13  ;;  %v2331_v45 = vrot.slane %v1811_v40, %v4526_v17  ;;  %1852 = vadd.xlane.f32.xlu0 %v1725_v63  ;;  %2956 = vmatpush3.msra.mxu0 %v2844_v14 }
 0x351   :  { %v1823_v24 = vpop.xlane.xlu0 %1822 }
 0x352   :  { %v4974_v27 = vsel %vm2126_vm5, %v2331_v45, %v4897_v42  ;;  %1980 = vadd.xlane.f32.xlu1 %v3106_v11  ;;  %v2361_v50 = vrot.slane %v1823_v24, %v4446_v30  ;;  %v2840_v11 = vld [vmem:[#allocation2 + $0x18] sm:$0xff] }
 0x353   :  { %v1825_v52 = vpop.xlane.xlu1 %1824 }
 0x354   :  { %v2365_v3 = vrot.slane %v1825_v52, %v4442_v59 }
 0x355   :  { %v1867_v33 = vpop.xlane.xlu0 %1866 }
 0x356   :  { %v4979_v28 = vsel %vm2119_vm4, %v2365_v3, %v2361_v50  ;;  %v1988_v13 = vsub.f32 %v1867_v33, %v1739_v58 }
 0x357   :  { %v1883_v0 = vpop.xlane.xlu1 %1882 }
 0x358   :  { %v2547_v61 = vrot.slane %v1988_v13, %v4929_v18  ;;  %v1996_v1 = vsub.f32 %v1883_v0, %v1755_v16  ;;  %v2843_v16 = vld [vmem:[#allocation2 + $0x30] sm:$0xff]  ;;  %v2837_v13 = vld [vmem:[#allocation2] sm:$0xff] }
 0x359   :  { %v1897_v9 = vpop.xlane.xlu0 %1896  ;;  %2957 = vmatprep.subr.mxu0 %v2843_v16 }
 0x35a   :  { %v4984_v42 = vsel %vm2154_vm9, %v2547_v61, %v4905_v21  ;;  %v2586_v35 = vrot.slane %v1996_v1, %v4929_v18  ;;  %v2003_v56 = vsub.f32 %v1897_v9, %v1769_v57  ;;  %2958 = vmatpush3.msra.mxu0 %v2843_v16 }
 0x35b   :  { %v1911_v26 = vpop.xlane.xlu1 %1910 }
 0x35c   :  { %v4989_v20 = vsel %vm2154_vm9, %v2586_v35, %v4912_v48  ;;  %v2620_v60 = vrot.slane %v2003_v56, %v4820_v7  ;;  %v2010_v41 = vsub.f32 %v1911_v26, %v1783_v2 }
 0x35d   :  { %v1925_v53 = vpop.xlane.xlu0 %1924 }
 0x35e   :  { %v4994_v43 = vsel %vm2147_vm8, %v2620_v60, %v4920_v10  ;;  %v2654_v12 = vrot.slane %v2010_v41, %v4689_v46  ;;  %v2017_v21 = vsub.f32 %v1925_v53, %v1797_v22 }
 0x35f   :  { %v1939_v62 = vpop.xlane.xlu1 %1938 }
 0x360   :  { %v5000_v32 = vsel %vm2140_vm7, %v2654_v12, %v4925_v15  ;;  %v2688_v48 = vrot.slane %v2017_v21, %v4582_v51  ;;  %v2024_v58 = vsub.f32 %v1939_v62, %v1811_v40  ;;  %v2842_v15 = vld [vmem:[#allocation2 + $0x28] sm:$0xff]  ;;  %v2839_v40 = vld [vmem:[#allocation2 + $0x10] sm:$0xff] }
 0x361   :  { %v1951_v55 = vpop.xlane.xlu0 %1950  ;;  %2959 = vmatprep.subr.mxu0 %v2842_v15 }
 0x362   :  { %v5005_v10 = vsel %vm2133_vm6, %v2688_v48, %v4933_v8  ;;  %v2722_v37 = vrot.slane %v2024_v58, %v4526_v17  ;;  %v2030_v4 = vsub.f32 %v1951_v55, %v1823_v24  ;;  %2960 = vmatpush3.msra.mxu0 %v2842_v15 }
 0x363   :  { %v1953_v6 = vpop.xlane.xlu1 %1952  ;;  %2961 = vmatprep.subr.mxu0 %v2841_v23 }
 0x364   :  { %v5013_v36 = vsel %vm2126_vm5, %v2722_v37, %v4941_v31  ;;  %v2031_v57 = vsub.f32 %v1953_v6, %v1825_v52  ;;  %v2752_v44 = vrot.slane %v2030_v4, %v4446_v30  ;;  %2962 = vmatpush3.msra.mxu0 %v2841_v23  ;;  %v2838_v52 = vld [vmem:[#allocation2 + $0x8] sm:$0xff] }
 0x365   :  { %v1741_v8 = vpop.xlane.xlu0 %1740  ;;  %2963 = vmatprep.subr.mxu0 %v2840_v11 }
 0x366   :  { %v2756_v39 = vrot.slane %v2031_v57, %v4442_v59  ;;  %v2160_v2 = vrot.slane %v1741_v8, %v5009_v19  ;;  %2964 = vmatpush3.msra.mxu0 %v2840_v11 }
 0x367   :  { %v1757_v38 = vpop.xlane.xlu1 %1756  ;;  %2965 = vmatprep.subr.mxu0 %v2839_v40 }
 0x368   :  { %v5019_v22 = vsel %vm2119_vm4, %v2756_v39, %v2752_v44  ;;  %v2162_v31 = vsel %vm2161_vm10, %v2160_v2, %v4945_v29  ;;  %v2200_v5 = vrot.slane %v1757_v38, %v5009_v19  ;;  %2966 = vmatpush3.msra.mxu0 %v2839_v40 }
 0x369   :  { %v1771_v63 = vpop.xlane.xlu0 %1770  ;;  %2967 = vmatprep.subr.mxu0 %v2838_v52 }
 0x36a   :  { %v2201_v45 = vsel %vm2161_vm10, %v2200_v5, %v4952_v34  ;;  %v2234_v24 = vrot.slane %v1771_v63, %v4929_v18  ;;  %2968 = vmatpush3.msra.mxu0 %v2838_v52 }
 0x36b   :  { %v5028_v50 = vsel %vm2436_vm11, %v2201_v45, %v2162_v31  ;;  %v1785_v3 = vpop.xlane.xlu1 %1784  ;;  %2969 = vmatprep.subr.mxu0 %v2837_v13 }
 0x36c   :  { %v5032_v29 = vsel %vm2154_vm9, %v2234_v24, %v4957_v49  ;;  %v2268_v33 = vrot.slane %v1785_v3, %v4820_v7  ;;  %2970 = vmatpush3.msra.mxu0 %v2837_v13 }
 0x36d   :  { %v1799_v0 = vpop.xlane.xlu0 %1798 }
 0x36e   :  { %v2269_v34 = vsel %vm2147_vm8, %v2268_v33, %v4962_v47  ;;  %v2302_v61 = vrot.slane %v1799_v0, %v4689_v46 }
 0x36f   :  { %v1813_v1 = vpop.xlane.xlu1 %1812 }
 0x370   :  { %v2303_v9 = vsel %vm2140_vm7, %v2302_v61, %v4969_v25  ;;  %v2336_v49 = vrot.slane %v1813_v1, %v4582_v51 }
 0x371   :  { %v1827_v35 = vpop.xlane.xlu0 %1826 }
 0x372   :  { %v2337_v56 = vsel %vm2133_vm6, %v2336_v49, %v4974_v27  ;;  %v2370_v26 = vrot.slane %v1827_v35, %v4526_v17 }
 0x373   :  { %v1839_v60 = vpop.xlane.xlu1 %1838 }
 0x374   :  { %v2371_v47 = vsel %vm2126_vm5, %v2370_v26, %v4979_v28  ;;  %v2400_v53 = vrot.slane %v1839_v60, %v4446_v30 }
 0x375   :  { %v1841_v41 = vpop.xlane.xlu0 %1840 }
 0x376   :  { %v2404_v12 = vrot.slane %v1841_v41, %v4442_v59 }
 0x377   :  { %v1869_v21 = vpop.xlane.xlu1 %1868 }
 0x378   :  { %v2405_v25 = vsel %vm2119_vm4, %v2404_v12, %v2400_v53  ;;  %v1989_v54 = vsub.f32 %v1869_v21, %v1741_v8 }
 0x379   :  { %v1885_v62 = vpop.xlane.xlu0 %1884 }
 0x37a   :  { %v2552_v48 = vrot.slane %v1989_v54, %v5009_v19  ;;  %v1997_v58 = vsub.f32 %v1885_v62, %v1757_v38 }
 0x37b   :  { %v1899_v27 = vpop.xlane.xlu1 %1898 }
 0x37c   :  { %v2553_v14 = vsel %vm2161_vm10, %v2552_v48, %v4984_v42  ;;  %v2591_v55 = vrot.slane %v1997_v58, %v5009_v19  ;;  %v2004_v28 = vsub.f32 %v1899_v27, %v1771_v63 }
 0x37d   :  { %v1913_v37 = vpop.xlane.xlu0 %1912 }
 0x37e   :  { %v2592_v4 = vsel %vm2161_vm10, %v2591_v55, %v4989_v20  ;;  %v2625_v16 = vrot.slane %v2004_v28, %v4929_v18  ;;  %v2011_v15 = vsub.f32 %v1913_v37, %v1785_v3 }
 0x37f   :  { %v2827_v6 = vsel %vm2436_vm11, %v2592_v4, %v2553_v14  ;;  %v1927_v57 = vpop.xlane.xlu1 %1926 }
 0x380   :  { %v2626_v23 = vsel %vm2154_vm9, %v2625_v16, %v4994_v43  ;;  %v2659_v8 = vrot.slane %v2011_v15, %v4820_v7  ;;  %v2018_v44 = vsub.f32 %v1927_v57, %v1799_v0 }
 0x381   :  { %v1941_v42 = vpop.xlane.xlu0 %1940 }
 0x382   :  { %v2660_v39 = vsel %vm2147_vm8, %v2659_v8, %v5000_v32  ;;  %v2693_v2 = vrot.slane %v2018_v44, %v4689_v46  ;;  %v2025_v11 = vsub.f32 %v1941_v42, %v1813_v1 }
 0x383   :  { %v1955_v20 = vpop.xlane.xlu1 %1954 }
 0x384   :  { %v2694_v38 = vsel %vm2140_vm7, %v2693_v2, %v5005_v10  ;;  %v2727_v31 = vrot.slane %v2025_v11, %v4582_v51  ;;  %v2032_v5 = vsub.f32 %v1955_v20, %v1827_v35 }
 0x385   :  { %v1967_v40 = vpop.xlane.xlu0 %1966 }
 0x386   :  { %v2728_v43 = vsel %vm2133_vm6, %v2727_v31, %v5013_v36  ;;  %v2761_v63 = vrot.slane %v2032_v5, %v4526_v17  ;;  %v2038_v45 = vsub.f32 %v1967_v40, %v1839_v60 }
 0x387   :  { %v1969_v24 = vpop.xlane.xlu1 %1968 }
 0x388   :  { %v2762_v32 = vsel %vm2126_vm5, %v2761_v63, %v5019_v22  ;;  %v2039_v52 = vsub.f32 %v1969_v24, %v1841_v41  ;;  %v2791_v33 = vrot.slane %v2038_v45, %v4446_v30 }
 0x389   :  { %v1773_v3 = vpop.xlane.xlu0 %1772 }
 0x38a   :  { %v2795_v10 = vrot.slane %v2039_v52, %v4442_v59  ;;  %v2239_v13 = vrot.slane %v1773_v3, %v5009_v19 }
 0x38b   :  { %v1787_v0 = vpop.xlane.xlu1 %1786 }
 0x38c   :  { %v2796_v61 = vsel %vm2119_vm4, %v2795_v10, %v2791_v33  ;;  %v2240_v36 = vsel %vm2161_vm10, %v2239_v13, %v5032_v29  ;;  %v2273_v1 = vrot.slane %v1787_v0, %v4929_v18 }
 0x38d   :  { %v2439_v22 = vsel %vm2438_vm12, %v2240_v36, %v5028_v50  ;;  %v1801_v49 = vpop.xlane.xlu0 %1800 }
 0x38e   :  { %v2274_v35 = vsel %vm2154_vm9, %v2273_v1, %v2269_v34  ;;  %v2307_v30 = vrot.slane %v1801_v49, %v4820_v7 }
 0x38f   :  { %v1815_v59 = vpop.xlane.xlu1 %1814 }
 0x390   :  { %v2308_v26 = vsel %vm2147_vm8, %v2307_v30, %v2303_v9  ;;  %v2341_v60 = vrot.slane %v1815_v59, %v4689_v46 }
 0x391   :  { %v1829_v41 = vpop.xlane.xlu0 %1828 }
 0x392   :  { %v5085_v53 = vsel %vm2140_vm7, %v2341_v60, %v2337_v56  ;;  %v2375_v29 = vrot.slane %v1829_v41, %v4582_v51 }
 0x393   :  { %v1843_v12 = vpop.xlane.xlu1 %1842 }
 0x394   :  { %v5089_v21 = vsel %vm2133_vm6, %v2375_v29, %v2371_v47  ;;  %v2409_v50 = vrot.slane %v1843_v12, %v4526_v17 }
 0x395   :  { %v1901_v34 = vpop.xlane.xlu0 %1900 }
 0x396   :  { %v5093_v54 = vsel %vm2126_vm5, %v2409_v50, %v2405_v25  ;;  %v2005_v62 = vsub.f32 %v1901_v34, %v1773_v3 }
 0x397   :  { %v1915_v9 = vpop.xlane.xlu1 %1914 }
 0x398   :  { %v2630_v48 = vrot.slane %v2005_v62, %v5009_v19  ;;  %v2012_v58 = vsub.f32 %v1915_v9, %v1787_v0 }
 0x399   :  { %v1929_v27 = vpop.xlane.xlu0 %1928 }
 0x39a   :  { %v2631_v56 = vsel %vm2161_vm10, %v2630_v48, %v2626_v23  ;;  %v2664_v14 = vrot.slane %v2012_v58, %v4929_v18  ;;  %v2019_v55 = vsub.f32 %v1929_v27, %v1801_v49 }
 0x39b   :  { %v2828_v47 = vsel %vm2438_vm12, %v2631_v56, %v2827_v6  ;;  %v1943_v28 = vpop.xlane.xlu1 %1942 }
 0x39c   :  { %v2665_v37 = vsel %vm2154_vm9, %v2664_v14, %v2660_v39  ;;  %v2698_v4 = vrot.slane %v2019_v55, %v4820_v7  ;;  %v2026_v25 = vsub.f32 %v1943_v28, %v1815_v59 }
 0x39d   :  { %v1957_v16 = vpop.xlane.xlu0 %1956 }
 0x39e   :  { %v2699_v15 = vsel %vm2147_vm8, %v2698_v4, %v2694_v38  ;;  %v2732_v57 = vrot.slane %v2026_v25, %v4689_v46  ;;  %v2033_v8 = vsub.f32 %v1957_v16, %v1829_v41 }
 0x39f   :  { %v1971_v44 = vpop.xlane.xlu1 %1970 }
 0x3a0   :  { %v5104_v23 = vsel %vm2140_vm7, %v2732_v57, %v2728_v43  ;;  %v2766_v42 = vrot.slane %v2033_v8, %v4582_v51  ;;  %v2040_v2 = vsub.f32 %v1971_v44, %v1843_v12 }
 0x3a1   :  { %v1789_v6 = vpop.xlane.xlu0 %1788 }
 0x3a2   :  { %v5108_v11 = vsel %vm2133_vm6, %v2766_v42, %v2762_v32  ;;  %v2800_v39 = vrot.slane %v2040_v2, %v4526_v17  ;;  %v2278_v20 = vrot.slane %v1789_v6, %v5009_v19 }
 0x3a3   :  { %v1803_v38 = vpop.xlane.xlu1 %1802 }
 0x3a4   :  { %v5113_v31 = vsel %vm2126_vm5, %v2800_v39, %v2796_v61  ;;  %v2279_v5 = vsel %vm2161_vm10, %v2278_v20, %v2274_v35  ;;  %v2312_v0 = vrot.slane %v1803_v38, %v4929_v18 }
 0x3a5   :  { %v2441_v40 = vsel %vm2440_vm13, %v2279_v5, %v2439_v22  ;;  %v1817_v43 = vpop.xlane.xlu0 %1816 }
 0x3a6   :  { %v2313_v22 = vsel %vm2154_vm9, %v2312_v0, %v2308_v26  ;;  %v2346_v26 = vrot.slane %v1817_v43, %v4820_v7 }
 0x3a7   :  { %v5116_v63 = vpop.xlane.xlu1 %1830 }
 0x3a9   :  { %v5118_v45 = vpop.xlane.xlu0 %1844 }
 0x3ab   :  { %v1917_v24 = vpop.xlane.xlu1 %1916 }
 0x3ac   :  { %v2013_v32 = vsub.f32 %v1917_v24, %v1789_v6 }
 0x3ad   :  { %v1931_v52 = vpop.xlane.xlu0 %1930 }
 0x3ae   :  { %v2669_v17 = vrot.slane %v2013_v32, %v5009_v19  ;;  %v2020_v30 = vsub.f32 %v1931_v52, %v1803_v38 }
 0x3af   :  { %v1945_v3 = vpop.xlane.xlu1 %1944 }
 0x3b0   :  { %v2670_v33 = vsel %vm2161_vm10, %v2669_v17, %v2665_v37  ;;  %v2703_v29 = vrot.slane %v2020_v30, %v4929_v18  ;;  %v2027_v28 = vsub.f32 %v1945_v3, %v1817_v43 }
 0x3b1   :  { %v2829_v10 = vsel %vm2440_vm13, %v2670_v33, %v2828_v47  ;;  %v1959_v13 = vpop.xlane.xlu0 %1958  ;;  %v2347_v47 = vsel %vm2147_vm8, %v2346_v26, %v5085_v53  ;;  %v2380_v53 = vrot.slane %v5116_v63, %v4689_v46 }
 0x3b2   :  { %v2704_v9 = vsel %vm2154_vm9, %v2703_v29, %v2699_v15  ;;  %v2737_v44 = vrot.slane %v2027_v28, %v4820_v7 }
 0x3b3   :  { %v5123_v61 = vpop.xlane.xlu1 %1972  ;;  %v2381_v3 = vsel %vm2140_vm7, %v2380_v53, %v5089_v21 }
 0x3b4   :  { %v2738_v20 = vsel %vm2147_vm8, %v2737_v44, %v5104_v23  ;;  %v2041_v21 = vsub.f32 %v5123_v61, %v5118_v45 }
 0x3b5   :  { %v1805_v36 = vpop.xlane.xlu0 %1804 }
 0x3b6   :  { %v2317_v1 = vrot.slane %v1805_v36, %v5009_v19 }
 0x3b7   :  { %v1819_v49 = vpop.xlane.xlu1 %1818 }
 0x3b8   :  { %v2318_v35 = vsel %vm2161_vm10, %v2317_v1, %v2313_v22  ;;  %v2351_v27 = vrot.slane %v1819_v49, %v4929_v18 }
 0x3b9   :  { %v2443_v59 = vsel %vm2442_vm14, %v2318_v35, %v2441_v40  ;;  %v1833_v60 = vpop.xlane.xlu0 %1832  ;;  %v2034_v40 = vsub.f32 %v1959_v13, %v5116_v63  ;;  %v2414_v13 = vrot.slane %v5118_v45, %v4582_v51 }
 0x3ba   :  { %v2352_v4 = vsel %vm2154_vm9, %v2351_v27, %v2347_v47  ;;  %v2385_v38 = vrot.slane %v1833_v60, %v4820_v7 }
 0x3bb   :  { %v5129_v41 = vpop.xlane.xlu1 %1846  ;;  %v2415_v45 = vsel %vm2133_vm6, %v2414_v13, %v5093_v54 }
 0x3bc   :  { %v2386_v0 = vsel %vm2147_vm8, %v2385_v38, %v2381_v3  ;;  %v2419_v30 = vrot.slane %v5129_v41, %v4689_v46 }
 0x3bd   :  { %v1933_v12 = vpop.xlane.xlu0 %1932 }
 0x3be   :  { %v2021_v50 = vsub.f32 %v1933_v12, %v1805_v36  ;;  %v2771_v36 = vrot.slane %v2034_v40, %v4689_v46 }
 0x3bf   :  { %v1947_v34 = vpop.xlane.xlu1 %1946 }
 0x3c0   :  { %v2708_v62 = vrot.slane %v2021_v50, %v5009_v19  ;;  %v2028_v25 = vsub.f32 %v1947_v34, %v1819_v49  ;;  %v2772_v61 = vsel %vm2140_vm7, %v2771_v36, %v5108_v11 }
 0x3c1   :  { %v1961_v48 = vpop.xlane.xlu0 %1960 }
 0x3c2   :  { %v2709_v58 = vsel %vm2161_vm10, %v2708_v62, %v2704_v9  ;;  %v2742_v42 = vrot.slane %v2028_v25, %v4929_v18  ;;  %v2035_v52 = vsub.f32 %v1961_v48, %v1833_v60 }
 0x3c3   :  { %v2830_v56 = vsel %vm2442_vm14, %v2709_v58, %v2829_v10  ;;  %v1975_v14 = vpop.xlane.xlu1 %1974 }
 0x3c4   :  { %v2743_v43 = vsel %vm2154_vm9, %v2742_v42, %v2738_v20  ;;  %v2776_v49 = vrot.slane %v2035_v52, %v4820_v7 }
 0x3c5   :  { %v1821_v55 = vpop.xlane.xlu0 %1820 }
 0x3c6   :  { %v2356_v37 = vrot.slane %v1821_v55, %v5009_v19  ;;  %v2777_v26 = vsel %vm2147_vm8, %v2776_v49, %v2772_v61 }
 0x3c7   :  { %v1835_v16 = vpop.xlane.xlu1 %1834 }
 0x3c8   :  { %v2357_v15 = vsel %vm2161_vm10, %v2356_v37, %v2352_v4  ;;  %v2390_v24 = vrot.slane %v1835_v16, %v4929_v18 }
 0x3c9   :  { %v2445_v57 = vsel %vm2444_vm15, %v2357_v15, %v2443_v59  ;;  %v1849_v8 = vpop.xlane.xlu0 %1848  ;;  %v2042_v59 = vsub.f32 %v1975_v14, %v5129_v41  ;;  %v2805_v41 = vrot.slane %v2041_v21, %v4582_v51 }
 0x3ca   :  { %v2391_v1 = vsel %vm2154_vm9, %v2390_v24, %v2386_v0  ;;  %v2424_v50 = vrot.slane %v1849_v8, %v4820_v7 }
 0x3cb   :  { %v1949_v2 = vpop.xlane.xlu1 %1948  ;;  %v2810_v14 = vrot.slane %v2042_v59, %v4689_v46  ;;  %v2806_v46 = vsel %vm2133_vm6, %v2805_v41, %v5113_v31 }
 0x3cc   :  { %v2029_v6 = vsub.f32 %v1949_v2, %v1821_v55 }
 0x3cd   :  { %v1963_v39 = vpop.xlane.xlu0 %1962 }
 0x3ce   :  { %v2747_v5 = vrot.slane %v2029_v6, %v5009_v19  ;;  %v2036_v23 = vsub.f32 %v1963_v39, %v1835_v16  ;;  %v2942_v39 = vld [vmem:[%s5217_s3] ss:$0 sm:$0xff] }
 0x3cf   :  { %v1977_v32 = vpop.xlane.xlu1 %1976 }
 0x3d0   :  { %v2748_v17 = vsel %vm2161_vm10, %v2747_v5, %v2743_v43  ;;  %v2781_v60 = vrot.slane %v2036_v23, %v4929_v18  ;;  %v2043_v34 = vsub.f32 %v1977_v32, %v1849_v8  ;;  %v2811_v8 = vsel %vm2140_vm7, %v2810_v14, %v2806_v46 }
 0x3d1   :  { %v2831_v33 = vsel %vm2444_vm15, %v2748_v17, %v2830_v56  ;;  %v1837_v10 = vpop.xlane.xlu0 %1836  ;;  %v2420_v56 = vsel %vm2140_vm7, %v2419_v30, %v2415_v45 }
 0x3d2   :  { %v2395_v63 = vrot.slane %v1837_v10, %v5009_v19  ;;  %v2782_v55 = vsel %vm2154_vm9, %v2781_v60, %v2777_v26  ;;  %v2425_v11 = vsel %vm2147_vm8, %v2424_v50, %v2420_v56  ;;  %v2815_v47 = vrot.slane %v2043_v34, %v4820_v7 }
 0x3d3   :  { %v1851_v22 = vpop.xlane.xlu1 %1850 }
 0x3d4   :  { %v2396_v35 = vsel %vm2161_vm10, %v2395_v63, %v2391_v1  ;;  %v2429_v9 = vrot.slane %v1851_v22, %v4929_v18  ;;  %v2816_v44 = vsel %vm2147_vm8, %v2815_v47, %v2811_v8 }
 0x3d5   :  { %v2447_v29 = vsel %vm2446_vm1, %v2396_v35, %v2445_v57  ;;  %v1965_v12 = vpop.xlane.xlu0 %1964 }
 0x3d6   :  { %v2037_v62 = vsub.f32 %v1965_v12, %v1837_v10  ;;  %v2430_v37 = vsel %vm2154_vm9, %v2429_v9, %v2425_v11 }
 0x3d7   :  { %v1979_v48 = vpop.xlane.xlu1 %1978 }
 0x3d8   :  { %v2786_v58 = vrot.slane %v2037_v62, %v5009_v19  ;;  %v2044_v27 = vsub.f32 %v1979_v48, %v1851_v22 }
 0x3d9   :  { %v1853_v54 = vpop.xlane.xlu0 %1852 }
 0x3da   :  { %v2787_v28 = vsel %vm2161_vm10, %v2786_v58, %v2782_v55  ;;  %v2434_v51 = vrot.slane %v1853_v54, %v5009_v19  ;;  %v2820_v25 = vrot.slane %v2044_v27, %v4929_v18 }
 0x3db   :  { %v2832_v4 = vsel %vm2446_vm1, %v2787_v28, %v2831_v33  ;;  %v1981_v16 = vpop.xlane.xlu1 %1980 }
 0x3dc   :  { %v2435_v15 = vsel %vm2161_vm10, %v2434_v51, %v2430_v37  ;;  %v2045_v57 = vsub.f32 %v1981_v16, %v1853_v54  ;;  %v2821_v2 = vsel %vm2154_vm9, %v2820_v25, %v2816_v44 }
 0x3dd   :  { %v2449_v7 = vsel %vm2448_vm2, %v2435_v15, %v2447_v29 }
 0x3de   :  { %3107 = vrcp.f32 %v2449_v7  ;;  %v2825_v42 = vrot.slane %v2045_v57, %v5009_v19 }
 0x3e0   :  { %v2826_v18 = vsel %vm2161_vm10, %v2825_v42, %v2821_v2 }
 0x3e1   :  { %v2833_v6 = vsel %vm2448_vm2, %v2826_v18, %v2832_v4 }
 0x3e2   :  { %3109 = vrcp.f32 %v2833_v6 }
 0x3eb   :  { %v3108_v31 = vpop.eup %3107 }
 0x3ec   :  { %2971 = vmatprep.mubr.msk.f32.mxu0 %vm41_vm0, %v3108_v31 }
 0x3ef   :  { %v3110_v53 = vpop.eup %3109 }
 0x3f0   :  { %2972 = vmatmul.mubr.msk.f32.vlgmr.msra.gmra.mxu0 %vm41_vm0, %v3110_v53 }
 0x4b0   :  { %v2973_v20 = vpop.f32.mrf.mxu0 }
 0x4b1   :  { %v2930_v38 = vadd.f32 %v2973_v20, %v2942_v39 }
 0x4b2   :  { %v2924_v19 = vpop.f32.mrf.mxu0 }
 0x4b3   :  { %v2934_v5 = vmax.f32 %v2930_v38, 0.0  ;;  %v2925_v40 = vadd.f32 %v2942_v39, %v2924_v19 }
 0x4b5   :  { %2936 = vst [vmem:[%s5218_s4 + $0x8] sm:$0xff] %v2934_v5  ;;  %v2933_v43 = vmax.f32 %v2925_v40, 0.0 }
 0x4b7   :  { %2935 = vst [vmem:[%s5218_s4] sm:$0xff] %v2933_v43 }
 0x4b8   :  { %2941 = vsyncpa [#allocation3], 1 }

</bundles_post_ra>
